<compile_context>
chip_gen: v7x
topology: tpu7x:2x2x1
jax: 0.10.0
libtpu: 0.0.40
codegen_flags: <defaults>
</compile_context>

<pallas_src>
import jax
import jax.numpy as jnp
from jax import lax
from jax.experimental import pallas as pl
from jax.experimental.pallas import tpu as pltpu


def _double_conv_kernel(x_ref, w1_ref, b1_ref, w2_ref, b2_ref, o_ref):
    """One image per grid step.

    x_ref  : (1, H+2, W+2, Cin_p)  bf16, zero-padded (halo + channel pad)
    w1_ref : (9*Cin_p, Cout_p)     bf16, BN1 scale folded, taps stacked on K
    b1_ref : (1, Cout_p)           f32 folded BN1 shift
    w2_ref : (9*Cout_p, Cout_p)    bf16, BN2 scale folded, taps stacked on K
    b2_ref : (1, Cout_p)           f32 folded BN2 shift
    o_ref  : (1, H, W, Cout_p)     f32
    """
    H = o_ref.shape[1]
    W = o_ref.shape[2]

    def conv3x3(m, w_ref):
        # m: (H+2, W+2, C) f32 zero-padded activation
        # w_ref: (9*C, Cout_p) bf16 with taps stacked along the contraction dim
        # Build the (H, W, 9*C) patch (taps folded into K -> one MXU dot).
        patch = jnp.concatenate(
            [m[dy:dy + H, dx:dx + W, :] for dy in range(3) for dx in range(3)],
            axis=-1)
        patch = patch.astype(jnp.bfloat16)
        return lax.dot_general(
            patch, w_ref[...],
            dimension_numbers=(((2,), (0,)), ((), ())),
            preferred_element_type=jnp.float32)          # (H, W, Cout_p) f32

    # Input tile (bf16 in HBM/VMEM -> f32 for layout-friendly slicing).
    x = x_ref[0].astype(jnp.float32)                     # (H+2, W+2, Cin_p)

    # ---- conv1 (BN1 scale folded into weights) + shift + ReLU ----
    y1 = jnp.maximum(conv3x3(x, w1_ref) + b1_ref[0], 0.0)   # (H, W, Cout_p)

    # ---- zero-pad y1 by 1 pixel in-register (conv2 padding=1), no scratch ----
    c = y1.shape[-1]
    zrow = jnp.zeros((1, W, c), y1.dtype)
    m2 = jnp.concatenate([zrow, y1, zrow], axis=0)           # (H+2, W,   C)
    zcol = jnp.zeros((H + 2, 1, c), y1.dtype)
    m2 = jnp.concatenate([zcol, m2, zcol], axis=1)           # (H+2, W+2, C)

    # ---- conv2 (BN2 scale folded into weights) + shift + ReLU ----
    y2 = jnp.maximum(conv3x3(m2, w2_ref) + b2_ref[0], 0.0)
    o_ref[0] = y2.astype(o_ref.dtype)


def _round_up_lanes(c, lane=128):
    return ((c + lane - 1) // lane) * lane


def double_conv_pallas(x_nchw, w1, bn1, w2, bn2, eps=1e-5,
                       compute_dtype=jnp.bfloat16):
    """x_nchw: (N, Cin, H, W) f32.  w*: (3,3,in,out) HWIO f32.  bn*: dicts."""
    N, Cin, H, W = x_nchw.shape
    Cout = w1.shape[-1]
    Cin_p = _round_up_lanes(Cin)
    Cout_p = _round_up_lanes(Cout)

    # Fold BN (eval semantics) into per-channel scale / shift.
    def fold(bn):
        scale = bn["gamma"] * lax.rsqrt(bn["var"] + eps)
        shift = bn["beta"] - bn["mean"] * scale
        return scale.astype(jnp.float32), shift.astype(jnp.float32)

    s1, sh1 = fold(bn1)
    s2, sh2 = fold(bn2)

    # Fold BN scale into weights, pad channels to lane multiples, stack the
    # 3x3 taps along the contraction dim, cast to MXU dtype.
    def prep_w(w, scale, cin, cin_p):
        w = w.astype(jnp.float32) * scale[None, None, None, :]
        wp = jnp.zeros((3, 3, cin_p, Cout_p), jnp.float32)
        wp = wp.at[:, :, :cin, :Cout].set(w)
        return wp.reshape(9 * cin_p, Cout_p).astype(compute_dtype)

    w1_p = prep_w(w1, s1, Cin, Cin_p)
    w2_p = prep_w(w2, s2, Cout, Cout_p)

    def prep_b(shift):
        return jnp.zeros((1, Cout_p), jnp.float32).at[0, :Cout].set(shift)

    b1_p = prep_b(sh1)
    b2_p = prep_b(sh2)

    # NCHW -> NHWC; spatial halo + channel pad fused into a single pad op;
    # activations stored in bf16 (half the HBM->VMEM DMA bytes).
    x_nhwc = jnp.transpose(x_nchw, (0, 2, 3, 1))
    x_pad = jnp.pad(
        x_nhwc, ((0, 0), (1, 1), (1, 1), (0, Cin_p - Cin))
    ).astype(compute_dtype)

    out_nhwc = pl.pallas_call(
        _double_conv_kernel,
        out_shape=jax.ShapeDtypeStruct((N, H, W, Cout_p), jnp.float32),
        grid_spec=pltpu.PrefetchScalarGridSpec(
            num_scalar_prefetch=0,
            grid=(N,),
            in_specs=[
                pl.BlockSpec((1, H + 2, W + 2, Cin_p), lambda n: (n, 0, 0, 0)),
                pl.BlockSpec((9 * Cin_p, Cout_p), lambda n: (0, 0)),
                pl.BlockSpec((1, Cout_p), lambda n: (0, 0)),
                pl.BlockSpec((9 * Cout_p, Cout_p), lambda n: (0, 0)),
                pl.BlockSpec((1, Cout_p), lambda n: (0, 0)),
            ],
            out_specs=pl.BlockSpec((1, H, W, Cout_p), lambda n: (n, 0, 0, 0)),
        ),
        compiler_params=pltpu.CompilerParams(
            dimension_semantics=("parallel",)),
    )(x_pad, w1_p, b1_p, w2_p, b2_p)

    # Drop channel padding, NHWC -> NCHW to match the PyTorch module.
    return jnp.transpose(out_nhwc[..., :Cout], (0, 3, 1, 2))


def _reference_f32(x_nchw, w1, bn1, w2, bn2, eps=1e-5):
    """Pure-JAX full-f32 reference (module semantics)."""
    x = jnp.transpose(x_nchw, (0, 2, 3, 1))

    def conv(x, w):
        return lax.conv_general_dilated(
            x, w, window_strides=(1, 1), padding="SAME",
            dimension_numbers=("NHWC", "HWIO", "NHWC"))

    def bn_relu(y, bn):
        scale = bn["gamma"] * lax.rsqrt(bn["var"] + eps)
        shift = bn["beta"] - bn["mean"] * scale
        return jnp.maximum(y * scale + shift, 0.0)

    y = bn_relu(conv(x, w1), bn1)
    y = bn_relu(conv(y, w2), bn2)
    return jnp.transpose(y, (0, 3, 1, 2))


def _reference_matched(x_nchw, w1, bn1, w2, bn2, eps=1e-5,
                       compute_dtype=jnp.bfloat16):
    """Same math as the kernel: BN scale folded into bf16 weights, bf16
    activations into the conv, f32 accumulation, f32 shift+ReLU."""
    x = jnp.transpose(x_nchw, (0, 2, 3, 1))

    def conv_bn_relu(x, w, bn):
        scale = bn["gamma"] * lax.rsqrt(bn["var"] + eps)
        shift = bn["beta"] - bn["mean"] * scale
        w_eff = (w.astype(jnp.float32) * scale[None, None, None, :]
                 ).astype(compute_dtype)
        y = lax.conv_general_dilated(
            x.astype(compute_dtype), w_eff, window_strides=(1, 1),
            padding="SAME", dimension_numbers=("NHWC", "HWIO", "NHWC"),
            preferred_element_type=jnp.float32)
        return jnp.maximum(y + shift, 0.0)

    y = conv_bn_relu(x, w1, bn1)
    y = conv_bn_relu(y, w2, bn2)
    return jnp.transpose(y, (0, 3, 1, 2))


if __name__ == "__main__":
    key = jax.random.PRNGKey(0)
    N, Cin, Cout, H, W = 2, 4, 8, 16, 16

    k = jax.random.split(key, 8)
    x = jax.random.normal(k[0], (N, Cin, H, W), jnp.float32)

    # Conv weights in HWIO (3, 3, in, out), deterministic synthetic init.
    w1 = jax.random.normal(k[1], (3, 3, Cin, Cout), jnp.float32) * 0.2
    w2 = jax.random.normal(k[2], (3, 3, Cout, Cout), jnp.float32) * 0.2

    bn1 = dict(
        gamma=1.0 + 0.1 * jax.random.normal(k[3], (Cout,), jnp.float32),
        beta=0.1 * jax.random.normal(k[4], (Cout,), jnp.float32),
        mean=0.1 * jax.random.normal(k[5], (Cout,), jnp.float32),
        var=1.0 + 0.05 * jnp.abs(jax.random.normal(k[6], (Cout,), jnp.float32)),
    )
    bn2 = dict(
        gamma=1.0 + 0.1 * jax.random.normal(k[7], (Cout,), jnp.float32),
        beta=0.05 * jnp.ones((Cout,), jnp.float32),
        mean=jnp.zeros((Cout,), jnp.float32),
        var=jnp.ones((Cout,), jnp.float32),
    )

    out = double_conv_pallas(x, w1, bn1, w2, bn2)
    out = jax.block_until_ready(out)
    assert out.shape == (N, Cout, H, W)

    # Precision-matched reference (bf16 matmul inputs, f32 accumulation):
    # differences are accumulation-order / rounding only.
    ref_m = _reference_matched(x, w1, bn1, w2, bn2)
    assert jnp.allclose(out, ref_m, rtol=1e-2, atol=1e-2), \
        "mismatch vs matched-precision reference"

    # Gross sanity check against the full-f32 module semantics
    # (bf16 MXU path introduces ~1e-2 absolute error at these magnitudes).
    ref_f = _reference_f32(x, w1, bn1, w2, bn2)
    max_err = float(jnp.max(jnp.abs(out - ref_f)))
    assert max_err < 0.2, f"gross mismatch vs f32 reference: {max_err}"

    print("KERNEL_OK")
</pallas_src>

<mosaic_0001>
module attributes {stable_mosaic.version = 11 : i64} {
  func.func @_double_conv_kernel(%arg0: i32, %arg1: memref<1x18x18x128xbf16, #tpu.memory_space<vmem>>, %arg2: memref<1152x128xbf16, #tpu.memory_space<vmem>>, %arg3: memref<1x128xf32, #tpu.memory_space<vmem>>, %arg4: memref<1152x128xbf16, #tpu.memory_space<vmem>>, %arg5: memref<1x128xf32, #tpu.memory_space<vmem>>, %arg6: memref<1x16x16x128xf32, #tpu.memory_space<vmem>>) attributes {dimension_semantics = [#tpu.dimension_semantics<parallel>], iteration_bounds = array<i64: 2>, scalar_prefetch = 0 : i64, scratch_operands = 0 : i64, tpu.core_type = #tpu.core_type<tc>, window_params = [{transform_indices = @transform_0, window_bounds = array<i64: 1, 18, 18, 128>}, {pipeline_mode = #tpu.pipeline_mode<synchronous>, transform_indices = @transform_1, window_bounds = array<i64: 1152, 128>}, {pipeline_mode = #tpu.pipeline_mode<synchronous>, transform_indices = @transform_2, window_bounds = array<i64: 1, 128>}, {pipeline_mode = #tpu.pipeline_mode<synchronous>, transform_indices = @transform_3, window_bounds = array<i64: 1152, 128>}, {pipeline_mode = #tpu.pipeline_mode<synchronous>, transform_indices = @transform_4, window_bounds = array<i64: 1, 128>}, {transform_indices = @transform_5, window_bounds = array<i64: 1, 16, 16, 128>}]} {
    %c0 = arith.constant 0 : index
    %c0_0 = arith.constant 0 : index
    %c0_1 = arith.constant 0 : index
    %c0_2 = arith.constant 0 : index
    %0 = vector.load %arg1[%c0, %c0_0, %c0_1, %c0_2] : memref<1x18x18x128xbf16, #tpu.memory_space<vmem>>, vector<1x18x18x128xbf16>
    %1 = vector.shape_cast %0 : vector<1x18x18x128xbf16> to vector<18x18x128xbf16>
    %2 = arith.extf %1 : vector<18x18x128xbf16> to vector<18x18x128xf32>
    %3 = vector.extract_strided_slice %2 {offsets = [0, 0, 0], sizes = [16, 16, 128], strides = [1, 1, 1]} : vector<18x18x128xf32> to vector<16x16x128xf32>
    %4 = vector.extract_strided_slice %2 {offsets = [0, 1, 0], sizes = [16, 16, 128], strides = [1, 1, 1]} : vector<18x18x128xf32> to vector<16x16x128xf32>
    %5 = vector.extract_strided_slice %2 {offsets = [0, 2, 0], sizes = [16, 16, 128], strides = [1, 1, 1]} : vector<18x18x128xf32> to vector<16x16x128xf32>
    %6 = vector.extract_strided_slice %2 {offsets = [1, 0, 0], sizes = [16, 16, 128], strides = [1, 1, 1]} : vector<18x18x128xf32> to vector<16x16x128xf32>
    %7 = vector.extract_strided_slice %2 {offsets = [1, 1, 0], sizes = [16, 16, 128], strides = [1, 1, 1]} : vector<18x18x128xf32> to vector<16x16x128xf32>
    %8 = vector.extract_strided_slice %2 {offsets = [1, 2, 0], sizes = [16, 16, 128], strides = [1, 1, 1]} : vector<18x18x128xf32> to vector<16x16x128xf32>
    %9 = vector.extract_strided_slice %2 {offsets = [2, 0, 0], sizes = [16, 16, 128], strides = [1, 1, 1]} : vector<18x18x128xf32> to vector<16x16x128xf32>
    %10 = vector.extract_strided_slice %2 {offsets = [2, 1, 0], sizes = [16, 16, 128], strides = [1, 1, 1]} : vector<18x18x128xf32> to vector<16x16x128xf32>
    %11 = vector.extract_strided_slice %2 {offsets = [2, 2, 0], sizes = [16, 16, 128], strides = [1, 1, 1]} : vector<18x18x128xf32> to vector<16x16x128xf32>
    %12 = tpu.concatenate %3, %4, %5, %6, %7, %8, %9, %10, %11 in 2 : vector<16x16x128xf32>, vector<16x16x128xf32>, vector<16x16x128xf32>, vector<16x16x128xf32>, vector<16x16x128xf32>, vector<16x16x128xf32>, vector<16x16x128xf32>, vector<16x16x128xf32>, vector<16x16x128xf32> -> vector<16x16x1152xf32>
    %13 = arith.truncf %12 : vector<16x16x1152xf32> to vector<16x16x1152xbf16>
    %c0_3 = arith.constant 0 : index
    %c0_4 = arith.constant 0 : index
    %14 = vector.load %arg2[%c0_3, %c0_4] : memref<1152x128xbf16, #tpu.memory_space<vmem>>, vector<1152x128xbf16>
    %cst = arith.constant dense<0.000000e+00> : vector<16x16x128xf32>
    %15 = tpu.matmul %13, %14, %cst {dimension_numbers = #tpu.dot_dimension_numbers<[2], [0], [0, 1], [1], [0, 0, 0, 1, 1, 1], [], []>} : vector<16x16x1152xbf16>, vector<1152x128xbf16>, vector<16x16x128xf32> -> vector<16x16x128xf32>
    %c0_5 = arith.constant 0 : index
    %c0_6 = arith.constant 0 : index
    %16 = vector.load %arg3[%c0_5, %c0_6] : memref<1x128xf32, #tpu.memory_space<vmem>>, vector<1x128xf32>
    %17 = vector.shape_cast %16 : vector<1x128xf32> to vector<128xf32>
    %18 = vector.shape_cast %17 : vector<128xf32> to vector<1x1x128xf32>
    %19 = vector.broadcast %18 : vector<1x1x128xf32> to vector<16x16x128xf32>
    %20 = arith.addf %15, %19 : vector<16x16x128xf32>
    %cst_7 = arith.constant 0.000000e+00 : f32
    %21 = vector.broadcast %cst_7 : f32 to vector<16x16x128xf32>
    %22 = arith.maximumf %20, %21 : vector<16x16x128xf32>
    %cst_8 = arith.constant 0.000000e+00 : f32
    %23 = vector.broadcast %cst_8 : f32 to vector<1x16x128xf32>
    %24 = tpu.concatenate %23, %22, %23 in 0 : vector<1x16x128xf32>, vector<16x16x128xf32>, vector<1x16x128xf32> -> vector<18x16x128xf32>
    %cst_9 = arith.constant 0.000000e+00 : f32
    %25 = vector.broadcast %cst_9 : f32 to vector<18x1x128xf32>
    %26 = tpu.concatenate %25, %24, %25 in 1 : vector<18x1x128xf32>, vector<18x16x128xf32>, vector<18x1x128xf32> -> vector<18x18x128xf32>
    %27 = vector.extract_strided_slice %26 {offsets = [0, 0, 0], sizes = [16, 16, 128], strides = [1, 1, 1]} : vector<18x18x128xf32> to vector<16x16x128xf32>
    %28 = vector.extract_strided_slice %26 {offsets = [0, 1, 0], sizes = [16, 16, 128], strides = [1, 1, 1]} : vector<18x18x128xf32> to vector<16x16x128xf32>
    %29 = vector.extract_strided_slice %26 {offsets = [0, 2, 0], sizes = [16, 16, 128], strides = [1, 1, 1]} : vector<18x18x128xf32> to vector<16x16x128xf32>
    %30 = vector.extract_strided_slice %26 {offsets = [1, 0, 0], sizes = [16, 16, 128], strides = [1, 1, 1]} : vector<18x18x128xf32> to vector<16x16x128xf32>
    %31 = vector.extract_strided_slice %26 {offsets = [1, 1, 0], sizes = [16, 16, 128], strides = [1, 1, 1]} : vector<18x18x128xf32> to vector<16x16x128xf32>
    %32 = vector.extract_strided_slice %26 {offsets = [1, 2, 0], sizes = [16, 16, 128], strides = [1, 1, 1]} : vector<18x18x128xf32> to vector<16x16x128xf32>
    %33 = vector.extract_strided_slice %26 {offsets = [2, 0, 0], sizes = [16, 16, 128], strides = [1, 1, 1]} : vector<18x18x128xf32> to vector<16x16x128xf32>
    %34 = vector.extract_strided_slice %26 {offsets = [2, 1, 0], sizes = [16, 16, 128], strides = [1, 1, 1]} : vector<18x18x128xf32> to vector<16x16x128xf32>
    %35 = vector.extract_strided_slice %26 {offsets = [2, 2, 0], sizes = [16, 16, 128], strides = [1, 1, 1]} : vector<18x18x128xf32> to vector<16x16x128xf32>
    %36 = tpu.concatenate %27, %28, %29, %30, %31, %32, %33, %34, %35 in 2 : vector<16x16x128xf32>, vector<16x16x128xf32>, vector<16x16x128xf32>, vector<16x16x128xf32>, vector<16x16x128xf32>, vector<16x16x128xf32>, vector<16x16x128xf32>, vector<16x16x128xf32>, vector<16x16x128xf32> -> vector<16x16x1152xf32>
    %37 = arith.truncf %36 : vector<16x16x1152xf32> to vector<16x16x1152xbf16>
    %c0_10 = arith.constant 0 : index
    %c0_11 = arith.constant 0 : index
    %38 = vector.load %arg4[%c0_10, %c0_11] : memref<1152x128xbf16, #tpu.memory_space<vmem>>, vector<1152x128xbf16>
    %cst_12 = arith.constant dense<0.000000e+00> : vector<16x16x128xf32>
    %39 = tpu.matmul %37, %38, %cst_12 {dimension_numbers = #tpu.dot_dimension_numbers<[2], [0], [0, 1], [1], [0, 0, 0, 1, 1, 1], [], []>} : vector<16x16x1152xbf16>, vector<1152x128xbf16>, vector<16x16x128xf32> -> vector<16x16x128xf32>
    %c0_13 = arith.constant 0 : index
    %c0_14 = arith.constant 0 : index
    %40 = vector.load %arg5[%c0_13, %c0_14] : memref<1x128xf32, #tpu.memory_space<vmem>>, vector<1x128xf32>
    %41 = vector.shape_cast %40 : vector<1x128xf32> to vector<128xf32>
    %42 = vector.shape_cast %41 : vector<128xf32> to vector<1x1x128xf32>
    %43 = vector.broadcast %42 : vector<1x1x128xf32> to vector<16x16x128xf32>
    %44 = arith.addf %39, %43 : vector<16x16x128xf32>
    %cst_15 = arith.constant 0.000000e+00 : f32
    %45 = vector.broadcast %cst_15 : f32 to vector<16x16x128xf32>
    %46 = arith.maximumf %44, %45 : vector<16x16x128xf32>
    %c0_16 = arith.constant 0 : index
    %c0_17 = arith.constant 0 : index
    %c0_18 = arith.constant 0 : index
    %c0_19 = arith.constant 0 : index
    %47 = vector.load %arg6[%c0_16, %c0_17, %c0_18, %c0_19] : memref<1x16x16x128xf32, #tpu.memory_space<vmem>>, vector<1x16x16x128xf32>
    %48 = vector.shape_cast %47 : vector<1x16x16x128xf32> to vector<16x16x128xf32>
    %49 = vector.shape_cast %46 : vector<16x16x128xf32> to vector<1x16x16x128xf32>
    tpu.vector_store %arg6[%c0_16, %c0_17, %c0_18, %c0_19], %49 {strides = array<i32>} : memref<1x16x16x128xf32, #tpu.memory_space<vmem>>, vector<1x16x16x128xf32>,
    return
  }
  func.func @transform_0(%arg0: i32) -> (i32, i32, i32, i32) {
    %c0_i32 = arith.constant 0 : i32
    %c0_i32_0 = arith.constant 0 : i32
    %c0_i32_1 = arith.constant 0 : i32
    %c0_i32_2 = arith.constant 0 : i32
    return %arg0, %c0_i32, %c0_i32_0, %c0_i32_1 : i32, i32, i32, i32
  }
  func.func @transform_1(%arg0: i32) -> (i32, i32) {
    %c0_i32 = arith.constant 0 : i32
    %c0_i32_0 = arith.constant 0 : i32
    %c0_i32_1 = arith.constant 0 : i32
    return %c0_i32, %c0_i32_0 : i32, i32
  }
  func.func @transform_2(%arg0: i32) -> (i32, i32) {
    %c0_i32 = arith.constant 0 : i32
    %c0_i32_0 = arith.constant 0 : i32
    %c0_i32_1 = arith.constant 0 : i32
    return %c0_i32, %c0_i32_0 : i32, i32
  }
  func.func @transform_3(%arg0: i32) -> (i32, i32) {
    %c0_i32 = arith.constant 0 : i32
    %c0_i32_0 = arith.constant 0 : i32
    %c0_i32_1 = arith.constant 0 : i32
    return %c0_i32, %c0_i32_0 : i32, i32
  }
  func.func @transform_4(%arg0: i32) -> (i32, i32) {
    %c0_i32 = arith.constant 0 : i32
    %c0_i32_0 = arith.constant 0 : i32
    %c0_i32_1 = arith.constant 0 : i32
    return %c0_i32, %c0_i32_0 : i32, i32
  }
  func.func @transform_5(%arg0: i32) -> (i32, i32, i32, i32) {
    %c0_i32 = arith.constant 0 : i32
    %c0_i32_0 = arith.constant 0 : i32
    %c0_i32_1 = arith.constant 0 : i32
    %c0_i32_2 = arith.constant 0 : i32
    return %arg0, %c0_i32, %c0_i32_0, %c0_i32_1 : i32, i32, i32, i32
  }
}

</mosaic_0001>

<bundles_post_ra>
// kernel: tpu_custom_call.1
= control target key start
LH: loop header
LB: loop body
LE: loop exit
PB: predicated region body
PF: predicated region fallthrough
CT: control target
= control target key end

     0   :  { %10 = vsyncpa [#allocation3], 0  ;;  %s8222_s0 = inlined_call_operand.vmem [shape: bf16[2,18,18,128], index: 0, kind: input, shape index: {}]   ;;  %s8223_s1 = inlined_call_operand.vmem [shape: bf16[1152,128], index: 1, kind: input, shape index: {}]   ;;  %s8224_s2 = inlined_call_operand.vmem [shape: f32[1,128], index: 2, kind: input, shape index: {}]   ;;  %s8225_s3 = inlined_call_operand.hbm [shape: bf16[1152,128], index: 3, kind: input, shape index: {}]   ;;  %s8226_s4 = inlined_call_operand.vmem [shape: f32[1,128], index: 4, kind: input, shape index: {}]   ;;  %s8227_s5 = inlined_call_operand.hbm [shape: f32[2,16,16,128], index: 5, kind: output, shape index: {}]  }
   0x1   :  { %11 = vsyncpa [#allocation4], 0 }
   0x2   :  { %13 = vsyncpa [#allocation4 + $0x1], 0  ;;  %s5941_s18 = smov 0   ;;  %s5943_s19 = smov 0  }
   0x3   :  { %s5945_s20 = smov 0   ;;  %s5947_s21 = smov 0  }
   0x4 LB: > { %s5962_s22 = sadd.s32 4294967295, %s5901_s21   ;;  %s4160_s23 = sadd.s32 4294967294, %s5901_s21   ;;  %s5901_s21 = sphi %s5947_s21, %s8403_s21   ;;  %s5897_s20 = sphi %s5945_s20, %s8402_s20   ;;  %s5893_s19 = sphi %s5943_s19, %s8401_s19   ;;  %s5889_s18 = sphi %s5941_s18, %s8400_s18  }
   0x5   : > { %s5966_s24 = sadd.s32 1, %s5901_s21   ;;  %s136_s25 = sadd.s32 1, %s5897_s20 }
   0x6   : > { %s133_s26 = ssub.s32 %s5901_s21, %s5966_s24  ;;  %p146_p0 = scmp.ne.s32.totalorder %s5897_s20, %s5893_s19 }
   0x7   : > { %p134_p1 = scmp.eq.s32.totalorder %s133_s26, 0  ;;  %p147_p2 = scmp.eq.s32.totalorder %s5962_s22, 1 }
   0x8   : > { %p152_p3 = scmp.ne.s32.totalorder %s5893_s19, %s5889_s18  ;;  %p153_p4 = scmp.eq.s32.totalorder %s4160_s23, 1 }
   0x9   : > { %s5977_s27 = scalar_select %p134_p1, %s5897_s20, %s136_s25  }
   0xa   : > { %p5979_p5 = por %p147_p2, %p146_p0  ;;  %p5983_p6 = por %p153_p4, %p152_p3 }
   0xb   : > { %p4161_p7 = scmp.ge.s32.totalorder %s5901_s21, 1  ;;  %p160_p8 = scmp.lt.s32.totalorder %s5901_s21, 3 }
   0xc   : > { %s8253_s28 = scalar_select %p5979_p5, 1, 0 }
   0xd   : > { %s8254_s29 = scalar_select %p5983_p6, 1, 0 }
   0xe   : > { %p8228_p9 = scmp.eq.s32.totalorder %s5962_s22, 0  ;;  %p5990_p10 = pnand %p4161_p7, %p160_p8 }
   0xf   : > { %s5903_s6 = smov [#allocation2]   ;;  %s5807_s11 = scalar_lea.hbm %s8225_s3, 9216 }
  0x10   : > { %s8255_s30 = scalar_select %p5990_p10, 1, 0 }
  0x11   : > { %s178_s7 = sshll.u32 %s5903_s6, 4  ;;  %p5577_p11 = pneg %p5990_p10  ;;  %s179_s7 = int_to_ptr.vmem [resolvable:$true] %s178_s7 }
  0x12   : > { %p5808_p13 = scmp.ne.s32.totalorder %s8225_s3, %s5807_s11  ;;  %p5814_p3 = scmp.lt.u32.totalorder %s5807_s11, %s8225_s3 }
  0x13   : > { %p5998_p12 = pnand %p8228_p9, %p5577_p11 }
  0x15   : > { %p5809_p0 = pneg %p5998_p12 }
  0x17   : > { %p5810_p1 = pnand %p5809_p0, %p5808_p13 }
  0x19   : > { %p5811_p2 = pneg %p5810_p1 }
  0x1b   : > { %p5816_p4 = pnand %p5814_p3, %p5811_p2 }
  0x1d   : > { %5819 = shalt.err (!%p5816_p4)
}
  0x1e   : > { %s5820_s16 = scalar_lea.vmem %s179_s7, 9216  ;;  %p5828_p9 = scmp.lt.s32.totalorder %s179_s7, %s179_s7 }
  0x1f   : > { %p5821_p7 = scmp.ne.s32.totalorder %s179_s7, %s5820_s16  ;;  %p5829_p6 = scmp.lt.s32.totalorder %s5820_s16, %s5820_s16 }
  0x21   : > { %p5823_p8 = pnand %p5821_p7, %p5809_p0  ;;  %p5830_p5 = por %p5829_p6, %p5828_p9 }
  0x23   : > { %p5824_p11 = pneg %p5823_p8 }
  0x25   : > { %p5831_p10 = pnand %p5830_p5, %p5824_p11 }
  0x27   : > { %5834 = shalt.err (!%p5831_p10)
}
  0x28   : > { %s5904_s17 = smov 64   ;;  %s5905_s23 = smov 4  }
  0x29   : > { %5580 = dma.hbm_to_vmem [thread:$0]  (!%p5998_p12), %s8225_s3, 9216, %s179_s7, [#allocation3], %s5904_s17, %s5904_s17, %s5905_s23  }
  0x2a   : > { %p8257_p13 = scmp.ne.s32.totalorder %s8255_s30, 0 }
  0x2c   : > { %205 = sbr.rel (%p8257_p13) target bundleno = 1112 (0x458), region = 40 }
  0x33   : > { %p8258_p1 = scmp.eq.s32.totalorder %s5962_s22, 0 }
  0x35   : > { %5880 = dma.done.wait (%p8258_p1), [#allocation3], 9216   ;;  %p8259_p0 = pmov %p8258_p1 }
  0x36   : > { %v5627_v0 = vld [vmem:[%s8223_s1 + $0x40] sm:$0xff]   ;;  %v5631_v4 = vld [vmem:[%s8223_s1 + $0x48] sm:$0xff]   ;;  %v5635_v8 = vld [vmem:[%s8223_s1 + $0x50] sm:$0xff]   ;;  %p233_p5 = scmp.lt.s32.totalorder %s5962_s22, 1  ;;  %vm395_vm0 = vcmask 1046528   ;;  %vm508_vm1 = vcmask 1045504  }
  0x37   : > { %5882 = vsyncadd (%p8259_p0), [#allocation3], 4294958080  ;;  %v5628_v1 = vld [vmem:[%s8223_s1] sm:$0xff]   ;;  %4530 = vmatprep.subr.bf16.mxu0 %v5627_v0  ;;  %v5632_v5 = vld [vmem:[%s8223_s1 + $0x8] sm:$0xff]   ;;  %vm2162_vm2 = vcmask 1040384   ;;  %vm5907_vm4 = vmmov 1  }
  0x38   : > { %v5629_v2 = vld [vmem:[%s8223_s1 + $0xc0] sm:$0xff]   ;;  %4531 = vmatpush3.bf16.msra.mxu0 %v5628_v1  ;;  %v5633_v6 = vld [vmem:[%s8223_s1 + $0xc8] sm:$0xff]   ;;  %v5636_v9 = vld [vmem:[%s8223_s1 + $0x10] sm:$0xff]   ;;  %s234_s15 = scalar_select %p233_p5, %s5962_s22, 1 }
  0x39   : > { %v5630_v3 = vld [vmem:[%s8223_s1 + $0x80] sm:$0xff]   ;;  %4642 = vmatprep.subr.bf16.mxu1 %v5629_v2  ;;  %4532 = vmatprep.subr.bf16.mxu0 %v5631_v4  ;;  %v5634_v7 = vld [vmem:[%s8223_s1 + $0x88] sm:$0xff]   ;;  %v5637_v10 = vld [vmem:[%s8223_s1 + $0xd0] sm:$0xff]   ;;  %s230_s23 = sand.u32 1, %s5893_s19   ;;  %s4529_s9 = sshll.u32 %s5962_s22, 12 }
  0x3a   : > { %4643 = vmatpush3.bf16.msra.mxu1 %v5630_v3  ;;  %v5638_v11 = vld [vmem:[%s8223_s1 + $0x90] sm:$0xff]   ;;  %v5639_v12 = vld [vmem:[%s8223_s1 + $0x58] sm:$0xff]   ;;  %v5643_v16 = vld [vmem:[%s8223_s1 + $0x60] sm:$0xff]   ;;  %s5570_s11 = smul.u32 216, %s234_s15  ;;  %s4166_s26 = sshll.u32 %s230_s23, 8 }
  0x3b   : > { %4644 = vmatprep.subr.bf16.mxu1 %v5633_v6  ;;  %v5640_v13 = vld [vmem:[%s8223_s1 + $0x18] sm:$0xff]   ;;  %v5644_v17 = vld [vmem:[%s8223_s1 + $0x20] sm:$0xff]   ;;  %v5647_v20 = vld [vmem:[%s8223_s1 + $0x68] sm:$0xff]   ;;  %s8104_s6 = scalar_lea.vmem [#allocation5], %s4166_s26  ;;  %s8172_s7 = scalar_lea.hbm %s8227_s5, %s4529_s9 }
  0x3c   : > { %4533 = vmatpush3.bf16.msra.mxu0 %v5632_v5  ;;  %v5641_v14 = vld [vmem:[%s8223_s1 + $0xd8] sm:$0xff]   ;;  %v5645_v18 = vld [vmem:[%s8223_s1 + $0xe0] sm:$0xff]   ;;  %v5648_v21 = vld [vmem:[%s8223_s1 + $0x28] sm:$0xff]   ;;  %s6116_s25 = scalar_lea.vmem %s8222_s0, %s5570_s11  ;;  %s4086_s10 = sshll.u32 %s8104_s6, 4  ;;  %s8174_s10 = int_to_ptr.vmem [resolvable:$true] %s4086_s10 }
  0x3d   : > { %4534 = vmatprep.subr.bf16.mxu0 %v5635_v8  ;;  %v5642_v15 = vld [vmem:[%s8223_s1 + $0x98] sm:$0xff]   ;;  %v5646_v19 = vld [vmem:[%s8223_s1 + $0xa0] sm:$0xff]   ;;  %v5649_v22 = vld [vmem:[%s8223_s1 + $0xe8] sm:$0xff]   ;;  %s8181_s22 = scalar_lea.sflag [#allocation4], %s230_s23  ;;  %s5835_s30 = scalar_lea.vmem %s8174_s10, 4096 }
  0x3e   : > { %4645 = vmatpush3.bf16.msra.mxu1 %v5634_v7  ;;  %v5650_v23 = vld [vmem:[%s8223_s1 + $0xa8] sm:$0xff]   ;;  %v5651_v24 = vld [vmem:[%s8223_s1 + $0x70] sm:$0xff]   ;;  %v5655_v28 = vld [vmem:[%s8223_s1 + $0x78] sm:$0xff]   ;;  %p5836_p6 = scmp.ne.s32.totalorder %s8174_s10, %s5835_s30  ;;  %p8398_p9 = scmp.ne.s32.totalorder %s8253_s28, 0 }
  0x3f   : > { %4646 = vmatprep.subr.bf16.mxu1 %v5637_v10  ;;  %v5652_v25 = vld [vmem:[%s8223_s1 + $0x30] sm:$0xff]   ;;  %v5656_v29 = vld [vmem:[%s8223_s1 + $0x38] sm:$0xff]   ;;  %v239_v31 = vld [vmem:[%s6116_s25] sm:$0xff]   ;;  %s5908_s12 = smov [#allocation5]  }
  0x40   : > { %4535 = vmatpush3.bf16.msra.mxu0 %v5636_v9  ;;  %v5653_v26 = vld [vmem:[%s8223_s1 + $0xf0] sm:$0xff]   ;;  %v5657_v30 = vld [vmem:[%s8223_s1 + $0xf8] sm:$0xff]   ;;  %v241_v32 = vld [vmem:[%s6116_s25 + $0x8] sm:$0x1]  ;;  %v293_v33 = vunpack.c.l.bf16 %v239_v31  ;;  %v294_v34 = vunpack.c.h.bf16 %v239_v31  ;;  %p5837_p10 = pnand %p5836_p6, %p8398_p9  ;;  %s5839_s13 = sshll.u32 %s5908_s12, 4  ;;  %s5840_s13 = int_to_ptr.vmem [resolvable:$false] %s5839_s13 }
  0x41   : > { %4536 = vmatprep.subr.bf16.mxu0 %v5639_v12  ;;  %v5654_v27 = vld [vmem:[%s8223_s1 + $0xb0] sm:$0xff]   ;;  %v295_v35 = vunpack.c.l.bf16 %v241_v32  ;;  %v5658_v36 = vld [vmem:[%s8223_s1 + $0xb8] sm:$0xff]   ;;  %v5660_v37 = vld [vmem:[%s8223_s1 + $0x140] sm:$0xff]   ;;  %s5841_s14 = scalar_lea.vmem %s5840_s13, 8192  ;;  %p5842_p2 = scmp.lt.s32.totalorder %s8174_s10, %s5840_s13 }
  0x42   : > { %4647 = vmatpush3.bf16.msra.mxu1 %v5638_v11  ;;  %v6133_v38 = vld [vmem:[%s6116_s25 + $0xc] sm:$0xff]   ;;  %v396_v39 = vrot.slane %v293_v33, 1  ;;  %v397_v40 = vrot.slane %v294_v34, 1  ;;  %v509_v44 = vrot.slane %v293_v33, 2  ;;  %v510_v45 = vrot.slane %v294_v34, 2  ;;  %v5662_v50 = vld [vmem:[%s8223_s1 + $0x100] sm:$0xff]   ;;  %vm4332_vm3 = vmneg %vm2162_vm2  ;;  %p5838_p12 = pneg %p5837_p10  ;;  %p5843_p3 = scmp.lt.s32.totalorder %s5841_s14, %s5835_s30 }
  0x43   : > { %4648 = vmatprep.subr.bf16.mxu1 %v5641_v14  ;;  %v399_v41 = vrot.slane %v295_v35, 1  ;;  %v296_v42 = vunpack.c.l.bf16 %v6133_v38  ;;  %v297_v43 = vunpack.c.h.bf16 %v6133_v38  ;;  %v244_v46 = vld [vmem:[%s6116_s25 + $0x14] sm:$0x1]  ;;  %v6144_v51 = vld [vmem:[%s6116_s25 + $0x18] sm:$0xff]   ;;  %v247_v52 = vld [vmem:[%s6116_s25 + $0x20] sm:$0x1]  ;;  %1485 = vmatprep.mubr.bf16.mxu1 %v6133_v38 }
  0x44   : > { %4537 = vmatpush3.bf16.msra.mxu0 %v5640_v13  ;;  %v398_v47 = vsel %vm395_vm0, %v396_v39, %v397_v40  ;;  %v511_v56 = vsel %vm508_vm1, %v509_v44, %v510_v45  ;;  %v512_v57 = vrot.slane %v295_v35, 2  ;;  %v298_v58 = vunpack.c.l.bf16 %v244_v46  ;;  %v5664_v61 = vld [vmem:[%s8223_s1 + $0x148] sm:$0xff]   ;;  %v5668_v13 = vld [vmem:[%s8223_s1 + $0x150] sm:$0xff]   ;;  %v5674_v35 = vld [vmem:[%s8223_s1 + $0x118] sm:$0xff]   ;;  %p5844_p4 = por %p5843_p3, %p5842_p2 }
  0x45   : > { %4538 = vmatprep.subr.bf16.mxu0 %v5643_v16  ;;  %v400_v48 = vsel %vm395_vm0, %v397_v40, %v399_v41  ;;  %v401_v49 = vrot.slane %v296_v42, 1  ;;  %v402_v54 = vrot.slane %v297_v43, 1  ;;  %v514_v55 = vrot.slane %v296_v42, 2  ;;  %v6156_v1 = vld [vmem:[%s6116_s25 + $0x24] sm:$0xff]   ;;  %v250_v16 = vld [vmem:[%s6116_s25 + $0x2c] sm:$0x1]  ;;  %vm6835_vm5 = vmpackc.low %vm5907_vm4, %vm4332_vm3 }
  0x46   : > { %4649 = vmatpush3.bf16.msra.mxu1 %v5642_v15  ;;  %v656_v53 = vpack.c.bf16 %v400_v48, %v398_v47  ;;  %v299_v59 = vunpack.c.l.bf16 %v6144_v51  ;;  %v300_v60 = vunpack.c.h.bf16 %v6144_v51  ;;  %v515_v62 = vrot.slane %v297_v43, 2  ;;  %v5666_v8 = vld [vmem:[%s8223_s1 + $0x108] sm:$0xff]   ;;  %v5676_v39 = vld [vmem:[%s8223_s1 + $0x160] sm:$0xff]   ;;  %p5845_p7 = pnand %p5844_p4, %p5838_p12 }
  0x47   : > { %4650 = vmatprep.subr.bf16.mxu1 %v5645_v18  ;;  %v403_v63 = vsel %vm395_vm0, %v401_v49, %v402_v54  ;;  %v301_v0 = vunpack.c.l.bf16 %v247_v52  ;;  %v513_v2 = vsel %vm508_vm1, %v510_v45, %v512_v57  ;;  %v404_v3 = vrot.slane %v298_v58, 1  ;;  %v5678_v45 = vld [vmem:[%s8223_s1 + $0x120] sm:$0xff]   ;;  %v5680_v47 = vld [vmem:[%s8223_s1 + $0x168] sm:$0xff]  }
  0x48   : > { %4539 = vmatpush3.bf16.msra.mxu0 %v5644_v17  ;;  %1324 = vmatprep.mubr.bf16.mxu0 %v656_v53  ;;  %v406_v4 = vrot.slane %v299_v59, 1  ;;  %v407_v5 = vrot.slane %v300_v60, 1  ;;  %v657_v6 = vpack.c.bf16 %v513_v2, %v511_v56  ;;  %v517_v7 = vrot.slane %v298_v58, 2  ;;  %v6221_v49 = vld [vmem:[%s6116_s25 + $0x3c] sm:$0xff]   ;;  %v5682_v56 = vld [vmem:[%s8223_s1 + $0x128] sm:$0xff]  }
  0x49   : > { %4540 = vmatprep.subr.bf16.mxu0 %v5647_v20  ;;  %v405_v9 = vsel %vm395_vm0, %v402_v54, %v404_v3  ;;  %v409_v11 = vrot.slane %v301_v0, 1  ;;  %v302_v12 = vunpack.c.l.bf16 %v6156_v1  ;;  %v303_v15 = vunpack.c.h.bf16 %v6156_v1  ;;  %v6250_v3 = vld [vmem:[%s6116_s25 + $0x50] sm:$0x1] }
  0x4a   : > { %4651 = vmatpush3.bf16.msra.mxu1 %v5646_v19  ;;  %v408_v10 = vsel %vm395_vm0, %v406_v4, %v407_v5  ;;  %v6168_v14 = vpack.c.bf16 %v405_v9, %v403_v63  ;;  %v516_v17 = vsel %vm508_vm1, %v514_v55, %v515_v62  ;;  %v518_v18 = vsel %vm508_vm1, %v515_v62, %v517_v7  ;;  %v6241_v62 = vld [vmem:[%s6116_s25 + $0x48] sm:$0xff]   ;;  %v5687_v63 = vld [vmem:[%s8223_s1 + $0x1c0] sm:$0xff]   ;;  %v5686_v7 = vld [vmem:[%s8223_s1 + $0x130] sm:$0xff]  }
  0x4b   : > { %4652 = vmatprep.subr.bf16.mxu1 %v5649_v22  ;;  %v410_v19 = vsel %vm395_vm0, %v407_v5, %v409_v11  ;;  %v6180_v22 = vld [vmem:[%s6116_s25 + $0x30] sm:$0xff]   ;;  %v524_v52 = vrot.slane %v302_v12, 2  ;;  %v525_v53 = vrot.slane %v303_v15, 2  ;;  %v308_v58 = vunpack.c.l.bf16 %v6221_v49  ;;  %8260 = vst [vmem:[#allocation8_spill] sm:$0xff] %v6241_v62  ;;  %v5688_v4 = vld [vmem:[%s8223_s1 + $0x180] sm:$0xff]   ;;  %v5689_v5 = vld [vmem:[%s8223_s1 + $0x1c8] sm:$0xff]  }
  0x4c   : > { %4541 = vmatpush3.bf16.msra.mxu0 %v5648_v21  ;;  %v6177_v20 = vpack.c.bf16 %v410_v19, %v408_v10  ;;  %v411_v21 = vrot.slane %v302_v12, 1  ;;  %v305_v33 = vunpack.c.l.bf16 %v6180_v22  ;;  %v306_v34 = vunpack.c.h.bf16 %v6180_v22  ;;  %v5690_v11 = vld [vmem:[%s8223_s1 + $0x188] sm:$0xff]  }
  0x4d   : > { %4542 = vmatprep.subr.bf16.mxu0 %v5651_v24  ;;  %v412_v24 = vrot.slane %v303_v15, 1  ;;  %v312_v19 = vunpack.c.h.bf16 %v6241_v62 }
  0x4e   : > { %4653 = vmatpush3.bf16.msra.mxu1 %v5650_v23  ;;  %v5670_v23 = vld [vmem:[%s8223_s1 + $0x110] sm:$0xff]   ;;  %v416_v43 = vrot.slane %v305_v33, 1  ;;  %v417_v44 = vrot.slane %v306_v34, 1  ;;  %v529_v12 = vrot.slane %v305_v33, 2  ;;  %v530_v15 = vrot.slane %v306_v34, 2  ;;  %v5696_v34 = vld [vmem:[%s8223_s1 + $0x178] sm:$0xff]  }
  0x4f   : > { %4654 = vmatprep.subr.bf16.mxu1 %v5653_v26  ;;  %v5672_v26 = vld [vmem:[%s8223_s1 + $0x158] sm:$0xff]  }
  0x50   : > { %4543 = vmatpush3.bf16.msra.mxu0 %v5652_v25  ;;  %v304_v25 = vunpack.c.l.bf16 %v250_v16  ;;  %v418_v55 = vsel %vm395_vm0, %v416_v43, %v417_v44  ;;  %v262_v33 = vld [vmem:[%s6116_s25 + $0x5c] sm:$0x1] }
  0x51   : > { %4544 = vmatprep.subr.bf16.mxu0 %v5655_v28  ;;  %v6188_v28 = vpack.c.bf16 %v518_v18, %v516_v17  ;;  %v311_v17 = vunpack.c.l.bf16 %v6241_v62  ;;  %v5692_v18 = vld [vmem:[%s8223_s1 + $0x1d0] sm:$0xff]  }
  0x52   : > { %4655 = vmatpush3.bf16.msra.mxu1 %v5654_v27  ;;  %v519_v27 = vrot.slane %v299_v59, 2  ;;  %v414_v32 = vrot.slane %v304_v25, 1  ;;  %v527_v54 = vrot.slane %v304_v25, 2  ;;  %v309_v59 = vunpack.c.h.bf16 %v6221_v49  ;;  %v5693_v25 = vld [vmem:[%s8223_s1 + $0x190] sm:$0xff]  }
  0x53   : > { %4656 = vmatprep.subr.bf16.mxu1 %v5657_v30  ;;  %v520_v30 = vrot.slane %v300_v60, 2 }
  0x54   : > { %4545 = vmatpush3.bf16.msra.mxu0 %v5656_v29  ;;  %v6191_v29 = vld [vmem:[%s6116_s25 + $0x38] sm:$0x1]  ;;  %v528_v2 = vsel %vm508_vm1, %v525_v53, %v527_v54  ;;  %v422_v9 = vrot.slane %v309_v59, 1  ;;  %v316_v54 = vunpack.c.l.bf16 %v262_v33  ;;  %v6369_v33 = vld [vmem:[%s8223_s1 + $0x200] sm:$0xff]  }
  0x55   : > { %4754 = vmatprep.subr.bf16.mxu0 %v5660_v37  ;;  %v415_v37 = vsel %vm395_vm0, %v412_v24, %v414_v32  ;;  %v521_v40 = vsel %vm508_vm1, %v519_v27, %v520_v30  ;;  %v534_v27 = vrot.slane %v308_v58, 2  ;;  %v6289_v32 = vld [vmem:[%s6116_s25 + $0x54] sm:$0xff]  }
  0x56   : > { %4657 = vmatpush3.bf16.msra.mxu1 %v5658_v36  ;;  %v413_v36 = vsel %vm395_vm0, %v411_v21, %v412_v24  ;;  %v313_v21 = vunpack.c.l.bf16 %v6250_v3 }
  0x57   : > { %1325 = vmatmul.mubr.bf16.vlgmr.msra.gmra.mrb[0].mxu0 %v239_v31  ;;  %v522_v31 = vrot.slane %v301_v0, 2  ;;  %v6210_v42 = vpack.c.bf16 %v415_v37, %v413_v36  ;;  %v526_v0 = vsel %vm508_vm1, %v524_v52, %v525_v53  ;;  %4866 = vmatprep.subr.bf16.mxu1 %v5687_v63  ;;  %v427_v36 = vrot.slane %v312_v19, 1 }
  0x58   : > { %4755 = vmatpush3.bf16.msra.mxu0 %v5662_v50  ;;  %1332 = vmatprep.mubr.bf16.mxu0 %v6168_v14  ;;  %v6224_v50 = vld [vmem:[%s6116_s25 + $0x44] sm:$0x1]  ;;  %v429_v37 = vrot.slane %v313_v21, 1 }
  0x59   : > { %4756 = vmatprep.subr.bf16.mxu0 %v5664_v61  ;;  %1486 = vmatmul.mubr.bf16.vlgmr.msra.gmra.mrb[0].mxu1 %v657_v6  ;;  %v523_v41 = vsel %vm508_vm1, %v520_v30, %v522_v31  ;;  %v310_v60 = vunpack.c.l.bf16 %v6224_v50  ;;  %v5684_v61 = vld [vmem:[%s8223_s1 + $0x170] sm:$0xff]   ;;  %v426_v31 = vrot.slane %v311_v17, 1  ;;  %v539_v50 = vrot.slane %v311_v17, 2 }
  0x5a   : > { %1493 = vmatprep.mubr.bf16.mxu1 %v6144_v51  ;;  %v6218_v48 = vpack.c.bf16 %v523_v41, %v521_v40  ;;  %4867 = vmatpush3.bf16.msra.mxu1 %v5688_v4  ;;  %v5695_v40 = vld [vmem:[%s8223_s1 + $0x198] sm:$0xff]   ;;  %v430_v53 = vsel %vm395_vm0, %v427_v36, %v429_v37  ;;  %v5704_v17 = vld [vmem:[%s8223_s1 + $0x1f0] sm:$0xff]  }
  0x5b   : > { %v424_v10 = vrot.slane %v310_v60, 1  ;;  %4868 = vmatprep.subr.bf16.mxu1 %v5689_v5  ;;  %v537_v43 = vrot.slane %v310_v60, 2  ;;  %v428_v52 = vsel %vm395_vm0, %v426_v31, %v427_v36  ;;  %v5705_v31 = vld [vmem:[%s8223_s1 + $0x1b0] sm:$0xff]  }
  0x5c   : > { %4757 = vmatpush3.bf16.msra.mxu0 %v5666_v8  ;;  %v421_v8 = vrot.slane %v308_v58, 1 }
  0x5d   : > { %4758 = vmatprep.subr.bf16.mxu0 %v5668_v13  ;;  %v6266_v13 = vpack.c.bf16 %v528_v2, %v526_v0  ;;  %v425_v24 = vsel %vm395_vm0, %v422_v9, %v424_v10  ;;  %v5701_v0 = vld [vmem:[%s8223_s1 + $0x1e8] sm:$0xff]   ;;  %v6332_v2 = vpack.c.bf16 %v430_v53, %v428_v52 }
  0x5e   : > { %4869 = vmatpush3.bf16.msra.mxu1 %v5690_v11  ;;  %v268_v11 = vld [vmem:[%s6116_s25 + $0x74] sm:$0x1]  ;;  %v274_v53 = vld [vmem:[%s6116_s25 + $0x8c] sm:$0x1] }
  0x5f   : > { %1333 = vmatmul.mubr.bf16.gmra.mrb[4].mxu0 %v6133_v38  ;;  %v307_v38 = vunpack.c.l.bf16 %v6191_v29  ;;  %4870 = vmatprep.subr.bf16.mxu1 %v5692_v18  ;;  %v531_v29 = vsel %vm508_vm1, %v529_v12, %v530_v15  ;;  %v5702_v12 = vld [vmem:[%s8223_s1 + $0x1a8] sm:$0xff]  }
  0x60   : > { %1340 = vmatprep.mubr.bf16.mxu0 %v6177_v20  ;;  %4759 = vmatpush3.bf16.msra.mxu0 %v5670_v23  ;;  %v423_v23 = vsel %vm395_vm0, %v421_v8, %v422_v9  ;;  %v542_v8 = vrot.slane %v313_v21, 2  ;;  %v434_v9 = vrot.slane %v316_v54, 1 }
  0x61   : > { %4760 = vmatprep.subr.bf16.mxu0 %v5672_v26  ;;  %1494 = vmatmul.mubr.bf16.gmra.mrb[4].mxu1 %v6188_v28  ;;  %v419_v46 = vrot.slane %v307_v38, 1  ;;  %v532_v16 = vrot.slane %v307_v38, 2  ;;  %v5694_v26 = vld [vmem:[%s8223_s1 + $0x1d8] sm:$0xff]   ;;  %v6298_v38 = vld [vmem:[%s6116_s25 + $0x60] sm:$0xff]  }
  0x62   : > { %1501 = vmatprep.mubr.bf16.mxu1 %v6156_v1  ;;  %4871 = vmatpush3.bf16.msra.mxu1 %v5693_v25  ;;  %v317_v58 = vunpack.c.l.bf16 %v6298_v38  ;;  %v318_v5 = vunpack.c.h.bf16 %v6298_v38  ;;  %v6356_v25 = vld [vmem:[%s6116_s25 + $0x78] sm:$0xff]  }
  0x63   : > { %v420_v57 = vsel %vm395_vm0, %v417_v44, %v419_v46  ;;  %v533_v30 = vsel %vm508_vm1, %v530_v15, %v532_v16  ;;  %v314_v44 = vunpack.c.l.bf16 %v6289_v32  ;;  %4872 = vmatprep.subr.bf16.mxu1 %v5694_v26  ;;  %v315_v46 = vunpack.c.h.bf16 %v6289_v32  ;;  %v271_v26 = vld [vmem:[%s6116_s25 + $0x80] sm:$0x1] }
  0x64   : > { %4761 = vmatpush3.bf16.msra.mxu0 %v5674_v35  ;;  %v6258_v6 = vpack.c.bf16 %v420_v57, %v418_v55  ;;  %v6295_v35 = vpack.c.bf16 %v425_v24, %v423_v23  ;;  %v6303_v41 = vpack.c.bf16 %v533_v30, %v531_v29  ;;  %v265_v55 = vld [vmem:[%s6116_s25 + $0x68] sm:$0x1]  ;;  %v540_v57 = vrot.slane %v312_v19, 2 }
  0x65   : > { %4762 = vmatprep.subr.bf16.mxu0 %v5676_v39  ;;  %v535_v39 = vrot.slane %v309_v59, 2  ;;  %v5700_v59 = vld [vmem:[%s8223_s1 + $0x1a0] sm:$0xff]   ;;  %v431_v63 = vrot.slane %v314_v44, 1  ;;  %v432_v3 = vrot.slane %v315_v46, 1  ;;  %v6334_v4 = vrot.slane %v314_v44, 2 }
  0x66   : > { %4873 = vmatpush3.bf16.msra.mxu1 %v5695_v40  ;;  %v319_v10 = vunpack.c.l.bf16 %v265_v55  ;;  %v436_v15 = vrot.slane %v317_v58, 1  ;;  %v437_v19 = vrot.slane %v318_v5, 1  ;;  %v6350_v21 = vrot.slane %v317_v58, 2  ;;  %v6361_v30 = vld [vmem:[%s6116_s25 + $0x84] sm:$0xff]   ;;  %v5706_v40 = vld [vmem:[%s8223_s1 + $0x1f8] sm:$0xff]   ;;  %v6395_v58 = vld [vmem:[%s6116_s25 + $0x90] sm:$0xff]  }
  0x67   : > { %1341 = vmatmul.mubr.bf16.gmra.mrb[8].mxu0 %v6144_v51  ;;  %v536_v60 = vsel %vm508_vm1, %v534_v27, %v535_v39  ;;  %v6352_v23 = vrot.slane %v318_v5, 2  ;;  %v547_v27 = vrot.slane %v316_v54, 2  ;;  %v435_v36 = vsel %vm395_vm0, %v432_v3, %v434_v9  ;;  %v277_v5 = vld [vmem:[%s6116_s25 + $0x98] sm:$0x1] }
  0x68   : > { %1348 = vmatprep.mubr.bf16.mxu0 %v6210_v42  ;;  %4763 = vmatpush3.bf16.msra.mxu0 %v5678_v45  ;;  %v5698_v45 = vld [vmem:[%s8223_s1 + $0x138] sm:$0xff]   ;;  %v439_v29 = vrot.slane %v319_v10, 1  ;;  %v543_v44 = vsel %vm508_vm1, %v540_v57, %v542_v8  ;;  %v324_v52 = vunpack.c.h.bf16 %v6356_v25  ;;  %v552_v55 = vrot.slane %v319_v10, 2 }
  0x69   : > { %4764 = vmatprep.subr.bf16.mxu0 %v5680_v47  ;;  %1502 = vmatmul.mubr.bf16.gmra.mrb[8].mxu1 %v6218_v48  ;;  %v5699_v47 = vld [vmem:[%s8223_s1 + $0x1e0] sm:$0xff]  }
  0x6a   : > { %1509 = vmatprep.mubr.bf16.mxu1 %v6180_v22  ;;  %4874 = vmatprep.subr.bf16.mxu1 %v5699_v47  ;;  %v323_v47 = vunpack.c.l.bf16 %v6356_v25  ;;  %v447_v9 = vrot.slane %v324_v52, 1 }
  0x6b   : > { %4875 = vmatpush3.bf16.msra.mxu1 %v5700_v59 }
  0x6c   : > { %4765 = vmatpush3.bf16.msra.mxu0 %v5682_v56  ;;  %v6319_v56 = vld [vmem:[%s6116_s25 + $0x6c] sm:$0xff]   ;;  %4876 = vmatprep.subr.bf16.mxu1 %v5701_v0  ;;  %v438_v0 = vsel %vm395_vm0, %v436_v15, %v437_v19  ;;  %v446_v8 = vrot.slane %v323_v47, 1  ;;  %v6407_v10 = vrot.slane %v323_v47, 2  ;;  %v6414_v15 = vld [vmem:[%s6116_s25 + $0x9c] sm:$0xff]  }
  0x6d   : > { %4766 = vmatprep.subr.bf16.mxu0 %v5684_v61  ;;  %v538_v61 = vsel %vm508_vm1, %v535_v39, %v537_v43  ;;  %v320_v16 = vunpack.c.l.bf16 %v6319_v56  ;;  %v321_v24 = vunpack.c.h.bf16 %v6319_v56  ;;  %v322_v39 = vunpack.c.l.bf16 %v268_v11 }
  0x6e   : > { %v6347_v18 = vpack.c.bf16 %v538_v61, %v536_v60  ;;  %v541_v43 = vsel %vm508_vm1, %v539_v50, %v540_v57  ;;  %v325_v57 = vunpack.c.l.bf16 %v271_v26  ;;  %v326_v60 = vunpack.c.l.bf16 %v6361_v30  ;;  %v5707_v61 = vld [vmem:[%s8223_s1 + $0x1b8] sm:$0xff]  }
  0x6f   : > { %1349 = vmatmul.mubr.bf16.gmra.mrb[12].mxu0 %v6156_v1  ;;  %v6373_v37 = vrot.slane %v320_v16, 1  ;;  %4877 = vmatpush3.bf16.msra.mxu1 %v5702_v12  ;;  %v6392_v50 = vrot.slane %v321_v24, 2  ;;  %v444_v59 = vrot.slane %v322_v39, 1  ;;  %v327_v11 = vunpack.c.h.bf16 %v6361_v30 }
  0x70   : > { %1356 = vmatprep.mubr.bf16.mxu0 %v6258_v6  ;;  %4767 = vmatpush3.bf16.msra.mxu0 %v5686_v7  ;;  %v6337_v7 = vrot.slane %v315_v46, 2  ;;  %v6384_v46 = vrot.slane %v320_v16, 2  ;;  %v6411_v12 = vrot.slane %v324_v52, 2  ;;  %v557_v16 = vrot.slane %v322_v39, 2 }
  0x71   : > { %1510 = vmatmul.mubr.bf16.gmra.mrb[12].mxu1 %v6266_v13  ;;  %4768 = vmatprep.subr.bf16.mxu0 %v5696_v34  ;;  %v433_v34 = vsel %vm395_vm0, %v431_v63, %v432_v3  ;;  %v6401_v63 = vpack.c.bf16 %v543_v44, %v541_v43  ;;  %v440_v3 = vsel %vm395_vm0, %v437_v19, %v439_v29  ;;  %v451_v19 = vrot.slane %v326_v60, 1 }
  0x72   : > { %1517 = vmatprep.mubr.bf16.mxu1 %v6221_v49  ;;  %4878 = vmatprep.subr.bf16.mxu1 %v5704_v17  ;;  %v6390_v54 = vpack.c.bf16 %v435_v36, %v433_v34  ;;  %v449_v17 = vrot.slane %v325_v57, 1  ;;  %v6416_v26 = vrot.slane %v326_v60, 2  ;;  %v329_v29 = vunpack.c.l.bf16 %v6395_v58 }
  0x73   : > { %4879 = vmatpush3.bf16.msra.mxu1 %v5705_v31  ;;  %8262 = vst [vmem:[#allocation10_spill] sm:$0xff] %v6401_v63  ;;  %v330_v31 = vunpack.c.h.bf16 %v6395_v58  ;;  %v546_v34 = vsel %vm508_vm1, %v6334_v4, %v6337_v7  ;;  %v548_v36 = vsel %vm508_vm1, %v6337_v7, %v547_v27  ;;  %v6427_v39 = vpack.c.bf16 %v440_v3, %v438_v0 }
  0x74   : > { %4769 = vmatpush3.bf16.msra.mxu0 %v5698_v45  ;;  %v6382_v45 = vrot.slane %v321_v24, 1  ;;  %8261 = vst [vmem:[#allocation9_spill] sm:$0xff] %v6390_v54  ;;  %4880 = vmatprep.subr.bf16.mxu1 %v5706_v40  ;;  %v328_v24 = vunpack.c.l.bf16 %v274_v53  ;;  %v452_v40 = vrot.slane %v327_v11, 1  ;;  %v6429_v43 = vrot.slane %v327_v11, 2 }
  0x75   : > { %5474 = vmatprep.subr.bf16.mxu0 %v6369_v33  ;;  %v331_v44 = vunpack.c.l.bf16 %v277_v5  ;;  %v562_v47 = vrot.slane %v325_v57, 2  ;;  %v332_v53 = vunpack.c.l.bf16 %v6414_v15  ;;  %v333_v60 = vunpack.c.h.bf16 %v6414_v15 }
  0x76   : > { %v454_v52 = vrot.slane %v328_v24, 1  ;;  %v6433_v4 = vpack.c.bf16 %v548_v36, %v546_v34  ;;  %v6437_v7 = vrot.slane %v329_v29, 2  ;;  %v6439_v27 = vrot.slane %v330_v31, 2 }
  0x77   : > { %1357 = vmatmul.mubr.bf16.gmra.mrb[16].mxu0 %v6180_v22  ;;  %4881 = vmatpush3.bf16.msra.mxu1 %v5707_v61  ;;  %v456_v61 = vrot.slane %v329_v29, 1  ;;  %v567_v0 = vrot.slane %v328_v24, 2  ;;  %v459_v3 = vrot.slane %v331_v44, 1  ;;  %v461_v57 = vrot.slane %v332_v53, 1 }
  0x78   : > { %1364 = vmatprep.mubr.bf16.mxu0 %v6295_v35  ;;  %v462_v5 = vrot.slane %v333_v60, 1  ;;  %v6442_v11 = vrot.slane %v332_v53, 2  ;;  %v443_v34 = vsel %vm395_vm0, %v6373_v37, %v6382_v45  ;;  %v445_v29 = vsel %vm395_vm0, %v6382_v45, %v444_v59 }
  0x79   : > { %1518 = vmatmul.mubr.bf16.gmra.mrb[16].mxu1 %v6303_v41  ;;  %v551_v24 = vsel %vm508_vm1, %v6350_v21, %v6352_v23  ;;  %v6458_v53 = vpack.c.bf16 %v445_v29, %v443_v34  ;;  %v572_v37 = vrot.slane %v331_v44, 2  ;;  %v448_v59 = vsel %vm395_vm0, %v446_v8, %v447_v9  ;;  %v6478_v34 = vld [vmem:[%s6116_s25 + $0xa8] sm:$0xff]  }
  0x7a   : > { %1525 = vmatprep.mubr.bf16.mxu1 %v6241_v62  ;;  %v450_v21 = vsel %vm395_vm0, %v447_v9, %v449_v17  ;;  %v453_v8 = vsel %vm395_vm0, %v451_v19, %v452_v40  ;;  %v455_v9 = vsel %vm395_vm0, %v452_v40, %v454_v52  ;;  %v283_v17 = vld [vmem:[%s6116_s25 + $0xb0] sm:$0x1]  ;;  %v336_v29 = vunpack.c.h.bf16 %v6478_v34 }
  0x7b   : > { %v337_v40 = vunpack.c.l.bf16 %v283_v17 }
  0x7f   : > { %1365 = vmatmul.mubr.bf16.gmra.mrb[20].mxu0 %v6221_v49 }
  0x80   : > { %1372 = vmatprep.mubr.bf16.mxu0 %v6332_v2 }
  0x81   : > { %1526 = vmatmul.mubr.bf16.gmra.mrb[20].mxu1 %v6347_v18 }
  0x82   : > { %1533 = vmatprep.mubr.bf16.mxu1 %v6289_v32 }
  0x87   : > { %1373 = vmatmul.mubr.bf16.gmra.mrb[24].mxu0 %v6241_v62  ;;  %v280_v62 = vld [vmem:[%s6116_s25 + $0xa4] sm:$0x1] }
  0x88   : > { %1380 = vmatprep.mubr.bf16.mxu0 %v6390_v54  ;;  %v457_v54 = vrot.slane %v330_v31, 1  ;;  %v553_v31 = vsel %vm508_vm1, %v6352_v23, %v552_v55  ;;  %v334_v36 = vunpack.c.l.bf16 %v280_v62  ;;  %v556_v62 = vsel %vm508_vm1, %v6384_v46, %v6392_v50 }
  0x89   : > { %1534 = vmatmul.mubr.bf16.gmra.mrb[24].mxu1 %v6401_v63  ;;  %v6444_v63 = vrot.slane %v333_v60, 2  ;;  %v6460_v60 = vpack.c.bf16 %v553_v31, %v551_v24  ;;  %v558_v23 = vsel %vm508_vm1, %v6392_v50, %v557_v16  ;;  %v6473_v55 = vpack.c.bf16 %v450_v21, %v448_v59 }
  0x8a   : > { %1541 = vmatprep.mubr.bf16.mxu1 %v6298_v38  ;;  %v464_v45 = vrot.slane %v334_v36, 1  ;;  %v6475_v44 = vpack.c.bf16 %v558_v23, %v556_v62  ;;  %v561_v46 = vsel %vm508_vm1, %v6407_v10, %v6411_v12  ;;  %v563_v50 = vsel %vm508_vm1, %v6411_v12, %v562_v47 }
  0x8b   : > { %v335_v16 = vunpack.c.l.bf16 %v6478_v34  ;;  %v6494_v24 = vpack.c.bf16 %v455_v9, %v453_v8  ;;  %v6496_v19 = vpack.c.bf16 %v563_v50, %v561_v46  ;;  %v467_v31 = vrot.slane %v336_v29, 1  ;;  %v286_v8 = vld [vmem:[%s6116_s25 + $0xbc] sm:$0x1] }
  0x8c   : > { %v458_v10 = vsel %vm395_vm0, %v456_v61, %v457_v54  ;;  %v460_v59 = vsel %vm395_vm0, %v457_v54, %v459_v3  ;;  %v577_v12 = vrot.slane %v334_v36, 2  ;;  %v469_v47 = vrot.slane %v337_v40, 1  ;;  %v6527_v36 = vld [vmem:[%s6116_s25 + $0xb4] sm:$0xff]  }
  0x8d   : > { %v466_v52 = vrot.slane %v335_v16, 1  ;;  %v566_v21 = vsel %vm508_vm1, %v6416_v26, %v6429_v43  ;;  %v568_v62 = vsel %vm508_vm1, %v6429_v43, %v567_v0  ;;  %v6509_v23 = vpack.c.bf16 %v460_v59, %v458_v10 }
  0x8e   : > { %v6511_v61 = vpack.c.bf16 %v568_v62, %v566_v21  ;;  %v463_v54 = vsel %vm395_vm0, %v461_v57, %v462_v5  ;;  %v465_v3 = vsel %vm395_vm0, %v462_v5, %v464_v45  ;;  %v571_v26 = vsel %vm508_vm1, %v6437_v7, %v6439_v27 }
  0x8f   : > { %1381 = vmatmul.mubr.bf16.gmra.mrb[28].mxu0 %v6289_v32  ;;  %v573_v43 = vsel %vm508_vm1, %v6439_v27, %v572_v37  ;;  %v6524_v0 = vpack.c.bf16 %v465_v3, %v463_v54  ;;  %v468_v57 = vsel %vm395_vm0, %v466_v52, %v467_v31  ;;  %v470_v5 = vsel %vm395_vm0, %v467_v31, %v469_v47  ;;  %v6560_v3 = vld [vmem:[%s6116_s25 + $0xc0] sm:$0xff]  }
  0x90   : > { %1388 = vmatprep.mubr.bf16.mxu0 %v6427_v39  ;;  %v6530_v9 = vpack.c.bf16 %v573_v43, %v571_v26  ;;  %v338_v7 = vunpack.c.l.bf16 %v6527_v36  ;;  %v339_v45 = vunpack.c.h.bf16 %v6527_v36  ;;  %v340_v27 = vunpack.c.l.bf16 %v286_v8 }
  0x91   : > { %1542 = vmatmul.mubr.bf16.gmra.mrb[28].mxu1 %v6433_v4  ;;  %v576_v37 = vsel %vm508_vm1, %v6442_v11, %v6444_v63  ;;  %v578_v17 = vsel %vm508_vm1, %v6444_v63, %v577_v12  ;;  %v6545_v46 = vpack.c.bf16 %v470_v5, %v468_v57  ;;  %v579_v59 = vrot.slane %v335_v16, 2  ;;  %v5709_v5 = vld [vmem:[%s8223_s1 + $0x208] sm:$0xff]  }
  0x92   : > { %1549 = vmatprep.mubr.bf16.mxu1 %v6319_v56  ;;  %v471_v50 = vrot.slane %v338_v7, 1  ;;  %v472_v52 = vrot.slane %v339_v45, 1  ;;  %v474_v31 = vrot.slane %v340_v27, 1  ;;  %v6547_v10 = vpack.c.bf16 %v578_v17, %v576_v37 }
  0x93   : > { %v580_v47 = vrot.slane %v336_v29, 2  ;;  %v582_v21 = vrot.slane %v337_v40, 2  ;;  %v584_v29 = vrot.slane %v338_v7, 2  ;;  %v585_v40 = vrot.slane %v339_v45, 2  ;;  %v5710_v7 = vld [vmem:[%s8223_s1 + $0x210] sm:$0xff]  }
  0x94   : > { %v473_v11 = vsel %vm395_vm0, %v471_v50, %v472_v52  ;;  %v475_v62 = vsel %vm395_vm0, %v472_v52, %v474_v31  ;;  %v587_v26 = vrot.slane %v340_v27, 2 }
  0x95   : > { %v581_v63 = vsel %vm508_vm1, %v579_v59, %v580_v47  ;;  %v583_v12 = vsel %vm508_vm1, %v580_v47, %v582_v21  ;;  %v6557_v54 = vpack.c.bf16 %v475_v62, %v473_v11  ;;  %v586_v43 = vsel %vm508_vm1, %v584_v29, %v585_v40 }
  0x96   : > { %v6562_v16 = vpack.c.bf16 %v583_v12, %v581_v63  ;;  %v588_v8 = vsel %vm508_vm1, %v585_v40, %v587_v26  ;;  %v289_v63 = vld [vmem:[%s6116_s25 + $0xc8] sm:$0x1] }
  0x97   : > { %1389 = vmatmul.mubr.bf16.gmra.mrb[32].mxu0 %v6298_v38  ;;  %v6570_v57 = vpack.c.bf16 %v588_v8, %v586_v43  ;;  %v341_v43 = vunpack.c.l.bf16 %v6560_v3 }
  0x98   : > { %1396 = vmatprep.mubr.bf16.mxu0 %v6458_v53 }
  0x99   : > { %1550 = vmatmul.mubr.bf16.gmra.mrb[32].mxu1 %v6460_v60 }
  0x9a   : > { %1557 = vmatprep.mubr.bf16.mxu1 %v6356_v25 }
  0x9f   : > { %1397 = vmatmul.mubr.bf16.gmra.mrb[36].mxu0 %v6319_v56 }
  0xa0   : > { %1404 = vmatprep.mubr.bf16.mxu0 %v6473_v55 }
  0xa1   : > { %1558 = vmatmul.mubr.bf16.gmra.mrb[36].mxu1 %v6475_v44 }
  0xa2   : > { %1565 = vmatprep.mubr.bf16.mxu1 %v6361_v30 }
  0xa7   : > { %1405 = vmatmul.mubr.bf16.gmra.mrb[40].mxu0 %v6356_v25 }
  0xa8   : > { %1412 = vmatprep.mubr.bf16.mxu0 %v6494_v24 }
  0xa9   : > { %1566 = vmatmul.mubr.bf16.gmra.mrb[40].mxu1 %v6496_v19 }
  0xaa   : > { %1573 = vmatprep.mubr.bf16.mxu1 %v6395_v58 }
  0xaf   : > { %1413 = vmatmul.mubr.bf16.gmra.mrb[44].mxu0 %v6361_v30 }
  0xb0   : > { %1420 = vmatprep.mubr.bf16.mxu0 %v6509_v23 }
  0xb1   : > { %1574 = vmatmul.mubr.bf16.gmra.mrb[44].mxu1 %v6511_v61 }
  0xb2   : > { %1581 = vmatprep.mubr.bf16.mxu1 %v6414_v15 }
  0xb7   : > { %1421 = vmatmul.mubr.bf16.gmra.mrb[48].mxu0 %v6395_v58 }
  0xb8   : > { %1428 = vmatprep.mubr.bf16.mxu0 %v6524_v0 }
  0xb9   : > { %1582 = vmatmul.mubr.bf16.gmra.mrb[48].mxu1 %v6530_v9 }
  0xba   : > { %1589 = vmatprep.mubr.bf16.mxu1 %v6478_v34 }
  0xbf   : > { %1429 = vmatmul.mubr.bf16.gmra.mrb[52].mxu0 %v6414_v15 }
  0xc0   : > { %1436 = vmatprep.mubr.bf16.mxu0 %v6545_v46 }
  0xc1   : > { %1590 = vmatmul.mubr.bf16.gmra.mrb[52].mxu1 %v6547_v10 }
  0xc2   : > { %1597 = vmatprep.mubr.bf16.mxu1 %v6527_v36 }
  0xc7   : > { %1437 = vmatmul.mubr.bf16.gmra.mrb[56].mxu0 %v6478_v34 }
  0xc8   : > { %1444 = vmatprep.mubr.bf16.mxu0 %v6557_v54 }
  0xc9   : > { %1598 = vmatmul.mubr.bf16.gmra.mrb[56].mxu1 %v6562_v16 }
  0xca   : > { %1605 = vmatprep.mubr.bf16.mxu1 %v6560_v3 }
  0xcf   : > { %1445 = vmatmul.mubr.bf16.gmra.mrb[60].mxu0 %v6527_v36 }
  0xd0   : > { %1646 = vmatprep.mubr.bf16.mxu0 %v6188_v28  ;;  %v5711_v28 = vld [vmem:[%s8223_s1 + $0x218] sm:$0xff]  }
  0xd1   : > { %1606 = vmatmul.mubr.bf16.gmra.mrb[60].mxu1 %v6570_v57 }
  0xd2   : > { %1807 = vmatprep.mubr.bf16.mxu1 %v6177_v20 }
  0xd7   : > { %1647 = vmatmul.mubr.bf16.vlgmr.msra.gmra.mrb[64].mxu0 %v6168_v14  ;;  %v5712_v14 = vld [vmem:[%s8223_s1 + $0x220] sm:$0xff]  }
  0xd8   : > { %5475 = vmatpush3.bf16.msra.mxu0 %v6369_v33  ;;  %1654 = vmatprep.mubr.bf16.mxu0 %v6218_v48  ;;  %v8265_v33 = vld [vmem:[#allocation9_spill] sm:$0xff] }
  0xd9   : > { %5476 = vmatprep.subr.bf16.mxu0 %v5709_v5  ;;  %1808 = vmatmul.mubr.bf16.vlgmr.msra.gmra.mrb[64].mxu1 %v6144_v51  ;;  %v5713_v51 = vld [vmem:[%s8223_s1 + $0x228] sm:$0xff]  }
  0xda   : > { %1815 = vmatprep.mubr.bf16.mxu1 %v6210_v42 }
  0xdc   : > { %5477 = vmatpush3.bf16.msra.mxu0 %v5709_v5 }
  0xdd   : > { %5478 = vmatprep.subr.bf16.mxu0 %v5710_v7 }
  0xdf   : > { %1655 = vmatmul.mubr.bf16.gmra.mrb[68].mxu0 %v6177_v20  ;;  %v5714_v20 = vld [vmem:[%s8223_s1 + $0x230] sm:$0xff]  }
  0xe0   : > { %1662 = vmatprep.mubr.bf16.mxu0 %v6266_v13  ;;  %5479 = vmatpush3.bf16.msra.mxu0 %v5710_v7  ;;  %v343_v7 = vunpack.c.l.bf16 %v289_v63 }
  0xe1   : > { %5480 = vmatprep.subr.bf16.mxu0 %v5711_v28  ;;  %1816 = vmatmul.mubr.bf16.gmra.mrb[68].mxu1 %v6156_v1  ;;  %v5715_v1 = vld [vmem:[%s8223_s1 + $0x238] sm:$0xff]  }
  0xe2   : > { %1823 = vmatprep.mubr.bf16.mxu1 %v6258_v6 }
  0xe4   : > { %5481 = vmatpush3.bf16.msra.mxu0 %v5711_v28 }
  0xe5   : > { %5482 = vmatprep.subr.bf16.mxu0 %v5712_v14 }
  0xe7   : > { %1663 = vmatmul.mubr.bf16.gmra.mrb[72].mxu0 %v6210_v42  ;;  %v8264_v42 = vld [vmem:[#allocation8_spill] sm:$0xff] }
  0xe8   : > { %1670 = vmatprep.mubr.bf16.mxu0 %v6303_v41  ;;  %5483 = vmatpush3.bf16.msra.mxu0 %v5712_v14 }
  0xe9   : > { %5484 = vmatprep.subr.bf16.mxu0 %v5713_v51  ;;  %1824 = vmatmul.mubr.bf16.gmra.mrb[72].mxu1 %v6180_v22  ;;  %v8263_v22 = vld [vmem:[#allocation10_spill] sm:$0xff] }
  0xea   : > { %1831 = vmatprep.mubr.bf16.mxu1 %v6295_v35 }
  0xec   : > { %5485 = vmatpush3.bf16.msra.mxu0 %v5713_v51 }
  0xed   : > { %5486 = vmatprep.subr.bf16.mxu0 %v5714_v20 }
  0xef   : > { %1671 = vmatmul.mubr.bf16.gmra.mrb[76].mxu0 %v6258_v6  ;;  %v6626_v6 = vld [vmem:[%s6116_s25 + $0xd4] sm:$0x1] }
  0xf0   : > { %1678 = vmatprep.mubr.bf16.mxu0 %v6347_v18  ;;  %5487 = vmatpush3.bf16.msra.mxu0 %v5714_v20 }
  0xf1   : > { %5488 = vmatprep.subr.bf16.mxu0 %v5715_v1  ;;  %1832 = vmatmul.mubr.bf16.gmra.mrb[76].mxu1 %v6221_v49  ;;  %v6623_v49 = vld [vmem:[%s6116_s25 + $0xcc] sm:$0xff]  }
  0xf2   : > { %1839 = vmatprep.mubr.bf16.mxu1 %v6332_v2  ;;  %v345_v45 = vunpack.c.h.bf16 %v6623_v49 }
  0xf4   : > { %5489 = vmatpush3.bf16.msra.mxu0 %v5715_v1  ;;  %v649_v27 = vrot.slane %v345_v45, 2 }
  0xf7   : > { %1679 = vmatmul.mubr.bf16.gmra.mrb[80].mxu0 %v6295_v35  ;;  %v344_v35 = vunpack.c.l.bf16 %v6623_v49 }
  0xf8   : > { %1686 = vmatprep.mubr.bf16.mxu0 %v8263_v22 }
  0xf9   : > { %1840 = vmatmul.mubr.bf16.gmra.mrb[80].mxu1 %v8264_v42  ;;  %v5718_v42 = vld [vmem:[#allocation2] sm:$0xff]  }
  0xfa   : > { %1847 = vmatprep.mubr.bf16.mxu1 %v8265_v33 }
  0xff   : > { %1687 = vmatmul.mubr.bf16.gmra.mrb[84].mxu0 %v6332_v2  ;;  %v346_v2 = vunpack.c.l.bf16 %v6626_v6 }
 0x100   : > { %1694 = vmatprep.mubr.bf16.mxu0 %v6433_v4 }
 0x101   : > { %1848 = vmatmul.mubr.bf16.gmra.mrb[84].mxu1 %v6289_v32  ;;  %v648_v32 = vrot.slane %v344_v35, 2  ;;  %v651_v37 = vrot.slane %v346_v2, 2 }
 0x102   : > { %1855 = vmatprep.mubr.bf16.mxu1 %v6427_v39 }
 0x103   : > { %v6642_v17 = vsel %vm508_vm1, %v648_v32, %v649_v27  ;;  %v6645_v50 = vsel %vm508_vm1, %v649_v27, %v651_v37  ;;  %v624_v27 = vrot.slane %v341_v43, 1 }
 0x107   : > { %1695 = vmatmul.mubr.bf16.gmra.mrb[88].mxu0 %v8265_v33 }
 0x108   : > { %1702 = vmatprep.mubr.bf16.mxu0 %v6460_v60 }
 0x109   : > { %1856 = vmatmul.mubr.bf16.gmra.mrb[88].mxu1 %v6298_v38  ;;  %v708_v38 = vpack.c.bf16 %v6645_v50, %v6642_v17  ;;  %v5729_v17 = vld [vmem:[#allocation2 + $0x70] sm:$0xff]  }
 0x10a   : > { %1863 = vmatprep.mubr.bf16.mxu1 %v6458_v53  ;;  %v5730_v50 = vld [vmem:[#allocation2 + $0x30] sm:$0xff]  }
 0x10f   : > { %1703 = vmatmul.mubr.bf16.gmra.mrb[92].mxu0 %v6427_v39 }
 0x110   : > { %1710 = vmatprep.mubr.bf16.mxu0 %v6475_v44 }
 0x111   : > { %1864 = vmatmul.mubr.bf16.gmra.mrb[92].mxu1 %v6319_v56 }
 0x112   : > { %1871 = vmatprep.mubr.bf16.mxu1 %v6473_v55 }
 0x117   : > { %1711 = vmatmul.mubr.bf16.gmra.mrb[96].mxu0 %v6458_v53 }
 0x118   : > { %1718 = vmatprep.mubr.bf16.mxu0 %v6496_v19 }
 0x119   : > { %1872 = vmatmul.mubr.bf16.gmra.mrb[96].mxu1 %v6356_v25  ;;  %v6667_v25 = vld [vmem:[%s8224_s2] ss:$0 sm:$0xff] }
 0x11a   : > { %1879 = vmatprep.mubr.bf16.mxu1 %v6494_v24 }
 0x11f   : > { %1719 = vmatmul.mubr.bf16.gmra.mrb[100].mxu0 %v6473_v55 }
 0x120   : > { %1726 = vmatprep.mubr.bf16.mxu0 %v6511_v61 }
 0x121   : > { %1880 = vmatmul.mubr.bf16.gmra.mrb[100].mxu1 %v6361_v30 }
 0x122   : > { %1887 = vmatprep.mubr.bf16.mxu1 %v6509_v23 }
 0x127   : > { %1727 = vmatmul.mubr.bf16.gmra.mrb[104].mxu0 %v6494_v24 }
 0x128   : > { %1734 = vmatprep.mubr.bf16.mxu0 %v6530_v9 }
 0x129   : > { %1888 = vmatmul.mubr.bf16.gmra.mrb[104].mxu1 %v6395_v58 }
 0x12a   : > { %v4546_v56 = vpop.f32.mrb[0].mxu0  ;;  %1895 = vmatprep.mubr.bf16.mxu1 %v6524_v0 }
 0x12b   : > { %v4547_v39 = vpop.f32.mrb[1].mxu0 }
 0x12c   : > { %v4548_v53 = vadd.f32 %v4547_v39, %v4546_v56  ;;  %v4549_v30 = vpop.f32.mrb[2].mxu0  ;;  %v4658_v55 = vpop.f32.mrb[0].mxu1 }
 0x12d   : > { %v4550_v52 = vpop.f32.mrb[3].mxu0  ;;  %v4659_v59 = vpop.f32.mrb[1].mxu1 }
 0x12e   : > { %v1327_v24 = vadd.f32 %v4548_v53, %v6667_v25  ;;  %v4551_v31 = vadd.f32 %v4550_v52, %v4549_v30  ;;  %v4660_v47 = vadd.f32 %v4659_v59, %v4658_v55  ;;  %v4661_v58 = vpop.f32.mrb[2].mxu1  ;;  %v627_v53 = vrot.slane %v343_v7, 1 }
 0x12f   : > { %1735 = vmatmul.mubr.bf16.gmra.mrb[108].mxu0 %v6509_v23  ;;  %v4662_v11 = vpop.f32.mrb[3].mxu1  ;;  %v342_v23 = vunpack.c.h.bf16 %v6560_v3 }
 0x130   : > { %v1330_v21 = vadd.f32 %v4551_v31, %v6667_v25  ;;  %1742 = vmatprep.mubr.bf16.mxu0 %v6547_v10  ;;  %v4663_v62 = vadd.f32 %v4662_v11, %v4661_v58  ;;  %v6675_v12 = vadd.f32 %v4660_v47, %v1327_v24 }
 0x131   : > { %1896 = vmatmul.mubr.bf16.gmra.mrb[108].mxu1 %v6414_v15  ;;  %v5717_v15 = vld [vmem:[#allocation2 + $0x40] sm:$0xff]   ;;  %v625_v37 = vrot.slane %v342_v23, 1  ;;  %v632_v11 = vrot.slane %v342_v23, 2  ;;  %v642_v23 = vrot.slane %v345_v45, 1 }
 0x132   : > { %v4552_v29 = vpop.f32.mrb[4].mxu0  ;;  %1903 = vmatprep.mubr.bf16.mxu1 %v6545_v46  ;;  %v6679_v26 = vadd.f32 %v4663_v62, %v1330_v21  ;;  %5002 = vmatprep.subr.bf16.mxu1 %v5717_v15  ;;  %v631_v21 = vrot.slane %v341_v43, 2  ;;  %v641_v43 = vrot.slane %v344_v35, 1 }
 0x133   : > { %v4553_v40 = vpop.f32.mrb[5].mxu0  ;;  %5003 = vmatpush3.bf16.msra.mxu1 %v5718_v42  ;;  %v626_v47 = vsel %vm395_vm0, %v624_v27, %v625_v37  ;;  %v628_v58 = vsel %vm395_vm0, %v625_v37, %v627_v53 }
 0x134   : > { %v4554_v8 = vadd.f32 %v4553_v40, %v4552_v29  ;;  %v4555_v5 = vpop.f32.mrb[6].mxu0  ;;  %v4664_v28 = vpop.f32.mrb[4].mxu1  ;;  %v634_v29 = vrot.slane %v343_v7, 2  ;;  %v644_v7 = vrot.slane %v346_v2, 1  ;;  %v633_v15 = vsel %vm508_vm1, %v631_v21, %v632_v11 }
 0x135   : > { %v4556_v14 = vpop.f32.mrb[7].mxu0  ;;  %v4665_v1 = vpop.f32.mrb[5].mxu1  ;;  %v643_v6 = vsel %vm395_vm0, %v641_v43, %v642_v23 }
 0x136   : > { %v1335_v51 = vadd.f32 %v4554_v8, %v6667_v25  ;;  %v4557_v20 = vadd.f32 %v4556_v14, %v4555_v5  ;;  %v4666_v33 = vadd.f32 %v4665_v1, %v4664_v28  ;;  %v4667_v32 = vpop.f32.mrb[6].mxu1  ;;  %v704_v14 = vpack.c.bf16 %v628_v58, %v626_v47 }
 0x137   : > { %1743 = vmatmul.mubr.bf16.gmra.mrb[112].mxu0 %v6524_v0  ;;  %v4668_v39 = vpop.f32.mrb[7].mxu1  ;;  %v645_v2 = vsel %vm395_vm0, %v642_v23, %v644_v7 }
 0x138   : > { %v1338_v56 = vadd.f32 %v4557_v20, %v6667_v25  ;;  %1750 = vmatprep.mubr.bf16.mxu0 %v6562_v16  ;;  %v4669_v30 = vadd.f32 %v4668_v39, %v4667_v32  ;;  %v6687_v55 = vadd.f32 %v4666_v33, %v1335_v51  ;;  %v707_v47 = vpack.c.bf16 %v645_v2, %v643_v6 }
 0x139   : > { %1904 = vmatmul.mubr.bf16.gmra.mrb[112].mxu1 %v6478_v34 }
 0x13a   : > { %v4558_v52 = vpop.f32.mrb[8].mxu0  ;;  %1911 = vmatprep.mubr.bf16.mxu1 %v6557_v54  ;;  %v6691_v0 = vadd.f32 %v4669_v30, %v1338_v56 }
 0x13b   : > { %v4559_v24 = vpop.f32.mrb[9].mxu0 }
 0x13c   : > { %v4560_v31 = vadd.f32 %v4559_v24, %v4558_v52  ;;  %v4561_v59 = vpop.f32.mrb[10].mxu0  ;;  %v4670_v62 = vpop.f32.mrb[8].mxu1  ;;  %v5720_v24 = vld [vmem:[#allocation2 + $0x8] sm:$0xff]  }
 0x13d   : > { %v4562_v63 = vpop.f32.mrb[11].mxu0  ;;  %v4671_v8 = vpop.f32.mrb[9].mxu1 }
 0x13e   : > { %v1343_v40 = vadd.f32 %v4560_v31, %v6667_v25  ;;  %v4563_v34 = vadd.f32 %v4562_v63, %v4561_v59  ;;  %v4672_v5 = vadd.f32 %v4671_v8, %v4670_v62  ;;  %v4673_v28 = vpop.f32.mrb[10].mxu1 }
 0x13f   : > { %1751 = vmatmul.mubr.bf16.gmra.mrb[116].mxu0 %v6545_v46  ;;  %v4674_v20 = vpop.f32.mrb[11].mxu1  ;;  %v635_v46 = vsel %vm508_vm1, %v632_v11, %v634_v29 }
 0x140   : > { %v1346_v51 = vadd.f32 %v4563_v34, %v6667_v25  ;;  %1758 = vmatprep.mubr.bf16.mxu0 %v6570_v57  ;;  %v4675_v1 = vadd.f32 %v4674_v20, %v4673_v28  ;;  %v6707_v42 = vadd.f32 %v4672_v5, %v1343_v40  ;;  %v6712_v45 = vpack.c.bf16 %v635_v46, %v633_v15 }
 0x141   : > { %1912 = vmatmul.mubr.bf16.gmra.mrb[116].mxu1 %v6527_v36  ;;  %v5719_v36 = vld [vmem:[#allocation2 + $0x48] sm:$0xff]  }
 0x142   : > { %v4564_v33 = vpop.f32.mrb[12].mxu0  ;;  %1919 = vmatprep.mubr.bf16.mxu1 %v704_v14  ;;  %v6710_v27 = vadd.f32 %v4675_v1, %v1346_v51  ;;  %5004 = vmatprep.subr.bf16.mxu1 %v5719_v36 }
 0x143   : > { %v4565_v32 = vpop.f32.mrb[13].mxu0  ;;  %5005 = vmatpush3.bf16.msra.mxu1 %v5720_v24 }
 0x144   : > { %v4566_v35 = vadd.f32 %v4565_v32, %v4564_v33  ;;  %v4567_v37 = vpop.f32.mrb[14].mxu0  ;;  %v4676_v56 = vpop.f32.mrb[12].mxu1 }
 0x145   : > { %v4568_v39 = vpop.f32.mrb[15].mxu0  ;;  %v4677_v52 = vpop.f32.mrb[13].mxu1 }
 0x146   : > { %v1351_v53 = vadd.f32 %v4566_v35, %v6667_v25  ;;  %v4569_v30 = vadd.f32 %v4568_v39, %v4567_v37  ;;  %v4678_v31 = vadd.f32 %v4677_v52, %v4676_v56  ;;  %v4679_v59 = vpop.f32.mrb[14].mxu1 }
 0x147   : > { %1759 = vmatmul.mubr.bf16.gmra.mrb[120].mxu0 %v6557_v54  ;;  %v4680_v21 = vpop.f32.mrb[15].mxu1 }
 0x148   : > { %v1354_v58 = vadd.f32 %v4569_v30, %v6667_v25  ;;  %1766 = vmatprep.mubr.bf16.mxu0 %v6712_v45  ;;  %v4681_v11 = vadd.f32 %v4680_v21, %v4679_v59  ;;  %v6720_v62 = vadd.f32 %v4678_v31, %v1351_v53  ;;  %v5721_v53 = vld [vmem:[#allocation2 + $0x50] sm:$0xff]  }
 0x149   : > { %1920 = vmatmul.mubr.bf16.gmra.mrb[120].mxu1 %v6560_v3  ;;  %v5722_v30 = vld [vmem:[#allocation2 + $0x10] sm:$0xff]   ;;  %5006 = vmatprep.subr.bf16.mxu1 %v5721_v53 }
 0x14a   : > { %v4570_v63 = vpop.f32.mrb[16].mxu0  ;;  %1927 = vmatprep.mubr.bf16.mxu1 %v707_v47  ;;  %v6723_v40 = vadd.f32 %v4681_v11, %v1354_v58  ;;  %5007 = vmatpush3.bf16.msra.mxu1 %v5722_v30 }
 0x14b   : > { %v4571_v29 = vpop.f32.mrb[17].mxu0 }
 0x14c   : > { %v4572_v34 = vadd.f32 %v4571_v29, %v4570_v63  ;;  %v4573_v54 = vpop.f32.mrb[18].mxu0  ;;  %v4682_v8 = vpop.f32.mrb[16].mxu1 }
 0x14d   : > { %v4574_v5 = vpop.f32.mrb[19].mxu0  ;;  %v4683_v20 = vpop.f32.mrb[17].mxu1 }
 0x14e   : > { %v1359_v28 = vadd.f32 %v4572_v34, %v6667_v25  ;;  %v4575_v51 = vadd.f32 %v4574_v5, %v4573_v54  ;;  %v4684_v43 = vadd.f32 %v4683_v20, %v4682_v8  ;;  %v4685_v23 = vpop.f32.mrb[18].mxu1 }
 0x14f   : > { %1767 = vmatmul.mubr.bf16.gmra.mrb[124].mxu0 %v704_v14  ;;  %v4686_v1 = vpop.f32.mrb[19].mxu1 }
 0x150   : > { %v1362_v7 = vadd.f32 %v4575_v51, %v6667_v25  ;;  %5490 = vmatprep.mubr.bf16.mxu0 %v6218_v48  ;;  %v4687_v3 = vadd.f32 %v4686_v1, %v4685_v23  ;;  %v6728_v15 = vadd.f32 %v4684_v43, %v1359_v28 }
 0x151   : > { %1928 = vmatmul.mubr.bf16.gmra.mrb[124].mxu1 %v6623_v49 }
 0x152   : > { %v4576_v46 = vpop.f32.mrb[20].mxu0  ;;  %v6731_v32 = vadd.f32 %v4687_v3, %v1362_v7 }
 0x153   : > { %v4577_v33 = vpop.f32.mrb[21].mxu0 }
 0x154   : > { %v4578_v35 = vadd.f32 %v4577_v33, %v4576_v46  ;;  %v4579_v37 = vpop.f32.mrb[22].mxu0  ;;  %v4688_v6 = vpop.f32.mrb[20].mxu1 }
 0x155   : > { %v4580_v2 = vpop.f32.mrb[23].mxu0  ;;  %v4689_v39 = vpop.f32.mrb[21].mxu1 }
 0x156   : > { %v1367_v14 = vadd.f32 %v4578_v35, %v6667_v25  ;;  %v4581_v56 = vadd.f32 %v4580_v2, %v4579_v37  ;;  %v4690_v48 = vadd.f32 %v4689_v39, %v4688_v6  ;;  %v4691_v52 = vpop.f32.mrb[22].mxu1  ;;  %v5723_v6 = vld [vmem:[#allocation2 + $0x58] sm:$0xff]  }
 0x157   : > { %5491 = vmatmul.mubr.bf16.vlgmr.msra.gmra.mrb[128].mxu0 %v6266_v13  ;;  %v4692_v36 = vpop.f32.mrb[23].mxu1  ;;  %v5724_v2 = vld [vmem:[#allocation2 + $0x18] sm:$0xff]   ;;  %5008 = vmatprep.subr.bf16.mxu1 %v5723_v6 }
 0x158   : > { %v1370_v49 = vadd.f32 %v4581_v56, %v6667_v25  ;;  %5494 = vmatprep.mubr.bf16.mxu0 %v6303_v41  ;;  %v4693_v24 = vadd.f32 %v4692_v36, %v4691_v52  ;;  %v6737_v31 = vadd.f32 %v4690_v48, %v1367_v14  ;;  %5009 = vmatpush3.bf16.msra.mxu1 %v5724_v2 }
 0x15a   : > { %v4582_v59 = vpop.f32.mrb[24].mxu0  ;;  %v6739_v58 = vadd.f32 %v4693_v24, %v1370_v49 }
 0x15b   : > { %v4583_v47 = vpop.f32.mrb[25].mxu0 }
 0x15c   : > { %v4584_v21 = vadd.f32 %v4583_v47, %v4582_v59  ;;  %v4585_v11 = vpop.f32.mrb[26].mxu0  ;;  %v4694_v63 = vpop.f32.mrb[24].mxu1 }
 0x15d   : > { %v4586_v29 = vpop.f32.mrb[27].mxu0  ;;  %v4695_v54 = vpop.f32.mrb[25].mxu1 }
 0x15e   : > { %v1375_v13 = vadd.f32 %v4584_v21, %v6667_v25  ;;  %v4587_v34 = vadd.f32 %v4586_v29, %v4585_v11  ;;  %v4696_v8 = vadd.f32 %v4695_v54, %v4694_v63  ;;  %v4697_v5 = vpop.f32.mrb[26].mxu1 }
 0x15f   : > { %5495 = vmatmul.mubr.bf16.gmra.mrb[132].mxu0 %v6347_v18  ;;  %v4698_v28 = vpop.f32.mrb[27].mxu1 }
 0x160   : > { %v1378_v41 = vadd.f32 %v4587_v34, %v6667_v25  ;;  %5498 = vmatprep.mubr.bf16.mxu0 %v8263_v22  ;;  %v4699_v51 = vadd.f32 %v4698_v28, %v4697_v5  ;;  %v6745_v20 = vadd.f32 %v4696_v8, %v1375_v13 }
 0x162   : > { %v4588_v43 = vpop.f32.mrb[28].mxu0  ;;  %v6747_v7 = vadd.f32 %v4699_v51, %v1378_v41 }
 0x163   : > { %v4589_v23 = vpop.f32.mrb[29].mxu0 }
 0x164   : > { %v4590_v1 = vadd.f32 %v4589_v23, %v4588_v43  ;;  %v4591_v3 = vpop.f32.mrb[30].mxu0  ;;  %v4700_v46 = vpop.f32.mrb[28].mxu1 }
 0x165   : > { %v4592_v33 = vpop.f32.mrb[31].mxu0  ;;  %v4701_v18 = vpop.f32.mrb[29].mxu1 }
 0x166   : > { %v1383_v35 = vadd.f32 %v4590_v1, %v6667_v25  ;;  %v4593_v37 = vadd.f32 %v4592_v33, %v4591_v3  ;;  %v4702_v14 = vadd.f32 %v4701_v18, %v4700_v46  ;;  %v4703_v56 = vpop.f32.mrb[30].mxu1  ;;  %v5725_v46 = vld [vmem:[#allocation2 + $0x60] sm:$0xff]  }
 0x167   : > { %5499 = vmatmul.mubr.bf16.gmra.mrb[136].mxu0 %v6433_v4  ;;  %v4704_v39 = vpop.f32.mrb[31].mxu1  ;;  %v5726_v33 = vld [vmem:[#allocation2 + $0x20] sm:$0xff]   ;;  %5010 = vmatprep.subr.bf16.mxu1 %v5725_v46 }
 0x168   : > { %v1386_v22 = vadd.f32 %v4593_v37, %v6667_v25  ;;  %5502 = vmatprep.mubr.bf16.mxu0 %v6460_v60  ;;  %v4705_v53 = vadd.f32 %v4704_v39, %v4703_v56  ;;  %v6753_v30 = vadd.f32 %v4702_v14, %v1383_v35  ;;  %5011 = vmatpush3.bf16.msra.mxu1 %v5726_v33 }
 0x16a   : > { %v4594_v48 = vpop.f32.mrb[32].mxu0  ;;  %v6755_v49 = vadd.f32 %v4705_v53, %v1386_v22 }
 0x16b   : > { %v4595_v52 = vpop.f32.mrb[33].mxu0 }
 0x16c   : > { %v4596_v36 = vadd.f32 %v4595_v52, %v4594_v48  ;;  %v4597_v24 = vpop.f32.mrb[34].mxu0  ;;  %v4706_v59 = vpop.f32.mrb[32].mxu1 }
 0x16d   : > { %v4598_v47 = vpop.f32.mrb[35].mxu0  ;;  %v4707_v11 = vpop.f32.mrb[33].mxu1 }
 0x16e   : > { %v1391_v4 = vadd.f32 %v4596_v36, %v6667_v25  ;;  %v4599_v21 = vadd.f32 %v4598_v47, %v4597_v24  ;;  %v4708_v63 = vadd.f32 %v4707_v11, %v4706_v59  ;;  %v4709_v29 = vpop.f32.mrb[34].mxu1 }
 0x16f   : > { %5503 = vmatmul.mubr.bf16.gmra.mrb[140].mxu0 %v6475_v44  ;;  %v4710_v13 = vpop.f32.mrb[35].mxu1 }
 0x170   : > { %v1394_v60 = vadd.f32 %v4599_v21, %v6667_v25  ;;  %5506 = vmatprep.mubr.bf16.mxu0 %v6496_v19  ;;  %v6761_v34 = vadd.f32 %v4708_v63, %v1391_v4  ;;  %v4711_v54 = vadd.f32 %v4710_v13, %v4709_v29 }
 0x172   : > { %v4600_v8 = vpop.f32.mrb[36].mxu0  ;;  %v6763_v5 = vadd.f32 %v4711_v54, %v1394_v60 }
 0x173   : > { %v4601_v41 = vpop.f32.mrb[37].mxu0 }
 0x174   : > { %v4602_v28 = vadd.f32 %v4601_v41, %v4600_v8  ;;  %v4603_v51 = vpop.f32.mrb[38].mxu0  ;;  %v4712_v43 = vpop.f32.mrb[36].mxu1 }
 0x175   : > { %v4604_v23 = vpop.f32.mrb[39].mxu0  ;;  %v4713_v44 = vpop.f32.mrb[37].mxu1 }
 0x176   : > { %v1399_v1 = vadd.f32 %v4602_v28, %v6667_v25  ;;  %v4605_v3 = vadd.f32 %v4604_v23, %v4603_v51  ;;  %v4714_v35 = vadd.f32 %v4713_v44, %v4712_v43  ;;  %v4715_v37 = vpop.f32.mrb[38].mxu1  ;;  %v5727_v43 = vld [vmem:[#allocation2 + $0x68] sm:$0xff]  }
 0x177   : > { %5507 = vmatmul.mubr.bf16.gmra.mrb[144].mxu0 %v6511_v61  ;;  %v4716_v18 = vpop.f32.mrb[39].mxu1  ;;  %v5728_v23 = vld [vmem:[#allocation2 + $0x28] sm:$0xff]   ;;  %5012 = vmatprep.subr.bf16.mxu1 %v5727_v43  ;;  %v5732_v43 = vld [vmem:[#allocation2 + $0x80] sm:$0xff]  }
 0x178   : > { %v1402_v19 = vadd.f32 %v4605_v3, %v6667_v25  ;;  %5510 = vmatprep.mubr.bf16.mxu0 %v6530_v9  ;;  %v6769_v6 = vadd.f32 %v4714_v35, %v1399_v1  ;;  %v4717_v2 = vadd.f32 %v4716_v18, %v4715_v37  ;;  %5013 = vmatpush3.bf16.msra.mxu1 %v5728_v23 }
 0x179   : > { %5014 = vmatprep.subr.bf16.mxu1 %v5729_v17 }
 0x17a   : > { %v4606_v14 = vpop.f32.mrb[40].mxu0  ;;  %v6771_v56 = vadd.f32 %v4717_v2, %v1402_v19 }
 0x17b   : > { %v4607_v22 = vpop.f32.mrb[41].mxu0 }
 0x17c   : > { %v4608_v39 = vadd.f32 %v4607_v22, %v4606_v14  ;;  %v4609_v53 = vpop.f32.mrb[42].mxu0  ;;  %v4718_v48 = vpop.f32.mrb[40].mxu1  ;;  %5015 = vmatpush3.bf16.msra.mxu1 %v5730_v50 }
 0x17d   : > { %v4610_v52 = vpop.f32.mrb[43].mxu0  ;;  %v4719_v24 = vpop.f32.mrb[41].mxu1 }
 0x17e   : > { %v1407_v61 = vadd.f32 %v4608_v39, %v6667_v25  ;;  %v4611_v36 = vadd.f32 %v4610_v52, %v4609_v53  ;;  %v4720_v59 = vadd.f32 %v4719_v24, %v4718_v48  ;;  %v4721_v47 = vpop.f32.mrb[42].mxu1 }
 0x17f   : > { %5511 = vmatmul.mubr.bf16.gmra.mrb[148].mxu0 %v6547_v10  ;;  %v4722_v4 = vpop.f32.mrb[43].mxu1 }
 0x180   : > { %v1410_v9 = vadd.f32 %v4611_v36, %v6667_v25  ;;  %5514 = vmatprep.mubr.bf16.mxu0 %v6562_v16  ;;  %v6777_v21 = vadd.f32 %v4720_v59, %v1407_v61  ;;  %v4723_v11 = vadd.f32 %v4722_v4, %v4721_v47 }
 0x182   : > { %v4612_v63 = vpop.f32.mrb[44].mxu0  ;;  %v6779_v29 = vadd.f32 %v4723_v11, %v1410_v9 }
 0x183   : > { %v4613_v60 = vpop.f32.mrb[45].mxu0 }
 0x184   : > { %v4614_v13 = vadd.f32 %v4613_v60, %v4612_v63  ;;  %v4615_v54 = vpop.f32.mrb[46].mxu0  ;;  %v4724_v8 = vpop.f32.mrb[44].mxu1 }
 0x185   : > { %v4616_v41 = vpop.f32.mrb[47].mxu0  ;;  %v4725_v10 = vpop.f32.mrb[45].mxu1 }
 0x186   : > { %v1415_v28 = vadd.f32 %v4614_v13, %v6667_v25  ;;  %v4617_v51 = vadd.f32 %v4616_v41, %v4615_v54  ;;  %v4726_v1 = vadd.f32 %v4725_v10, %v4724_v8  ;;  %v4727_v3 = vpop.f32.mrb[46].mxu1 }
 0x187   : > { %5515 = vmatmul.mubr.bf16.gmra.mrb[152].mxu0 %v6570_v57  ;;  %v4728_v44 = vpop.f32.mrb[47].mxu1 }
 0x188   : > { %v1418_v16 = vadd.f32 %v4617_v51, %v6667_v25  ;;  %5518 = vmatprep.mubr.bf16.mxu0 %v6712_v45  ;;  %v6785_v46 = vadd.f32 %v4726_v1, %v1415_v28  ;;  %v4729_v33 = vadd.f32 %v4728_v44, %v4727_v3  ;;  %v5731_v28 = vld [vmem:[#allocation2 + $0xc0] sm:$0xff]  }
 0x189   : > { %5114 = vmatprep.subr.bf16.mxu0 %v5731_v28 }
 0x18a   : > { %v4618_v35 = vpop.f32.mrb[48].mxu0  ;;  %v6787_v37 = vadd.f32 %v4729_v33, %v1418_v16  ;;  %5115 = vmatpush3.bf16.msra.mxu0 %v5732_v43  ;;  %v5733_v33 = vld [vmem:[#allocation2 + $0xc8] sm:$0xff]  }
 0x18b   : > { %v4619_v19 = vpop.f32.mrb[49].mxu0  ;;  %5116 = vmatprep.subr.bf16.mxu0 %v5733_v33 }
 0x18c   : > { %v4620_v18 = vadd.f32 %v4619_v19, %v4618_v35  ;;  %v4621_v2 = vpop.f32.mrb[50].mxu0  ;;  %v4730_v14 = vpop.f32.mrb[48].mxu1 }
 0x18d   : > { %v4622_v22 = vpop.f32.mrb[51].mxu0  ;;  %v4731_v53 = vpop.f32.mrb[49].mxu1 }
 0x18e   : > { %v1423_v57 = vadd.f32 %v4620_v18, %v6667_v25  ;;  %v4623_v39 = vadd.f32 %v4622_v22, %v4621_v2  ;;  %v4732_v48 = vadd.f32 %v4731_v53, %v4730_v14  ;;  %v4733_v52 = vpop.f32.mrb[50].mxu1  ;;  %v5734_v18 = vld [vmem:[#allocation2 + $0x88] sm:$0xff]  }
 0x18f   : > { %5519 = vmatmul.mubr.bf16.gmra.mrb[156].mxu0 %v708_v38  ;;  %v4734_v61 = vpop.f32.mrb[51].mxu1 }
 0x190   : > { %v1426_v45 = vadd.f32 %v4623_v39, %v6667_v25  ;;  %v6794_v36 = vadd.f32 %v4732_v48, %v1423_v57  ;;  %v4735_v24 = vadd.f32 %v4734_v61, %v4733_v52  ;;  %5117 = vmatpush3.bf16.msra.mxu0 %v5734_v18  ;;  %v5735_v52 = vld [vmem:[#allocation2 + $0xd0] sm:$0xff]  }
 0x191   : > { %5118 = vmatprep.subr.bf16.mxu0 %v5735_v52 }
 0x192   : > { %v4624_v59 = vpop.f32.mrb[52].mxu0  ;;  %v6796_v47 = vadd.f32 %v4735_v24, %v1426_v45  ;;  %v5736_v24 = vld [vmem:[#allocation2 + $0x90] sm:$0xff]  }
 0x193   : > { %v4625_v9 = vpop.f32.mrb[53].mxu0 }
 0x194   : > { %v4626_v4 = vadd.f32 %v4625_v9, %v4624_v59  ;;  %v4627_v11 = vpop.f32.mrb[54].mxu0  ;;  %v4736_v63 = vpop.f32.mrb[52].mxu1  ;;  %5119 = vmatpush3.bf16.msra.mxu0 %v5736_v24 }
 0x195   : > { %v4628_v60 = vpop.f32.mrb[55].mxu0  ;;  %v4737_v8 = vpop.f32.mrb[53].mxu1 }
 0x196   : > { %v1431_v13 = vadd.f32 %v4626_v4, %v6667_v25  ;;  %v4629_v54 = vadd.f32 %v4628_v60, %v4627_v11  ;;  %v4738_v38 = vadd.f32 %v4737_v8, %v4736_v63  ;;  %v4739_v41 = vpop.f32.mrb[54].mxu1  ;;  %v5739_v60 = vld [vmem:[#allocation2 + $0xd8] sm:$0xff]  }
 0x197   : > { %v4740_v10 = vpop.f32.mrb[55].mxu1  ;;  %v5740_v8 = vld [vmem:[#allocation2 + $0x98] sm:$0xff]   ;;  %5120 = vmatprep.subr.bf16.mxu0 %v5739_v60 }
 0x198   : > { %v1434_v51 = vadd.f32 %v4629_v54, %v6667_v25  ;;  %v6800_v23 = vadd.f32 %v4738_v38, %v1431_v13  ;;  %v4741_v1 = vadd.f32 %v4740_v10, %v4739_v41  ;;  %v5738_v10 = vld [vmem:[#allocation2 + $0x38] sm:$0xff]   ;;  %5121 = vmatpush3.bf16.msra.mxu0 %v5740_v8 }
 0x19a   : > { %v4630_v3 = vpop.f32.mrb[56].mxu0  ;;  %v6802_v16 = vadd.f32 %v4741_v1, %v1434_v51  ;;  %v5737_v51 = vld [vmem:[#allocation2 + $0x78] sm:$0xff]  }
 0x19b   : > { %v4631_v44 = vpop.f32.mrb[57].mxu0  ;;  %5016 = vmatprep.subr.bf16.mxu1 %v5737_v51  ;;  %v5745_v51 = vld [vmem:[#allocation2 + $0xf0] sm:$0xff]  }
 0x19c   : > { %v4632_v35 = vadd.f32 %v4631_v44, %v4630_v3  ;;  %v4633_v19 = vpop.f32.mrb[58].mxu0  ;;  %v4742_v2 = vpop.f32.mrb[56].mxu1  ;;  %v5741_v3 = vld [vmem:[#allocation2 + $0xe0] sm:$0xff]   ;;  %5017 = vmatpush3.bf16.msra.mxu1 %v5738_v10 }
 0x19d   : > { %v4634_v14 = vpop.f32.mrb[59].mxu0  ;;  %v4743_v39 = vpop.f32.mrb[57].mxu1  ;;  %5122 = vmatprep.subr.bf16.mxu0 %v5741_v3  ;;  %v5746_v3 = vld [vmem:[#allocation2 + $0xb0] sm:$0xff]  }
 0x19e   : > { %v1439_v22 = vadd.f32 %v4632_v35, %v6667_v25  ;;  %v4635_v57 = vadd.f32 %v4634_v14, %v4633_v19  ;;  %v4744_v53 = vadd.f32 %v4743_v39, %v4742_v2  ;;  %v4745_v48 = vpop.f32.mrb[58].mxu1  ;;  %v5742_v35 = vld [vmem:[#allocation2 + $0xa0] sm:$0xff]   ;;  %v5906_v19 = vmov 0.0  }
 0x19f   : > { %v4746_v61 = vpop.f32.mrb[59].mxu1  ;;  %v6812_v18 = vrot.slane %v5906_v19, 7  ;;  %5123 = vmatpush3.bf16.msra.mxu0 %v5742_v35 }
 0x1a0   : > { %v1442_v45 = vadd.f32 %v4635_v57, %v6667_v25  ;;  %v6806_v59 = vadd.f32 %v4744_v53, %v1439_v22  ;;  %v4747_v9 = vadd.f32 %v4746_v61, %v4745_v48  ;;  %v5743_v48 = vld [vmem:[#allocation2 + $0xe8] sm:$0xff]  }
 0x1a1   : > { %v2263_v57 = vsel %vm2162_vm2, 0.0, %v6812_v18  ;;  %5124 = vmatprep.subr.bf16.mxu0 %v5743_v48  ;;  %v6831_v10 = vpack.c.bf16 %v6812_v18, %v6812_v18 }
 0x1a2   : > { %v4636_v4 = vpop.f32.mrb[60].mxu0  ;;  %v6808_v11 = vadd.f32 %v4747_v9, %v1442_v45  ;;  %v2329_v52 = vrot.slane %v2263_v57, 1  ;;  %v2330_v45 = vrot.slane %v6812_v18, 1 }
 0x1a3   : > { %v4637_v63 = vpop.f32.mrb[61].mxu0  ;;  %8267 = vst [vmem:[#allocation8_spill] sm:$0xff] %v6831_v10 }
 0x1a4   : > { %v4638_v13 = vadd.f32 %v4637_v63, %v4636_v4  ;;  %v4639_v54 = vpop.f32.mrb[62].mxu0  ;;  %v4748_v17 = vpop.f32.mrb[60].mxu1  ;;  %v5744_v4 = vld [vmem:[#allocation2 + $0xa8] sm:$0xff]  }
 0x1a5   : > { %v4640_v50 = vpop.f32.mrb[63].mxu0  ;;  %v4749_v28 = vpop.f32.mrb[61].mxu1  ;;  %5125 = vmatpush3.bf16.msra.mxu0 %v5744_v4 }
 0x1a6   : > { %v1447_v38 = vadd.f32 %v4638_v13, %v6667_v25  ;;  %v4641_v41 = vadd.f32 %v4640_v50, %v4639_v54  ;;  %v4750_v43 = vadd.f32 %v4749_v28, %v4748_v17  ;;  %v4751_v1 = vpop.f32.mrb[62].mxu1  ;;  %v2331_v13 = vsel %vm395_vm0, %v2329_v52, %v2330_v45  ;;  %5126 = vmatprep.subr.bf16.mxu0 %v5745_v51  ;;  %v5748_v52 = vld [vmem:[#allocation2 + $0xf8] sm:$0xff]  }
 0x1a7   : > { %v4752_v33 = vpop.f32.mrb[63].mxu1 }
 0x1a8   : > { %v1450_v44 = vadd.f32 %v4641_v41, %v6667_v25  ;;  %v6814_v2 = vadd.f32 %v4750_v43, %v1447_v38  ;;  %v4753_v14 = vadd.f32 %v4752_v33, %v4751_v1  ;;  %v2280_v25 = vsel %vm2162_vm2, %v6812_v18, 0.0 }
 0x1a9   : > { %v2332_v61 = vrot.slane %v2280_v25, 1  ;;  %5127 = vmatpush3.bf16.msra.mxu0 %v5746_v3  ;;  %v2444_v48 = vrot.slane %v2280_v25, 2  ;;  %v5747_v3 = vld [vmem:[#allocation2 + $0x140] sm:$0xff]  }
 0x1aa   : > { %v4770_v22 = vpop.f32.mrb[64].mxu0  ;;  %v6820_v39 = vadd.f32 %v4753_v14, %v1450_v44  ;;  %5128 = vmatprep.subr.bf16.mxu0 %v5748_v52  ;;  %5226 = vmatprep.subr.bf16.mxu1 %v5747_v3 }
 0x1ab   : > { %v4771_v53 = vpop.f32.mrb[65].mxu0  ;;  %v2333_v54 = vsel %vm395_vm0, %v2330_v45, %v2332_v61 }
 0x1ac   : > { %v4772_v24 = vadd.f32 %v4771_v53, %v4770_v22  ;;  %v4773_v9 = vpop.f32.mrb[66].mxu0  ;;  %v4882_v63 = vpop.f32.mrb[64].mxu1  ;;  %v6826_v38 = vpack.c.bf16 %v2333_v54, %v2331_v13  ;;  %v2441_v53 = vrot.slane %v2263_v57, 2 }
 0x1ad   : > { %v4774_v60 = vpop.f32.mrb[67].mxu0  ;;  %v4883_v50 = vpop.f32.mrb[65].mxu1 }
 0x1ae   : > { %v1649_v8 = vadd.f32 %v4772_v24, %v6675_v12  ;;  %v4775_v17 = vadd.f32 %v4774_v60, %v4773_v9  ;;  %8266 = vst [vmem:[#allocation10_spill] sm:$0xff] %v6826_v38  ;;  %v4884_v41 = vadd.f32 %v4883_v50, %v4882_v63  ;;  %v4885_v28 = vpop.f32.mrb[66].mxu1  ;;  %3235 = vmatprep.mubr.bf16.mxu1 %v6826_v38  ;;  %v5750_v24 = vld [vmem:[#allocation2 + $0xb8] sm:$0xff]   ;;  %v2442_v60 = vrot.slane %v6812_v18, 2 }
 0x1af   : > { %v4886_v1 = vpop.f32.mrb[67].mxu1  ;;  %4335 = vmatmul.mubr.msk.bf16.vlgmr.msra.gmra.mrb[128].mxu1 %vm6835_vm5, %v6831_v10  ;;  %5129 = vmatpush3.bf16.msra.mxu0 %v5750_v24 }
 0x1b0   : > { %v1652_v43 = vadd.f32 %v4775_v17, %v6679_v26  ;;  %v4887_v44 = vadd.f32 %v4886_v1, %v4885_v28  ;;  %v6839_v33 = vadd.f32 %v4884_v41, %v1649_v8  ;;  %v2443_v57 = vsel %vm508_vm1, %v2441_v53, %v2442_v60 }
 0x1b1   : > { %v2445_v25 = vsel %vm508_vm1, %v2442_v60, %v2444_v48 }
 0x1b2   : > { %v4776_v35 = vpop.f32.mrb[68].mxu0  ;;  %v6844_v19 = vadd.f32 %v4887_v44, %v1652_v43  ;;  %v6853_v28 = vpack.c.bf16 %v2445_v25, %v2443_v57 }
 0x1b3   : > { %v4777_v26 = vpop.f32.mrb[69].mxu0 }
 0x1b4   : > { %v4778_v14 = vadd.f32 %v4777_v26, %v4776_v35  ;;  %v4779_v22 = vpop.f32.mrb[70].mxu0  ;;  %v4888_v45 = vpop.f32.mrb[68].mxu1  ;;  %8270 = vst [vmem:[#allocation9_spill] sm:$0xff] %v6853_v28 }
 0x1b5   : > { %v4780_v61 = vpop.f32.mrb[71].mxu0  ;;  %v4889_v63 = vpop.f32.mrb[69].mxu1 }
 0x1b6   : > { %v1657_v9 = vadd.f32 %v4778_v14, %v6687_v55  ;;  %v4781_v4 = vadd.f32 %v4780_v61, %v4779_v22  ;;  %v4890_v13 = vadd.f32 %v4889_v63, %v4888_v45  ;;  %v4891_v54 = vpop.f32.mrb[70].mxu1  ;;  %v5749_v22 = vld [vmem:[#allocation2 + $0x100] sm:$0xff]  }
 0x1b7   : > { %v4892_v17 = vpop.f32.mrb[71].mxu1  ;;  %5227 = vmatpush3.bf16.msra.mxu1 %v5749_v22 }
 0x1b8   : > { %v1660_v8 = vadd.f32 %v4781_v4, %v6691_v0  ;;  %v4893_v50 = vadd.f32 %v4892_v17, %v4891_v54  ;;  %v6851_v41 = vadd.f32 %v4890_v13, %v1657_v9 }
 0x1ba   : > { %v4782_v55 = vpop.f32.mrb[72].mxu0  ;;  %v6855_v43 = vadd.f32 %v4893_v50, %v1660_v8 }
 0x1bb   : > { %v4783_v51 = vpop.f32.mrb[73].mxu0 }
 0x1bc   : > { %v4784_v18 = vadd.f32 %v4783_v51, %v4782_v55  ;;  %v4785_v1 = vpop.f32.mrb[74].mxu0  ;;  %v4894_v44 = vpop.f32.mrb[72].mxu1 }
 0x1bd   : > { %v4786_v35 = vpop.f32.mrb[75].mxu0  ;;  %v4895_v14 = vpop.f32.mrb[73].mxu1 }
 0x1be   : > { %v1665_v0 = vadd.f32 %v4784_v18, %v6707_v42  ;;  %v4787_v26 = vadd.f32 %v4786_v35, %v4785_v1  ;;  %v4896_v53 = vadd.f32 %v4895_v14, %v4894_v44  ;;  %v4897_v48 = vpop.f32.mrb[74].mxu1 }
 0x1bf   : > { %v4898_v45 = vpop.f32.mrb[75].mxu1 }
 0x1c0   : > { %v1668_v52 = vadd.f32 %v4787_v26, %v6710_v27  ;;  %v4899_v61 = vadd.f32 %v4898_v45, %v4897_v48  ;;  %v6859_v24 = vadd.f32 %v4896_v53, %v1665_v0  ;;  %v5751_v48 = vld [vmem:[#allocation2 + $0x148] sm:$0xff]  }
 0x1c1   : > { %5228 = vmatprep.subr.bf16.mxu1 %v5751_v48 }
 0x1c2   : > { %v4788_v9 = vpop.f32.mrb[76].mxu0  ;;  %v6861_v63 = vadd.f32 %v4899_v61, %v1668_v52 }
 0x1c3   : > { %v4789_v4 = vpop.f32.mrb[77].mxu0 }
 0x1c4   : > { %v4790_v60 = vadd.f32 %v4789_v4, %v4788_v9  ;;  %v4791_v13 = vpop.f32.mrb[78].mxu0  ;;  %v4900_v42 = vpop.f32.mrb[76].mxu1  ;;  %v5752_v9 = vld [vmem:[#allocation2 + $0x108] sm:$0xff]  }
 0x1c5   : > { %v4792_v54 = vpop.f32.mrb[79].mxu0  ;;  %v4901_v57 = vpop.f32.mrb[77].mxu1  ;;  %5229 = vmatpush3.bf16.msra.mxu1 %v5752_v9 }
 0x1c6   : > { %v1673_v8 = vadd.f32 %v4790_v60, %v6720_v62  ;;  %v4793_v17 = vadd.f32 %v4792_v54, %v4791_v13  ;;  %v4902_v25 = vadd.f32 %v4901_v57, %v4900_v42  ;;  %v4903_v50 = vpop.f32.mrb[78].mxu1 }
 0x1c7   : > { %v4904_v55 = vpop.f32.mrb[79].mxu1 }
 0x1c8   : > { %v1676_v27 = vadd.f32 %v4793_v17, %v6723_v40  ;;  %v4905_v51 = vadd.f32 %v4904_v55, %v4903_v50  ;;  %v6865_v18 = vadd.f32 %v4902_v25, %v1673_v8 }
 0x1ca   : > { %v4794_v1 = vpop.f32.mrb[80].mxu0  ;;  %v6867_v44 = vadd.f32 %v4905_v51, %v1676_v27 }
 0x1cb   : > { %v4795_v3 = vpop.f32.mrb[81].mxu0 }
 0x1cc   : > { %v4796_v35 = vadd.f32 %v4795_v3, %v4794_v1  ;;  %v4797_v0 = vpop.f32.mrb[82].mxu0  ;;  %v4906_v26 = vpop.f32.mrb[80].mxu1 }
 0x1cd   : > { %v4798_v14 = vpop.f32.mrb[83].mxu0  ;;  %v4907_v53 = vpop.f32.mrb[81].mxu1 }
 0x1ce   : > { %v1681_v62 = vadd.f32 %v4796_v35, %v6728_v15  ;;  %v4799_v22 = vadd.f32 %v4798_v14, %v4797_v0  ;;  %v4908_v52 = vadd.f32 %v4907_v53, %v4906_v26  ;;  %v4909_v45 = vpop.f32.mrb[82].mxu1 }
 0x1cf   : > { %v4910_v61 = vpop.f32.mrb[83].mxu1 }
 0x1d0   : > { %v1684_v40 = vadd.f32 %v4799_v22, %v6731_v32  ;;  %v4911_v4 = vadd.f32 %v4910_v61, %v4909_v45  ;;  %v6871_v60 = vadd.f32 %v4908_v52, %v1681_v62 }
 0x1d2   : > { %v4800_v13 = vpop.f32.mrb[84].mxu0  ;;  %v6873_v54 = vadd.f32 %v4911_v4, %v1684_v40  ;;  %v5753_v4 = vld [vmem:[#allocation2 + $0x150] sm:$0xff]  }
 0x1d3   : > { %v4801_v42 = vpop.f32.mrb[85].mxu0  ;;  %5230 = vmatprep.subr.bf16.mxu1 %v5753_v4 }
 0x1d4   : > { %v4802_v8 = vadd.f32 %v4801_v42, %v4800_v13  ;;  %v4803_v15 = vpop.f32.mrb[86].mxu0  ;;  %v4912_v17 = vpop.f32.mrb[84].mxu1 }
 0x1d5   : > { %v4804_v57 = vpop.f32.mrb[87].mxu0  ;;  %v4913_v27 = vpop.f32.mrb[85].mxu1 }
 0x1d6   : > { %v1689_v25 = vadd.f32 %v4802_v8, %v6737_v31  ;;  %v4805_v50 = vadd.f32 %v4804_v57, %v4803_v15  ;;  %v4914_v32 = vadd.f32 %v4913_v27, %v4912_v17  ;;  %v4915_v55 = vpop.f32.mrb[86].mxu1  ;;  %v5754_v15 = vld [vmem:[#allocation2 + $0x110] sm:$0xff]  }
 0x1d7   : > { %v4916_v1 = vpop.f32.mrb[87].mxu1  ;;  %5231 = vmatpush3.bf16.msra.mxu1 %v5754_v15 }
 0x1d8   : > { %v1692_v51 = vadd.f32 %v4805_v50, %v6739_v58  ;;  %v4917_v3 = vadd.f32 %v4916_v1, %v4915_v55  ;;  %v6877_v35 = vadd.f32 %v4914_v32, %v1689_v25 }
 0x1da   : > { %v4806_v0 = vpop.f32.mrb[88].mxu0  ;;  %v6879_v14 = vadd.f32 %v4917_v3, %v1692_v51 }
 0x1db   : > { %v4807_v26 = vpop.f32.mrb[89].mxu0 }
 0x1dc   : > { %v4808_v62 = vadd.f32 %v4807_v26, %v4806_v0  ;;  %v4809_v22 = vpop.f32.mrb[90].mxu0  ;;  %v4918_v53 = vpop.f32.mrb[88].mxu1 }
 0x1dd   : > { %v4810_v48 = vpop.f32.mrb[91].mxu0  ;;  %v4919_v45 = vpop.f32.mrb[89].mxu1 }
 0x1de   : > { %v1697_v31 = vadd.f32 %v4808_v62, %v6745_v20  ;;  %v4811_v52 = vadd.f32 %v4810_v48, %v4809_v22  ;;  %v4920_v40 = vadd.f32 %v4919_v45, %v4918_v53  ;;  %v4921_v61 = vpop.f32.mrb[90].mxu1 }
 0x1df   : > { %v4922_v9 = vpop.f32.mrb[91].mxu1 }
 0x1e0   : > { %v1700_v58 = vadd.f32 %v4811_v52, %v6747_v7  ;;  %v4923_v13 = vadd.f32 %v4922_v9, %v4921_v61  ;;  %v6883_v42 = vadd.f32 %v4920_v40, %v1697_v31 }
 0x1e2   : > { %v4812_v8 = vpop.f32.mrb[92].mxu0  ;;  %v6885_v57 = vadd.f32 %v4923_v13, %v1700_v58 }
 0x1e3   : > { %v4813_v17 = vpop.f32.mrb[93].mxu0 }
 0x1e4   : > { %v4814_v25 = vadd.f32 %v4813_v17, %v4812_v8  ;;  %v4815_v50 = vpop.f32.mrb[94].mxu0  ;;  %v4924_v20 = vpop.f32.mrb[92].mxu1 }
 0x1e5   : > { %v4816_v27 = vpop.f32.mrb[95].mxu0  ;;  %v4925_v7 = vpop.f32.mrb[93].mxu1 }
 0x1e6   : > { %v1705_v32 = vadd.f32 %v4814_v25, %v6753_v30  ;;  %v4817_v55 = vadd.f32 %v4816_v27, %v4815_v50  ;;  %v4926_v51 = vadd.f32 %v4925_v7, %v4924_v20  ;;  %v4927_v1 = vpop.f32.mrb[94].mxu1  ;;  %v5755_v25 = vld [vmem:[#allocation2 + $0x158] sm:$0xff]  }
 0x1e7   : > { %v4928_v0 = vpop.f32.mrb[95].mxu1  ;;  %5232 = vmatprep.subr.bf16.mxu1 %v5755_v25 }
 0x1e8   : > { %v1708_v3 = vadd.f32 %v4817_v55, %v6755_v49  ;;  %v4929_v26 = vadd.f32 %v4928_v0, %v4927_v1  ;;  %v6889_v62 = vadd.f32 %v4926_v51, %v1705_v32  ;;  %v5756_v55 = vld [vmem:[#allocation2 + $0x118] sm:$0xff]  }
 0x1e9   : > { %5233 = vmatpush3.bf16.msra.mxu1 %v5756_v55 }
 0x1ea   : > { %v4818_v22 = vpop.f32.mrb[96].mxu0  ;;  %v6891_v48 = vadd.f32 %v4929_v26, %v1708_v3 }
 0x1eb   : > { %v4819_v53 = vpop.f32.mrb[97].mxu0 }
 0x1ec   : > { %v4820_v31 = vadd.f32 %v4819_v53, %v4818_v22  ;;  %v4821_v52 = vpop.f32.mrb[98].mxu0  ;;  %v4930_v45 = vpop.f32.mrb[96].mxu1  ;;  %v5757_v53 = vld [vmem:[#allocation2 + $0x1c0] sm:$0xff]  }
 0x1ed   : > { %v4822_v40 = vpop.f32.mrb[99].mxu0  ;;  %v4931_v58 = vpop.f32.mrb[97].mxu1  ;;  %5338 = vmatprep.subr.bf16.mxu0 %v5757_v53 }
 0x1ee   : > { %v1713_v30 = vadd.f32 %v4820_v31, %v6761_v34  ;;  %v4823_v61 = vadd.f32 %v4822_v40, %v4821_v52  ;;  %v4932_v9 = vadd.f32 %v4931_v58, %v4930_v45  ;;  %v4933_v4 = vpop.f32.mrb[98].mxu1 }
 0x1ef   : > { %v4934_v13 = vpop.f32.mrb[99].mxu1 }
 0x1f0   : > { %v1716_v49 = vadd.f32 %v4823_v61, %v6763_v5  ;;  %v4935_v8 = vadd.f32 %v4934_v13, %v4933_v4  ;;  %v6895_v15 = vadd.f32 %v4932_v9, %v1713_v30 }
 0x1f2   : > { %v4824_v17 = vpop.f32.mrb[100].mxu0  ;;  %v6897_v20 = vadd.f32 %v4935_v8, %v1716_v49  ;;  %v5759_v8 = vld [vmem:[#allocation2 + $0x160] sm:$0xff]  }
 0x1f3   : > { %v4825_v50 = vpop.f32.mrb[101].mxu0  ;;  %5234 = vmatprep.subr.bf16.mxu1 %v5759_v8 }
 0x1f4   : > { %v4826_v27 = vadd.f32 %v4825_v50, %v4824_v17  ;;  %v4827_v32 = vpop.f32.mrb[102].mxu0  ;;  %v4936_v34 = vpop.f32.mrb[100].mxu1 }
 0x1f5   : > { %v4828_v7 = vpop.f32.mrb[103].mxu0  ;;  %v4937_v3 = vpop.f32.mrb[101].mxu1 }
 0x1f6   : > { %v1721_v51 = vadd.f32 %v4826_v27, %v6769_v6  ;;  %v4829_v1 = vadd.f32 %v4828_v7, %v4827_v32  ;;  %v4938_v5 = vadd.f32 %v4937_v3, %v4936_v34  ;;  %v4939_v0 = vpop.f32.mrb[102].mxu1 }
 0x1f7   : > { %v4940_v22 = vpop.f32.mrb[103].mxu1 }
 0x1f8   : > { %v1724_v26 = vadd.f32 %v4829_v1, %v6771_v56  ;;  %v4941_v31 = vadd.f32 %v4940_v22, %v4939_v0  ;;  %v6901_v52 = vadd.f32 %v4938_v5, %v1721_v51  ;;  %v5760_v56 = vld [vmem:[#allocation2 + $0x120] sm:$0xff]  }
 0x1f9   : > { %5235 = vmatpush3.bf16.msra.mxu1 %v5760_v56 }
 0x1fa   : > { %v4830_v45 = vpop.f32.mrb[104].mxu0  ;;  %v6903_v30 = vadd.f32 %v4941_v31, %v1724_v26 }
 0x1fb   : > { %v4831_v40 = vpop.f32.mrb[105].mxu0 }
 0x1fc   : > { %v4832_v61 = vadd.f32 %v4831_v40, %v4830_v45  ;;  %v4833_v58 = vpop.f32.mrb[106].mxu0  ;;  %v4942_v6 = vpop.f32.mrb[104].mxu1 }
 0x1fd   : > { %v4834_v9 = vpop.f32.mrb[107].mxu0  ;;  %v4943_v13 = vpop.f32.mrb[105].mxu1 }
 0x1fe   : > { %v1729_v4 = vadd.f32 %v4832_v61, %v6777_v21  ;;  %v4835_v49 = vadd.f32 %v4834_v9, %v4833_v58  ;;  %v4944_v17 = vadd.f32 %v4943_v13, %v4942_v6  ;;  %v4945_v25 = vpop.f32.mrb[106].mxu1 }
 0x1ff   : > { %v4946_v27 = vpop.f32.mrb[107].mxu1 }
 0x200   : > { %v1732_v50 = vadd.f32 %v4835_v49, %v6779_v29  ;;  %v4947_v32 = vadd.f32 %v4946_v27, %v4945_v25  ;;  %v6907_v55 = vadd.f32 %v4944_v17, %v1729_v4  ;;  %v5763_v25 = vld [vmem:[#allocation2 + $0x168] sm:$0xff]  }
 0x201   : > { %5236 = vmatprep.subr.bf16.mxu1 %v5763_v25 }
 0x202   : > { %v4836_v34 = vpop.f32.mrb[108].mxu0  ;;  %v6909_v51 = vadd.f32 %v4947_v32, %v1732_v50  ;;  %v5764_v50 = vld [vmem:[#allocation2 + $0x128] sm:$0xff]  }
 0x203   : > { %v4837_v7 = vpop.f32.mrb[109].mxu0  ;;  %5237 = vmatpush3.bf16.msra.mxu1 %v5764_v50 }
 0x204   : > { %v4838_v1 = vadd.f32 %v4837_v7, %v4836_v34  ;;  %v4839_v21 = vpop.f32.mrb[110].mxu0  ;;  %v4948_v3 = vpop.f32.mrb[108].mxu1 }
 0x205   : > { %v4840_v5 = vpop.f32.mrb[111].mxu0  ;;  %v4949_v22 = vpop.f32.mrb[109].mxu1 }
 0x206   : > { %v1737_v0 = vadd.f32 %v4838_v1, %v6785_v46  ;;  %v4841_v26 = vadd.f32 %v4840_v5, %v4839_v21  ;;  %v4950_v53 = vadd.f32 %v4949_v22, %v4948_v3  ;;  %v4951_v29 = vpop.f32.mrb[110].mxu1 }
 0x207   : > { %v4952_v45 = vpop.f32.mrb[111].mxu1 }
 0x208   : > { %v1740_v31 = vadd.f32 %v4841_v26, %v6787_v37  ;;  %v4953_v40 = vadd.f32 %v4952_v45, %v4951_v29  ;;  %v6913_v61 = vadd.f32 %v4950_v53, %v1737_v0 }
 0x20a   : > { %v4842_v58 = vpop.f32.mrb[112].mxu0  ;;  %v6915_v9 = vadd.f32 %v4953_v40, %v1740_v31 }
 0x20b   : > { %v4843_v6 = vpop.f32.mrb[113].mxu0 }
 0x20c   : > { %v4844_v4 = vadd.f32 %v4843_v6, %v4842_v58  ;;  %v4845_v49 = vpop.f32.mrb[114].mxu0  ;;  %v4954_v13 = vpop.f32.mrb[112].mxu1 }
 0x20d   : > { %v4846_v8 = vpop.f32.mrb[115].mxu0  ;;  %v4955_v17 = vpop.f32.mrb[113].mxu1 }
 0x20e   : > { %v1745_v46 = vadd.f32 %v4844_v4, %v6794_v36  ;;  %v4847_v56 = vadd.f32 %v4846_v8, %v4845_v49  ;;  %v4956_v27 = vadd.f32 %v4955_v17, %v4954_v13  ;;  %v4957_v37 = vpop.f32.mrb[114].mxu1 }
 0x20f   : > { %v4958_v34 = vpop.f32.mrb[115].mxu1 }
 0x210   : > { %v1748_v32 = vadd.f32 %v4847_v56, %v6796_v47  ;;  %v4959_v7 = vadd.f32 %v4958_v34, %v4957_v37  ;;  %v6919_v1 = vadd.f32 %v4956_v27, %v1745_v46  ;;  %v5767_v37 = vld [vmem:[#allocation2 + $0x170] sm:$0xff]  }
 0x211   : > { %5238 = vmatprep.subr.bf16.mxu1 %v5767_v37 }
 0x212   : > { %v4848_v21 = vpop.f32.mrb[116].mxu0  ;;  %v6921_v5 = vadd.f32 %v4959_v7, %v1748_v32  ;;  %v5768_v32 = vld [vmem:[#allocation2 + $0x130] sm:$0xff]  }
 0x213   : > { %v4849_v3 = vpop.f32.mrb[117].mxu0  ;;  %5239 = vmatpush3.bf16.msra.mxu1 %v5768_v32 }
 0x214   : > { %v4850_v0 = vadd.f32 %v4849_v3, %v4848_v21  ;;  %v4851_v36 = vpop.f32.mrb[118].mxu0  ;;  %v4960_v26 = vpop.f32.mrb[116].mxu1 }
 0x215   : > { %v4852_v22 = vpop.f32.mrb[119].mxu0  ;;  %v4961_v31 = vpop.f32.mrb[117].mxu1 }
 0x216   : > { %v1753_v53 = vadd.f32 %v4850_v0, %v6800_v23  ;;  %v4853_v29 = vadd.f32 %v4852_v22, %v4851_v36  ;;  %v4962_v45 = vadd.f32 %v4961_v31, %v4960_v26  ;;  %v4963_v47 = vpop.f32.mrb[118].mxu1 }
 0x217   : > { %v4964_v58 = vpop.f32.mrb[119].mxu1 }
 0x218   : > { %v1756_v40 = vadd.f32 %v4853_v29, %v6802_v16  ;;  %v4965_v6 = vadd.f32 %v4964_v58, %v4963_v47  ;;  %v6925_v4 = vadd.f32 %v4962_v45, %v1753_v53 }
 0x21a   : > { %v4854_v49 = vpop.f32.mrb[120].mxu0  ;;  %v6927_v8 = vadd.f32 %v4965_v6, %v1756_v40 }
 0x21b   : > { %v4855_v13 = vpop.f32.mrb[121].mxu0 }
 0x21c   : > { %v4856_v46 = vadd.f32 %v4855_v13, %v4854_v49  ;;  %v4857_v56 = vpop.f32.mrb[122].mxu0  ;;  %v4966_v17 = vpop.f32.mrb[120].mxu1 }
 0x21d   : > { %v4858_v25 = vpop.f32.mrb[123].mxu0  ;;  %v4967_v27 = vpop.f32.mrb[121].mxu1 }
 0x21e   : > { %v1761_v23 = vadd.f32 %v4856_v46, %v6806_v59  ;;  %v4859_v50 = vadd.f32 %v4858_v25, %v4857_v56  ;;  %v4968_v34 = vadd.f32 %v4967_v27, %v4966_v17  ;;  %v4969_v16 = vpop.f32.mrb[122].mxu1 }
 0x21f   : > { %v4970_v21 = vpop.f32.mrb[123].mxu1 }
 0x220   : > { %v1764_v7 = vadd.f32 %v4859_v50, %v6808_v11  ;;  %v4971_v3 = vadd.f32 %v4970_v21, %v4969_v16  ;;  %v6931_v0 = vadd.f32 %v4968_v34, %v1761_v23  ;;  %v5771_v16 = vld [vmem:[#allocation2 + $0x178] sm:$0xff]  }
 0x221   : > { %5240 = vmatprep.subr.bf16.mxu1 %v5771_v16 }
 0x222   : > { %v4860_v36 = vpop.f32.mrb[124].mxu0  ;;  %v6933_v22 = vadd.f32 %v4971_v3, %v1764_v7  ;;  %v5772_v7 = vld [vmem:[#allocation2 + $0x138] sm:$0xff]  }
 0x223   : > { %v4861_v26 = vpop.f32.mrb[125].mxu0  ;;  %5241 = vmatpush3.bf16.msra.mxu1 %v5772_v7 }
 0x224   : > { %v4862_v53 = vadd.f32 %v4861_v26, %v4860_v36  ;;  %v4863_v59 = vpop.f32.mrb[126].mxu0  ;;  %v4972_v29 = vpop.f32.mrb[124].mxu1 }
 0x225   : > { %v4864_v31 = vpop.f32.mrb[127].mxu0  ;;  %v4973_v40 = vpop.f32.mrb[125].mxu1 }
 0x226   : > { %v1769_v45 = vadd.f32 %v4862_v53, %v6814_v2  ;;  %v4865_v47 = vadd.f32 %v4864_v31, %v4863_v59  ;;  %v4974_v58 = vadd.f32 %v4973_v40, %v4972_v29  ;;  %v4975_v11 = vpop.f32.mrb[126].mxu1 }
 0x227   : > { %v4976_v49 = vpop.f32.mrb[127].mxu1 }
 0x228   : > { %v1772_v6 = vadd.f32 %v4865_v47, %v6820_v39  ;;  %v4977_v13 = vadd.f32 %v4976_v49, %v4975_v11  ;;  %v6937_v46 = vadd.f32 %v4974_v58, %v1769_v45 }
 0x22a   : > { %v5492_v56 = vpop.f32.mrb[128].mxu0  ;;  %v6940_v23 = vadd.f32 %v4977_v13, %v1772_v6 }
 0x22b   : > { %v1979_v17 = vadd.f32 %v5492_v56, %v6851_v41  ;;  %v1970_v25 = vpop.f32.mrb[129].mxu0 }
 0x22c   : > { %v1971_v50 = vadd.f32 %v1970_v25, %v6839_v33  ;;  %v5493_v27 = vpop.f32.mrb[130].mxu0 }
 0x22d   : > { %v2099_v2 = vmax.f32 %v1979_v17, 0.0  ;;  %v1982_v37 = vadd.f32 %v5493_v27, %v6855_v43  ;;  %v1973_v32 = vpop.f32.mrb[131].mxu0 }
 0x22e   : > { %v2097_v34 = vmax.f32 %v1971_v50, 0.0  ;;  %v1974_v39 = vadd.f32 %v1973_v32, %v6844_v19 }
 0x22f   : > { %v2168_v21 = vrot.slane %v2099_v2, 7  ;;  %v2100_v3 = vmax.f32 %v1982_v37, 0.0  ;;  %v7024_v2 = vld [vmem:[#allocation2 + $0x200] sm:$0xff]  }
 0x230   : > { %v2165_v36 = vrot.slane %v2097_v34, 7  ;;  %v2098_v26 = vmax.f32 %v1974_v39, 0.0  ;;  %5522 = vmatprep.subr.bf16.mxu1 %v7024_v2 }
 0x231   : > { %v6946_v41 = vsel %vm2162_vm2, 0.0, %v2168_v21  ;;  %v2169_v53 = vrot.slane %v2100_v3, 7 }
 0x232   : > { %v2339_v33 = vrot.slane %v6946_v41, 1  ;;  %v2264_v43 = vsel %vm2162_vm2, 0.0, %v2165_v36  ;;  %v2166_v59 = vrot.slane %v2098_v26, 7  ;;  %v5496_v29 = vpop.f32.mrb[132].mxu0 }
 0x233   : > { %v2334_v31 = vrot.slane %v2264_v43, 1  ;;  %v6952_v45 = vsel %vm2162_vm2, %v2168_v21, %v2169_v53  ;;  %v6955_v47 = vsel %vm2162_vm2, %v2169_v53, 0.0  ;;  %v1986_v40 = vpop.f32.mrb[133].mxu0  ;;  %v2446_v58 = vrot.slane %v2264_v43, 2 }
 0x234   : > { %v2340_v11 = vrot.slane %v6952_v45, 1  ;;  %v2342_v6 = vrot.slane %v6955_v47, 1  ;;  %v5497_v13 = vpop.f32.mrb[134].mxu0  ;;  %v6961_v56 = vsel %vm2162_vm2, %v2165_v36, %v2166_v59  ;;  %v6964_v17 = vsel %vm2162_vm2, %v2166_v59, 0.0 }
 0x235   : > { %v1995_v25 = vadd.f32 %v5496_v29, %v6865_v18  ;;  %v1987_v50 = vadd.f32 %v1986_v40, %v6859_v24  ;;  %v1989_v27 = vpop.f32.mrb[135].mxu0  ;;  %v2335_v37 = vrot.slane %v6961_v56, 1  ;;  %v2337_v32 = vrot.slane %v6964_v17, 1 }
 0x236   : > { %v2447_v34 = vrot.slane %v6961_v56, 2  ;;  %v1998_v7 = vadd.f32 %v5497_v13, %v6867_v44  ;;  %v1990_v3 = vadd.f32 %v1989_v27, %v6861_v63  ;;  %v4338_v26 = vpack.c.bf16 %v6961_v56, %v2165_v36  ;;  %v5761_v13 = vld [vmem:[#allocation2 + $0x1c8] sm:$0xff]  }
 0x237   : > { %v2103_v39 = vmax.f32 %v1995_v25, 0.0  ;;  %v2101_v16 = vmax.f32 %v1987_v50, 0.0  ;;  %v6976_v18 = vpack.c.bf16 %v6952_v45, %v2168_v21  ;;  %v2336_v24 = vsel %vm395_vm0, %v2334_v31, %v2335_v37  ;;  %v5758_v25 = vld [vmem:[#allocation2 + $0x180] sm:$0xff]  }
 0x238   : > { %v2338_v53 = vsel %vm395_vm0, %v2335_v37, %v2337_v32  ;;  %v2104_v29 = vmax.f32 %v1998_v7, 0.0  ;;  %v2102_v40 = vmax.f32 %v1990_v3, 0.0  ;;  %4399 = vmatprep.mubr.msk.bf16.mxu0 %vm6835_vm5, %v4338_v26  ;;  %v2341_v36 = vsel %vm395_vm0, %v2339_v33, %v2340_v11  ;;  %v5765_v33 = vld [vmem:[#allocation2 + $0x1d0] sm:$0xff]  }
 0x239   : > { %v6980_v43 = vrot.slane %v2103_v39, 7  ;;  %v2171_v59 = vrot.slane %v2101_v16, 7  ;;  %v6984_v63 = vpack.c.bf16 %v2338_v53, %v2336_v24  ;;  %v2343_v21 = vsel %vm395_vm0, %v2340_v11, %v2342_v6  ;;  %3397 = vmatmul.mubr.bf16.vlgmr.msra.gmra.mrb[160].mxu0 %v6853_v28  ;;  %v5762_v53 = vld [vmem:[#allocation2 + $0x188] sm:$0xff]  }
 0x23a   : > { %v5500_v44 = vpop.f32.mrb[136].mxu0  ;;  %v2448_v31 = vsel %vm508_vm1, %v2446_v58, %v2447_v34  ;;  %v2175_v27 = vrot.slane %v2104_v29, 7  ;;  %v2172_v37 = vrot.slane %v2102_v40, 7  ;;  %v2449_v39 = vrot.slane %v6964_v17, 2  ;;  %4403 = vmatprep.mubr.msk.bf16.mxu0 %vm6835_vm5, %v6976_v18  ;;  %5339 = vmatpush3.bf16.msra.mxu0 %v5758_v25 }
 0x23b   : > { %v6991_v56 = vsel %vm2162_vm2, 0.0, %v6980_v43  ;;  %v6994_v50 = vsel %vm2162_vm2, 0.0, %v2171_v59  ;;  %v2002_v32 = vpop.f32.mrb[137].mxu0  ;;  %3243 = vmatprep.mubr.bf16.mxu1 %v6984_v63  ;;  %5340 = vmatprep.subr.bf16.mxu0 %v5761_v13  ;;  %v2011_v29 = vadd.f32 %v5500_v44, %v6877_v35  ;;  %v7033_v49 = vpack.c.bf16 %v2343_v21, %v2341_v36  ;;  %v5766_v36 = vld [vmem:[#allocation2 + $0x190] sm:$0xff]  }
 0x23c   : > { %v2344_v58 = vrot.slane %v6994_v50, 1  ;;  %v5501_v6 = vpop.f32.mrb[138].mxu0  ;;  %v7007_v16 = vsel %vm2162_vm2, %v6980_v43, %v2175_v27  ;;  %v7010_v7 = vsel %vm2162_vm2, %v2175_v27, 0.0  ;;  %v7013_v17 = vsel %vm2162_vm2, %v2171_v59, %v2172_v37  ;;  %4339 = vmatmul.mubr.msk.bf16.gmra.mrb[132].mxu1 %vm6835_vm5, %v4338_v26 }
 0x23d   : > { %v7016_v3 = vsel %vm2162_vm2, %v2172_v37, 0.0  ;;  %v2005_v24 = vpop.f32.mrb[139].mxu0  ;;  %v2345_v19 = vrot.slane %v7013_v17, 1  ;;  %v2003_v40 = vadd.f32 %v2002_v32, %v6871_v60  ;;  %v2014_v11 = vadd.f32 %v5501_v6, %v6879_v14  ;;  %3251 = vmatprep.mubr.bf16.mxu1 %v7033_v49 }
 0x23e   : > { %v2347_v26 = vrot.slane %v7016_v3, 1  ;;  %v2006_v13 = vadd.f32 %v2005_v24, %v6873_v54  ;;  %v2450_v37 = vsel %vm508_vm1, %v2447_v34, %v2449_v39  ;;  %v7039_v27 = vpack.c.bf16 %v7013_v17, %v2171_v59  ;;  %5341 = vmatpush3.bf16.msra.mxu0 %v5762_v53 }
 0x23f   : > { %v2346_v28 = vsel %vm395_vm0, %v2344_v58, %v2345_v19  ;;  %v2107_v25 = vmax.f32 %v2011_v29, 0.0  ;;  %v2105_v35 = vmax.f32 %v2003_v40, 0.0  ;;  %v2108_v44 = vmax.f32 %v2014_v11, 0.0  ;;  %5342 = vmatprep.subr.bf16.mxu0 %v5765_v33  ;;  %v5769_v11 = vld [vmem:[#allocation2 + $0x1d8] sm:$0xff]  }
 0x240   : > { %8271 = vst [vmem:[#allocation11_spill] sm:$0xff] %v7039_v27  ;;  %v7043_v60 = vpack.c.bf16 %v2450_v37, %v2448_v31  ;;  %v2106_v21 = vmax.f32 %v2006_v13, 0.0  ;;  %v2348_v59 = vsel %vm395_vm0, %v2345_v19, %v2347_v26  ;;  %v8272_v32 = vrot.slane %v6952_v45, 2 }
 0x241   : > { %v8273_v39 = vrot.slane %v6946_v41, 2  ;;  %v7052_v6 = vrot.slane %v2107_v25, 7  ;;  %v7054_v31 = vrot.slane %v2105_v35, 7  ;;  %v2181_v24 = vrot.slane %v2108_v44, 7  ;;  %v5776_v35 = vld [vmem:[#allocation2 + $0x1a8] sm:$0xff]  }
 0x242   : > { %v5504_v14 = vpop.f32.mrb[140].mxu0  ;;  %3405 = vmatmul.mubr.bf16.gmra.mrb[164].mxu0 %v7043_v60  ;;  %v2178_v53 = vrot.slane %v2106_v21, 7  ;;  %v7065_v29 = vpack.c.bf16 %v2348_v59, %v2346_v28  ;;  %v8275_v21 = vrot.slane %v6955_v47, 2  ;;  %v5777_v47 = vld [vmem:[#allocation2 + $0x1f0] sm:$0xff]  }
 0x243   : > { %v2027_v54 = vadd.f32 %v5504_v14, %v6889_v62  ;;  %v2018_v34 = vpop.f32.mrb[141].mxu0  ;;  %v2453_v58 = vsel %vm508_vm1, %v8273_v39, %v8272_v32  ;;  %4407 = vmatprep.mubr.msk.bf16.mxu0 %vm6835_vm5, %v7039_v27  ;;  %v7069_v37 = vsel %vm2162_vm2, 0.0, %v7052_v6  ;;  %v7077_v26 = vsel %vm2162_vm2, %v7052_v6, %v2181_v24  ;;  %5343 = vmatpush3.bf16.msra.mxu0 %v5766_v36  ;;  %v5773_v14 = vld [vmem:[#allocation2 + $0x1e0] sm:$0xff]  }
 0x244   : > { %v2019_v33 = vadd.f32 %v2018_v34, %v6883_v42  ;;  %v5505_v62 = vpop.f32.mrb[142].mxu0  ;;  %4343 = vmatmul.mubr.msk.bf16.gmra.mrb[136].mxu1 %vm6835_vm5, %v6976_v18  ;;  %8274 = vst [vmem:[#allocation12_spill] sm:$0xff] %v7065_v29  ;;  %v7073_v42 = vsel %vm2162_vm2, 0.0, %v7054_v31  ;;  %v7080_v25 = vsel %vm2162_vm2, %v2181_v24, 0.0  ;;  %5344 = vmatprep.subr.bf16.mxu0 %v5769_v11  ;;  %v7093_v59 = vsel %vm2162_vm2, %v7054_v31, %v2178_v53  ;;  %v5774_v36 = vld [vmem:[#allocation2 + $0x1a0] sm:$0xff]   ;;  %v5775_v11 = vld [vmem:[#allocation2 + $0x1e8] sm:$0xff]  }
 0x245   : > { %v2111_v19 = vmax.f32 %v2027_v54, 0.0  ;;  %v2030_v41 = vadd.f32 %v5505_v62, %v6891_v48  ;;  %v2021_v40 = vpop.f32.mrb[143].mxu0  ;;  %v5770_v48 = vld [vmem:[#allocation2 + $0x198] sm:$0xff]   ;;  %3259 = vmatprep.mubr.bf16.mxu1 %v7065_v29  ;;  %v7096_v32 = vsel %vm2162_vm2, %v2178_v53, 0.0 }
 0x246   : > { %v2109_v24 = vmax.f32 %v2019_v33, 0.0  ;;  %v2022_v33 = vadd.f32 %v2021_v40, %v6885_v57 }
 0x247   : > { %v7098_v39 = vrot.slane %v2111_v19, 7  ;;  %5345 = vmatpush3.bf16.msra.mxu0 %v5770_v48  ;;  %v2112_v19 = vmax.f32 %v2030_v41, 0.0  ;;  %v8276_v48 = vrot.slane %v6952_v45, 2 }
 0x248   : > { %v7108_v53 = vrot.slane %v2109_v24, 7  ;;  %5346 = vmatprep.subr.bf16.mxu0 %v5773_v14  ;;  %v7120_v24 = vpack.c.bf16 %v7007_v16, %v6980_v43  ;;  %v2110_v14 = vmax.f32 %v2022_v33, 0.0 }
 0x249   : > { %v7106_v13 = vsel %vm2162_vm2, 0.0, %v7098_v39  ;;  %v2455_v62 = vsel %vm508_vm1, %v8276_v48, %v8275_v21  ;;  %v2187_v40 = vrot.slane %v2112_v19, 7 }
 0x24a   : > { %v5508_v34 = vpop.f32.mrb[144].mxu0  ;;  %8277 = vst [vmem:[#allocation13_spill] sm:$0xff] %v7120_v24  ;;  %v7124_v57 = vsel %vm2162_vm2, 0.0, %v7108_v53  ;;  %v7126_v44 = vpack.c.bf16 %v2455_v62, %v2453_v58  ;;  %v2184_v62 = vrot.slane %v2110_v14, 7  ;;  %v5780_v14 = vld [vmem:[#allocation2 + $0x1f8] sm:$0xff]  }
 0x24b   : > { %v2034_v54 = vpop.f32.mrb[145].mxu0  ;;  %v2043_v43 = vadd.f32 %v5508_v34, %v6901_v52  ;;  %5347 = vmatpush3.bf16.msra.mxu0 %v5774_v36  ;;  %v7137_v19 = vsel %vm2162_vm2, %v7098_v39, %v2187_v40  ;;  %v7140_v58 = vsel %vm2162_vm2, %v2187_v40, 0.0  ;;  %v8280_v52 = vrot.slane %v7010_v7, 1 }
 0x24c   : > { %v5509_v41 = vpop.f32.mrb[146].mxu0  ;;  %4347 = vmatmul.mubr.msk.bf16.gmra.mrb[140].mxu1 %vm6835_vm5, %v7039_v27  ;;  %v2035_v48 = vadd.f32 %v2034_v54, %v6895_v15  ;;  %3413 = vmatmul.mubr.bf16.gmra.mrb[168].mxu0 %v7126_v44  ;;  %v7153_v36 = vsel %vm2162_vm2, %v7108_v53, %v2184_v62  ;;  %v5778_v15 = vld [vmem:[#allocation2 + $0x1b0] sm:$0xff]   ;;  %v8284_v27 = vrot.slane %v7016_v3, 2  ;;  %v8290_v3 = vrot.slane %v7073_v42, 1 }
 0x24d   : > { %v2037_v45 = vpop.f32.mrb[147].mxu0  ;;  %v2046_v33 = vadd.f32 %v5509_v41, %v6903_v30  ;;  %5348 = vmatprep.subr.bf16.mxu0 %v5775_v11  ;;  %4411 = vmatprep.mubr.msk.bf16.mxu0 %vm6835_vm5, %v7120_v24  ;;  %v7156_v30 = vsel %vm2162_vm2, %v2184_v62, 0.0  ;;  %v2115_v11 = vmax.f32 %v2043_v43, 0.0  ;;  %v8278_v62 = vrot.slane %v7007_v16, 1 }
 0x24e   : > { %v2113_v41 = vmax.f32 %v2035_v48, 0.0  ;;  %v8279_v43 = vrot.slane %v6991_v56, 1 }
 0x24f   : > { %5349 = vmatpush3.bf16.msra.mxu0 %v5776_v35  ;;  %v7162_v21 = vrot.slane %v2115_v11, 7  ;;  %v2116_v10 = vmax.f32 %v2046_v33, 0.0  ;;  %v8281_v34 = vmov %v8278_v62  ;;  %v2038_v11 = vadd.f32 %v2037_v45, %v6897_v20 }
 0x250   : > { %v7164_v28 = vrot.slane %v2113_v41, 7  ;;  %v2351_v48 = vsel %vm395_vm0, %v8279_v43, %v8278_v62  ;;  %5350 = vmatprep.subr.bf16.mxu0 %v5777_v47  ;;  %v2353_v35 = vsel %vm395_vm0, %v8281_v34, %v8280_v52  ;;  %v8282_v41 = vrot.slane %v7013_v17, 2 }
 0x251   : > { %v8283_v33 = vrot.slane %v6994_v50, 2  ;;  %v7189_v29 = vsel %vm2162_vm2, 0.0, %v7162_v21  ;;  %v2193_v45 = vrot.slane %v2116_v10, 7  ;;  %v7195_v52 = vpack.c.bf16 %v2353_v35, %v2351_v48 }
 0x252   : > { %v5512_v54 = vpop.f32.mrb[148].mxu0  ;;  %v8285_v62 = vmov %v8282_v41  ;;  %v7193_v20 = vsel %vm2162_vm2, 0.0, %v7164_v28  ;;  %v2114_v10 = vmax.f32 %v2038_v11, 0.0  ;;  %v8289_v35 = vrot.slane %v7093_v59, 1 }
 0x253   : > { %v2050_v40 = vpop.f32.mrb[149].mxu0  ;;  %v2458_v38 = vsel %vm508_vm1, %v8283_v33, %v8282_v41  ;;  %v2460_v47 = vsel %vm508_vm1, %v8285_v62, %v8284_v27  ;;  %8286 = vst [vmem:[#allocation14_spill] sm:$0xff] %v7195_v52  ;;  %5351 = vmatpush3.bf16.msra.mxu0 %v5778_v15  ;;  %v5781_v41 = vld [vmem:[#allocation2 + $0x1b8] sm:$0xff]   ;;  %v7203_v33 = vsel %vm2162_vm2, %v7162_v21, %v2193_v45  ;;  %v7206_v62 = vsel %vm2162_vm2, %v2193_v45, 0.0 }
 0x254   : > { %v5513_v43 = vpop.f32.mrb[150].mxu0  ;;  %3267 = vmatprep.mubr.bf16.mxu1 %v7195_v52  ;;  %v7209_v48 = vpack.c.bf16 %v2460_v47, %v2458_v38  ;;  %5352 = vmatprep.subr.bf16.mxu0 %v5780_v14  ;;  %v2190_v45 = vrot.slane %v2114_v10, 7  ;;  %v7221_v38 = vpack.c.bf16 %v7093_v59, %v7054_v31  ;;  %v2059_v14 = vadd.f32 %v5512_v54, %v6913_v61 }
 0x255   : > { %v2053_v50 = vpop.f32.mrb[151].mxu0  ;;  %4351 = vmatmul.mubr.msk.bf16.gmra.mrb[144].mxu1 %vm6835_vm5, %v7120_v24  ;;  %v2051_v11 = vadd.f32 %v2050_v40, %v6907_v55  ;;  %v2062_v47 = vadd.f32 %v5513_v43, %v6915_v9  ;;  %v2356_v15 = vsel %vm395_vm0, %v8290_v3, %v8289_v35  ;;  %v8291_v10 = vrot.slane %v7096_v32, 1 }
 0x256   : > { %8287 = vst [vmem:[#allocation15_spill] sm:$0xff] %v7209_v48  ;;  %3421 = vmatmul.mubr.bf16.gmra.mrb[172].mxu0 %v7209_v48  ;;  %8288 = vst [vmem:[#allocation16_spill] sm:$0xff] %v7221_v38  ;;  %v8292_v17 = vmov %v8289_v35  ;;  %v2054_v31 = vadd.f32 %v2053_v50, %v6909_v51  ;;  %v7239_v55 = vsel %vm2162_vm2, %v7164_v28, %v2190_v45  ;;  %v7242_v61 = vsel %vm2162_vm2, %v2190_v45, 0.0 }
 0x257   : > { %v2358_v27 = vsel %vm395_vm0, %v8292_v17, %v8291_v10  ;;  %5353 = vmatpush3.bf16.msra.mxu0 %v5781_v41  ;;  %4415 = vmatprep.mubr.msk.bf16.mxu0 %vm6835_vm5, %v7221_v38  ;;  %v2119_v9 = vmax.f32 %v2059_v14, 0.0  ;;  %v2117_v54 = vmax.f32 %v2051_v11, 0.0  ;;  %v2120_v45 = vmax.f32 %v2062_v47, 0.0 }
 0x258   : > { %v7255_v10 = vpack.c.bf16 %v2358_v27, %v2356_v15  ;;  %v2118_v14 = vmax.f32 %v2054_v31, 0.0  ;;  %v8294_v11 = vrot.slane %v7007_v16, 2  ;;  %v8295_v43 = vrot.slane %v6991_v56, 2 }
 0x259   : > { %v7251_v41 = vrot.slane %v2119_v9, 7  ;;  %v7253_v35 = vrot.slane %v2117_v54, 7  ;;  %v8296_v50 = vrot.slane %v7010_v7, 2  ;;  %v7269_v54 = vpack.c.bf16 %v7077_v26, %v7052_v6 }
 0x25a   : > { %v5516_v34 = vpop.f32.mrb[152].mxu0  ;;  %8293 = vst [vmem:[#allocation17_spill] sm:$0xff] %v7255_v10  ;;  %v2463_v51 = vsel %vm508_vm1, %v8295_v43, %v8294_v11  ;;  %v8297_v3 = vmov %v8294_v11  ;;  %v2199_v56 = vrot.slane %v2120_v45, 7  ;;  %3275 = vmatprep.mubr.bf16.mxu1 %v7255_v10 }
 0x25b   : > { %v2066_v40 = vpop.f32.mrb[153].mxu0  ;;  %v2465_v9 = vsel %vm508_vm1, %v8297_v3, %v8296_v50  ;;  %v7273_v27 = vsel %vm2162_vm2, 0.0, %v7251_v41  ;;  %v7277_v15 = vsel %vm2162_vm2, 0.0, %v7253_v35  ;;  %v2075_v3 = vadd.f32 %v5516_v34, %v6925_v4 }
 0x25c   : > { %v5517_v17 = vpop.f32.mrb[154].mxu0  ;;  %v7280_v7 = vpack.c.bf16 %v2465_v9, %v2463_v51  ;;  %v7291_v43 = vsel %vm2162_vm2, %v7251_v41, %v2199_v56  ;;  %v7294_v50 = vsel %vm2162_vm2, %v2199_v56, 0.0  ;;  %v2196_v51 = vrot.slane %v2118_v14, 7 }
 0x25d   : > { %v2069_v24 = vpop.f32.mrb[155].mxu0  ;;  %4355 = vmatmul.mubr.msk.bf16.gmra.mrb[148].mxu1 %vm6835_vm5, %v7221_v38  ;;  %v2123_v4 = vmax.f32 %v2075_v3, 0.0  ;;  %v2067_v34 = vadd.f32 %v2066_v40, %v6919_v1  ;;  %v2078_v52 = vadd.f32 %v5517_v17, %v6927_v8  ;;  %v8300_v3 = vrot.slane %v7069_v37, 1 }
 0x25e   : > { %8298 = vst [vmem:[#allocation18_spill] sm:$0xff] %v7280_v7  ;;  %3429 = vmatmul.mubr.bf16.gmra.mrb[176].mxu0 %v7280_v7  ;;  %v7307_v14 = vsel %vm2162_vm2, %v7253_v35, %v2196_v51  ;;  %v7310_v56 = vsel %vm2162_vm2, %v2196_v51, 0.0  ;;  %v8299_v51 = vrot.slane %v7077_v26, 1  ;;  %v8301_v9 = vrot.slane %v7080_v25, 1 }
 0x25f   : > { %4419 = vmatprep.mubr.msk.bf16.mxu0 %vm6835_vm5, %v7269_v54  ;;  %v7317_v38 = vrot.slane %v2123_v4, 7  ;;  %v2121_v10 = vmax.f32 %v2067_v34, 0.0  ;;  %v2070_v31 = vadd.f32 %v2069_v24, %v6921_v5  ;;  %v8303_v4 = vrot.slane %v7093_v59, 2 }
 0x260   : > { %v2361_v1 = vsel %vm395_vm0, %v8300_v3, %v8299_v51  ;;  %v8302_v6 = vmov %v8299_v51  ;;  %v8304_v34 = vrot.slane %v7073_v42, 2  ;;  %v8305_v17 = vrot.slane %v7096_v32, 2 }
 0x261   : > { %v2363_v11 = vsel %vm395_vm0, %v8302_v6, %v8301_v9  ;;  %v8306_v7 = vmov %v8303_v4  ;;  %v7343_v3 = vsel %vm2162_vm2, 0.0, %v7317_v38  ;;  %v7345_v48 = vrot.slane %v2121_v10, 7 }
 0x262   : > { %v5520_v47 = vpop.f32.mrb[156].mxu0  ;;  %v2468_v8 = vsel %vm508_vm1, %v8304_v34, %v8303_v4  ;;  %v2470_v51 = vsel %vm508_vm1, %v8306_v7, %v8305_v17  ;;  %v2124_v6 = vmax.f32 %v2078_v52, 0.0  ;;  %v7347_v5 = vpack.c.bf16 %v2363_v11, %v2361_v1 }
 0x263   : > { %v2082_v45 = vpop.f32.mrb[157].mxu0  ;;  %v2122_v9 = vmax.f32 %v2070_v31, 0.0  ;;  %v7351_v4 = vpack.c.bf16 %v2470_v51, %v2468_v8  ;;  %v7355_v59 = vsel %vm2162_vm2, 0.0, %v7345_v48  ;;  %v7360_v10 = vpack.c.bf16 %v7153_v36, %v7108_v53 }
 0x264   : > { %v5521_v16 = vpop.f32.mrb[158].mxu0  ;;  %v2205_v32 = vrot.slane %v2124_v6, 7  ;;  %3283 = vmatprep.mubr.bf16.mxu1 %v7347_v5  ;;  %v2091_v52 = vadd.f32 %v5520_v47, %v6937_v46  ;;  %v2083_v1 = vadd.f32 %v2082_v45, %v6931_v0  ;;  %v8310_v45 = vrot.slane %v7156_v30, 1 }
 0x265   : > { %v2085_v40 = vpop.f32.mrb[159].mxu0  ;;  %8307 = vst [vmem:[#allocation19_spill] sm:$0xff] %v7360_v10  ;;  %v2202_v31 = vrot.slane %v2122_v9, 7  ;;  %4359 = vmatmul.mubr.msk.bf16.gmra.mrb[152].mxu1 %vm6835_vm5, %v7269_v54  ;;  %v2094_v47 = vadd.f32 %v5521_v16, %v6940_v23  ;;  %v8320_v23 = vrot.slane %v7153_v36, 2  ;;  %v7524_v24 = vpack.c.bf16 %v7203_v33, %v7162_v21 }
 0x266   : > { %3437 = vmatmul.mubr.bf16.gmra.mrb[180].mxu0 %v7351_v4  ;;  %v7372_v34 = vsel %vm2162_vm2, %v7317_v38, %v2205_v32  ;;  %v7375_v53 = vsel %vm2162_vm2, %v2205_v32, 0.0  ;;  %v2127_v46 = vmax.f32 %v2091_v52, 0.0  ;;  %v2125_v32 = vmax.f32 %v2083_v1, 0.0 }
 0x267   : > { %4423 = vmatprep.mubr.msk.bf16.mxu0 %vm6835_vm5, %v7360_v10  ;;  %v7387_v51 = vsel %vm2162_vm2, %v7345_v48, %v2202_v31  ;;  %v7390_v6 = vsel %vm2162_vm2, %v2202_v31, 0.0  ;;  %v2128_v8 = vmax.f32 %v2094_v47, 0.0  ;;  %v8308_v31 = vrot.slane %v7153_v36, 1 }
 0x268   : > { %v7392_v9 = vrot.slane %v2127_v46, 7  ;;  %v7402_v0 = vrot.slane %v2125_v32, 7  ;;  %v8309_v46 = vrot.slane %v7124_v57, 1  ;;  %v2086_v32 = vadd.f32 %v2085_v40, %v6933_v22 }
 0x269   : > { %v8311_v7 = vmov %v8308_v31  ;;  %v2211_v11 = vrot.slane %v2128_v8, 7  ;;  %v8314_v22 = vrot.slane %v7080_v25, 2 }
 0x26a   : > { %v7400_v17 = vsel %vm2162_vm2, 0.0, %v7392_v9  ;;  %v2366_v1 = vsel %vm395_vm0, %v8309_v46, %v8308_v31  ;;  %v2368_v52 = vsel %vm395_vm0, %v8311_v7, %v8310_v45  ;;  %v7419_v47 = vsel %vm2162_vm2, 0.0, %v7402_v0 }
 0x26b   : > { %v7421_v16 = vpack.c.bf16 %v2368_v52, %v2366_v1  ;;  %v8312_v31 = vrot.slane %v7077_v26, 2  ;;  %v8313_v46 = vrot.slane %v7069_v37, 2  ;;  %v2126_v7 = vmax.f32 %v2086_v32, 0.0 }
 0x26c   : > { %v7437_v8 = vsel %vm2162_vm2, %v7392_v9, %v2211_v11  ;;  %v7440_v52 = vsel %vm2162_vm2, %v2211_v11, 0.0  ;;  %v7447_v1 = vpack.c.bf16 %v7137_v19, %v7098_v39  ;;  %v8317_v39 = vrot.slane %v7106_v13, 1 }
 0x26d   : > { %v2473_v42 = vsel %vm508_vm1, %v8313_v46, %v8312_v31  ;;  %v8315_v40 = vmov %v8312_v31  ;;  %3291 = vmatprep.mubr.bf16.mxu1 %v7421_v16  ;;  %v2208_v11 = vrot.slane %v2126_v7, 7  ;;  %v8321_v31 = vrot.slane %v7124_v57, 2 }
 0x26e   : > { %v2475_v45 = vsel %vm508_vm1, %v8315_v40, %v8314_v22  ;;  %4363 = vmatmul.mubr.msk.bf16.gmra.mrb[156].mxu1 %vm6835_vm5, %v7360_v10  ;;  %v8318_v22 = vrot.slane %v7140_v58, 1  ;;  %v8324_v57 = vrot.slane %v7239_v55, 1 }
 0x26f   : > { %v7443_v37 = vpack.c.bf16 %v2475_v45, %v2473_v42  ;;  %v8316_v42 = vrot.slane %v7137_v19, 1  ;;  %v2478_v7 = vsel %vm508_vm1, %v8321_v31, %v8320_v23 }
 0x271   : > { %3445 = vmatmul.mubr.bf16.gmra.mrb[184].mxu0 %v7443_v37  ;;  %v2371_v46 = vsel %vm395_vm0, %v8317_v39, %v8316_v42  ;;  %v8319_v40 = vmov %v8316_v42  ;;  %v8322_v42 = vrot.slane %v7156_v30, 2  ;;  %v8323_v39 = vmov %v8320_v23 }
 0x272   : > { %v2373_v45 = vsel %vm395_vm0, %v8319_v40, %v8318_v22  ;;  %4427 = vmatprep.mubr.msk.bf16.mxu0 %vm6835_vm5, %v7447_v1  ;;  %v7484_v22 = vpack.c.bf16 %v7239_v55, %v7164_v28  ;;  %v8325_v23 = vrot.slane %v7193_v20, 1  ;;  %v7496_v30 = vsel %vm2162_vm2, %v2208_v11, 0.0 }
 0x273   : > { %v7475_v32 = vpack.c.bf16 %v2373_v45, %v2371_v46  ;;  %v2480_v26 = vsel %vm508_vm1, %v8323_v39, %v8322_v42  ;;  %v7493_v46 = vsel %vm2162_vm2, %v7402_v0, %v2208_v11  ;;  %v8326_v40 = vrot.slane %v7242_v61, 1 }
 0x274   : > { %v2376_v31 = vsel %vm395_vm0, %v8325_v23, %v8324_v57  ;;  %v7498_v36 = vpack.c.bf16 %v2480_v26, %v2478_v7  ;;  %v8327_v28 = vmov %v8324_v57  ;;  %v2405_v39 = vrot.slane %v7493_v46, 1 }
 0x275   : > { %v2378_v45 = vsel %vm395_vm0, %v8327_v28, %v8326_v40  ;;  %v2407_v57 = vrot.slane %v7496_v30, 1  ;;  %v2517_v23 = vrot.slane %v7493_v46, 2  ;;  %3299 = vmatprep.mubr.bf16.mxu1 %v7475_v32  ;;  %v8328_v26 = vrot.slane %v7137_v19, 2 }
 0x276   : > { %v7510_v11 = vpack.c.bf16 %v2378_v45, %v2376_v31  ;;  %v8329_v7 = vrot.slane %v7106_v13, 2  ;;  %v8330_v40 = vrot.slane %v7140_v58, 2  ;;  %v8332_v31 = vrot.slane %v7203_v33, 1  ;;  %4367 = vmatmul.mubr.msk.bf16.gmra.mrb[160].mxu1 %vm6835_vm5, %v7447_v1 }
 0x277   : > { %v8331_v28 = vmov %v8328_v26  ;;  %v8333_v45 = vrot.slane %v7189_v29, 1 }
 0x278   : > { %v2483_v25 = vsel %vm508_vm1, %v8329_v7, %v8328_v26  ;;  %v2485_v42 = vsel %vm508_vm1, %v8331_v28, %v8330_v40  ;;  %v8334_v26 = vrot.slane %v7206_v62, 1  ;;  %v8335_v58 = vmov %v8332_v31  ;;  %3307 = vmatprep.mubr.bf16.mxu1 %v7510_v11 }
 0x279   : > { %v7526_v10 = vpack.c.bf16 %v2485_v42, %v2483_v25  ;;  %v2381_v13 = vsel %vm395_vm0, %v8333_v45, %v8332_v31  ;;  %v8336_v7 = vrot.slane %v7239_v55, 2  ;;  %v8337_v40 = vrot.slane %v7193_v20, 2  ;;  %3453 = vmatmul.mubr.bf16.gmra.mrb[188].mxu0 %v7498_v36 }
 0x27a   : > { %v2383_v19 = vsel %vm395_vm0, %v8335_v58, %v8334_v26  ;;  %v8338_v42 = vrot.slane %v7242_v61, 2  ;;  %v7552_v45 = vpack.c.bf16 %v7307_v14, %v7253_v35  ;;  %v8340_v26 = vrot.slane %v7307_v14, 1  ;;  %4431 = vmatprep.mubr.msk.bf16.mxu0 %vm6835_vm5, %v7484_v22 }
 0x27b   : > { %v2488_v21 = vsel %vm508_vm1, %v8337_v40, %v8336_v7  ;;  %v7543_v25 = vpack.c.bf16 %v2383_v19, %v2381_v13  ;;  %v8339_v28 = vmov %v8336_v7  ;;  %v8341_v58 = vrot.slane %v7277_v15, 1 }
 0x27c   : > { %v2490_v31 = vsel %vm508_vm1, %v8339_v28, %v8338_v42  ;;  %v8342_v55 = vrot.slane %v7310_v56, 1  ;;  %v8343_v61 = vmov %v8340_v26  ;;  %v8344_v35 = vrot.slane %v7203_v33, 2 }
 0x27d   : > { %v2386_v20 = vsel %vm395_vm0, %v8341_v58, %v8340_v26  ;;  %v7562_v13 = vpack.c.bf16 %v2490_v31, %v2488_v21  ;;  %v8345_v7 = vrot.slane %v7189_v29, 2  ;;  %v8346_v42 = vrot.slane %v7206_v62, 2 }
 0x27e   : > { %v2388_v19 = vsel %vm395_vm0, %v8343_v61, %v8342_v55  ;;  %v8347_v28 = vmov %v8344_v35  ;;  %v2519_v21 = vrot.slane %v7496_v30, 2  ;;  %v7588_v29 = vpack.c.bf16 %v7291_v43, %v7251_v41  ;;  %4371 = vmatmul.mubr.msk.bf16.gmra.mrb[164].mxu1 %vm6835_vm5, %v7484_v22 }
 0x27f   : > { %v2493_v40 = vsel %vm508_vm1, %v8345_v7, %v8344_v35  ;;  %v2495_v26 = vsel %vm508_vm1, %v8347_v28, %v8346_v42  ;;  %v7582_v31 = vpack.c.bf16 %v2388_v19, %v2386_v20  ;;  %v8348_v33 = vrot.slane %v7291_v43, 1  ;;  %3315 = vmatprep.mubr.bf16.mxu1 %v7543_v25 }
 0x280   : > { %v7584_v58 = vpack.c.bf16 %v2495_v26, %v2493_v40  ;;  %v8349_v62 = vrot.slane %v7273_v27, 1  ;;  %v8350_v55 = vrot.slane %v7294_v50, 1  ;;  %v8352_v19 = vrot.slane %v7307_v14, 2 }
 0x281   : > { %v8351_v20 = vmov %v8348_v33  ;;  %v8353_v41 = vrot.slane %v7277_v15, 2  ;;  %v8354_v7 = vrot.slane %v7310_v56, 2  ;;  %v8357_v15 = vrot.slane %v7355_v59, 1  ;;  %3461 = vmatmul.mubr.bf16.gmra.mrb[192].mxu0 %v7526_v10 }
 0x282   : > { %v2391_v30 = vsel %vm395_vm0, %v8349_v62, %v8348_v33  ;;  %v2393_v61 = vsel %vm395_vm0, %v8351_v20, %v8350_v55  ;;  %v8355_v40 = vmov %v8352_v19  ;;  %v7619_v33 = vpack.c.bf16 %v7387_v51, %v7345_v48  ;;  %4435 = vmatprep.mubr.msk.bf16.mxu0 %vm6835_vm5, %v7524_v24 }
 0x283   : > { %v2498_v35 = vsel %vm508_vm1, %v8353_v41, %v8352_v19  ;;  %v2500_v42 = vsel %vm508_vm1, %v8355_v40, %v8354_v7  ;;  %v7613_v28 = vpack.c.bf16 %v2393_v61, %v2391_v30  ;;  %v8356_v62 = vrot.slane %v7387_v51, 1 }
 0x284   : > { %v7615_v26 = vpack.c.bf16 %v2500_v42, %v2498_v35  ;;  %v8358_v56 = vrot.slane %v7390_v6, 1  ;;  %v8360_v30 = vrot.slane %v7291_v43, 2  ;;  %v8361_v61 = vrot.slane %v7273_v27, 2 }
 0x285   : > { %v2396_v55 = vsel %vm395_vm0, %v8357_v15, %v8356_v62  ;;  %v8359_v14 = vmov %v8356_v62  ;;  %v8362_v48 = vrot.slane %v7294_v50, 2  ;;  %v7643_v7 = vpack.c.bf16 %v7372_v34, %v7317_v38 }
 0x286   : > { %v2398_v20 = vsel %vm395_vm0, %v8359_v14, %v8358_v56  ;;  %v2503_v19 = vsel %vm508_vm1, %v8361_v61, %v8360_v30  ;;  %v8363_v41 = vmov %v8360_v30  ;;  %v8364_v62 = vrot.slane %v7372_v34, 1  ;;  %4375 = vmatmul.mubr.msk.bf16.gmra.mrb[168].mxu1 %vm6835_vm5, %v7524_v24 }
 0x287   : > { %v2505_v35 = vsel %vm508_vm1, %v8363_v41, %v8362_v48  ;;  %v7645_v40 = vpack.c.bf16 %v2398_v20, %v2396_v55  ;;  %v8365_v27 = vrot.slane %v7343_v3, 1  ;;  %v8366_v50 = vrot.slane %v7375_v53, 1  ;;  %3323 = vmatprep.mubr.bf16.mxu1 %v7582_v31 }
 0x288   : > { %v7647_v42 = vpack.c.bf16 %v2505_v35, %v2503_v19  ;;  %v8367_v43 = vmov %v8364_v62  ;;  %v8368_v38 = vrot.slane %v7387_v51, 2  ;;  %v8369_v55 = vrot.slane %v7355_v59, 2 }
 0x289   : > { %v2401_v15 = vsel %vm395_vm0, %v8365_v27, %v8364_v62  ;;  %v2403_v56 = vsel %vm395_vm0, %v8367_v43, %v8366_v50  ;;  %v8370_v30 = vrot.slane %v7390_v6, 2  ;;  %v7673_v48 = vpack.c.bf16 %v7493_v46, %v7402_v0  ;;  %3469 = vmatmul.mubr.bf16.gmra.mrb[196].mxu0 %v7562_v13 }
 0x28a   : > { %v7659_v14 = vpack.c.bf16 %v2403_v56, %v2401_v15  ;;  %v2508_v20 = vsel %vm508_vm1, %v8369_v55, %v8368_v38  ;;  %v8371_v61 = vmov %v8368_v38  ;;  %v8372_v35 = vrot.slane %v7419_v47, 1  ;;  %4439 = vmatprep.mubr.msk.bf16.mxu0 %vm6835_vm5, %v7552_v45 }
 0x28b   : > { %v2510_v19 = vsel %vm508_vm1, %v8371_v61, %v8370_v30  ;;  %v2408_v59 = vsel %vm395_vm0, %v2405_v39, %v2407_v57  ;;  %v8373_v27 = vrot.slane %v7372_v34, 2  ;;  %v8374_v6 = vrot.slane %v7343_v3, 2 }
 0x28c   : > { %v7675_v41 = vpack.c.bf16 %v2510_v19, %v2508_v20  ;;  %v2406_v62 = vsel %vm395_vm0, %v8372_v35, %v2405_v39  ;;  %v8375_v46 = vrot.slane %v7375_v53, 2  ;;  %v7698_v39 = vpack.c.bf16 %v7437_v8, %v7392_v9 }
 0x28d   : > { %v2513_v51 = vsel %vm508_vm1, %v8374_v6, %v8373_v27  ;;  %v7689_v0 = vpack.c.bf16 %v2408_v59, %v2406_v62  ;;  %v8376_v15 = vmov %v8373_v27  ;;  %v8377_v3 = vrot.slane %v7419_v47, 2 }
 0x28e   : > { %v2515_v50 = vsel %vm508_vm1, %v8376_v15, %v8375_v46  ;;  %v2520_v53 = vsel %vm508_vm1, %v2517_v23, %v2519_v21  ;;  %v8378_v34 = vrot.slane %v7437_v8, 1  ;;  %v8379_v56 = vrot.slane %v7400_v17, 1  ;;  %4379 = vmatmul.mubr.msk.bf16.gmra.mrb[172].mxu1 %vm6835_vm5, %v7552_v45  ;;  %v5782_v46 = vld [vmem:[#allocation2 + $0x208] sm:$0xff]   ;;  %v5783_v15 = vld [vmem:[#allocation2 + $0x210] sm:$0xff]  }
 0x28f   : > { %v2518_v57 = vsel %vm508_vm1, %v8377_v3, %v2517_v23  ;;  %v7705_v43 = vpack.c.bf16 %v2515_v50, %v2513_v51  ;;  %v8380_v47 = vrot.slane %v7440_v52, 1  ;;  %v8382_v23 = vrot.slane %v7437_v8, 2  ;;  %3331 = vmatprep.mubr.bf16.mxu1 %v7613_v28  ;;  %v8387_v50 = vld [vmem:[#allocation12_spill] sm:$0xff] }
 0x290   : > { %v2557_v38 = vsel %vm395_vm0, %v8379_v56, %v8378_v34  ;;  %v7716_v9 = vpack.c.bf16 %v2520_v53, %v2518_v57  ;;  %v8381_v55 = vmov %v8378_v34  ;;  %v8383_v21 = vrot.slane %v7400_v17, 2  ;;  %v5018_v17 = vpop.f32.mrb[128].mxu1  ;;  %v5785_v3 = vld [vmem:[#allocation2 + $0x220] sm:$0xff]   ;;  %v8388_v57 = vld [vmem:[#allocation11_spill] sm:$0xff]  ;;  %v8390_v53 = vld [vmem:[#allocation14_spill] sm:$0xff] }
 0x291   : > { %v2559_v20 = vsel %vm395_vm0, %v8381_v55, %v8380_v47  ;;  %v8384_v61 = vrot.slane %v7440_v52, 2  ;;  %v8385_v19 = vmov %v8382_v23  ;;  %v5019_v8 = vpop.f32.mrb[129].mxu1  ;;  %3477 = vmatmul.mubr.bf16.gmra.mrb[200].mxu0 %v7584_v58  ;;  %v5788_v34 = vld [vmem:[#allocation2 + $0x238] sm:$0xff]   ;;  %v8391_v56 = vld [vmem:[#allocation13_spill] sm:$0xff]  ;;  %v8393_v47 = vld [vmem:[#allocation16_spill] sm:$0xff] }
 0x292   : > { %v2564_v30 = vsel %vm508_vm1, %v8383_v21, %v8382_v23  ;;  %v7733_v62 = vpack.c.bf16 %v2559_v20, %v2557_v38  ;;  %v7745_v52 = vadd.f32 %v5019_v8, %v5018_v17  ;;  %v5021_v27 = vpop.f32.mrb[130].mxu1  ;;  %4443 = vmatprep.mubr.msk.bf16.mxu0 %vm6835_vm5, %v7588_v29  ;;  %v8392_v38 = vld [vmem:[#allocation17_spill] sm:$0xff]  ;;  %v8394_v55 = vld [vmem:[#allocation19_spill] sm:$0xff] }
 0x293   : > { %v2566_v35 = vsel %vm508_vm1, %v8385_v19, %v8384_v61  ;;  %v5022_v6 = vpop.f32.mrb[131].mxu1 }
 0x294   : > { %v7735_v59 = vpack.c.bf16 %v2566_v35, %v2564_v30  ;;  %v7747_v51 = vadd.f32 %v5022_v6, %v5021_v27 }
 0x296   : > { %4383 = vmatmul.mubr.msk.bf16.gmra.mrb[176].mxu1 %vm6835_vm5, %v7588_v29 }
 0x297   : > { %3339 = vmatprep.mubr.bf16.mxu1 %v7645_v40 }
 0x299   : > { %3485 = vmatmul.mubr.bf16.gmra.mrb[204].mxu0 %v7615_v26 }
 0x29a   : > { %4447 = vmatprep.mubr.msk.bf16.mxu0 %vm6835_vm5, %v7619_v33 }
 0x29e   : > { %4387 = vmatmul.mubr.msk.bf16.gmra.mrb[180].mxu1 %vm6835_vm5, %v7619_v33 }
 0x29f   : > { %3347 = vmatprep.mubr.bf16.mxu1 %v7659_v14 }
 0x2a1   : > { %3493 = vmatmul.mubr.bf16.gmra.mrb[208].mxu0 %v7647_v42 }
 0x2a2   : > { %4451 = vmatprep.mubr.msk.bf16.mxu0 %vm6835_vm5, %v7643_v7 }
 0x2a6   : > { %4391 = vmatmul.mubr.msk.bf16.gmra.mrb[184].mxu1 %vm6835_vm5, %v7643_v7 }
 0x2a7   : > { %3355 = vmatprep.mubr.bf16.mxu1 %v7689_v0 }
 0x2a9   : > { %3501 = vmatmul.mubr.bf16.gmra.mrb[212].mxu0 %v7675_v41 }
 0x2aa   : > { %4455 = vmatprep.mubr.msk.bf16.mxu0 %vm6835_vm5, %v7673_v48 }
 0x2ae   : > { %4395 = vmatmul.mubr.msk.bf16.gmra.mrb[188].mxu1 %vm6835_vm5, %v7673_v48 }
 0x2af   : > { %3557 = vmatprep.mubr.bf16.mxu1 %v7043_v60  ;;  %v5784_v60 = vld [vmem:[#allocation2 + $0x218] sm:$0xff]  }
 0x2b1   : > { %3509 = vmatmul.mubr.bf16.gmra.mrb[216].mxu0 %v7705_v43 }
 0x2b2   : > { %4459 = vmatprep.mubr.msk.bf16.mxu0 %vm6835_vm5, %v7698_v39 }
 0x2b6   : > { %3558 = vmatmul.mubr.bf16.vlgmr.msra.gmra.mrb[192].mxu1 %v6984_v63  ;;  %v8386_v63 = vld [vmem:[#allocation15_spill] sm:$0xff] }
 0x2b7   : > { %3565 = vmatprep.mubr.bf16.mxu1 %v7126_v44  ;;  %5523 = vmatpush3.bf16.msra.mxu1 %v7024_v2  ;;  %v5786_v2 = vld [vmem:[#allocation2 + $0x228] sm:$0xff]  }
 0x2b8   : > { %5524 = vmatprep.subr.bf16.mxu1 %v5782_v46 }
 0x2b9   : > { %3517 = vmatmul.mubr.bf16.gmra.mrb[220].mxu0 %v7716_v9 }
 0x2ba   : > { %3718 = vmatprep.mubr.bf16.mxu0 %v7033_v49 }
 0x2bb   : > { %5525 = vmatpush3.bf16.msra.mxu1 %v5782_v46 }
 0x2bc   : > { %5526 = vmatprep.subr.bf16.mxu1 %v5783_v15 }
 0x2be   : > { %3566 = vmatmul.mubr.bf16.gmra.mrb[196].mxu1 %v7033_v49  ;;  %v8389_v49 = vld [vmem:[#allocation18_spill] sm:$0xff] }
 0x2bf   : > { %3573 = vmatprep.mubr.bf16.mxu1 %v8386_v63  ;;  %5527 = vmatpush3.bf16.msra.mxu1 %v5783_v15 }
 0x2c0   : > { %5528 = vmatprep.subr.bf16.mxu1 %v5784_v60 }
 0x2c1   : > { %4463 = vmatmul.mubr.msk.bf16.vlgmr.msra.gmra.mrb[224].mxu0 %vm6835_vm5, %v6976_v18  ;;  %v5787_v18 = vld [vmem:[#allocation2 + $0x230] sm:$0xff]  }
 0x2c2   : > { %3726 = vmatprep.mubr.bf16.mxu0 %v8387_v50 }
 0x2c3   : > { %5529 = vmatpush3.bf16.msra.mxu1 %v5784_v60 }
 0x2c4   : > { %5530 = vmatprep.subr.bf16.mxu1 %v5785_v3 }
 0x2c6   : > { %3574 = vmatmul.mubr.bf16.gmra.mrb[200].mxu1 %v8387_v50 }
 0x2c7   : > { %3581 = vmatprep.mubr.bf16.mxu1 %v8389_v49  ;;  %5531 = vmatpush3.bf16.msra.mxu1 %v5785_v3 }
 0x2c8   : > { %5532 = vmatprep.subr.bf16.mxu1 %v5786_v2 }
 0x2c9   : > { %4467 = vmatmul.mubr.msk.bf16.gmra.mrb[228].mxu0 %vm6835_vm5, %v8388_v57 }
 0x2ca   : > { %3734 = vmatprep.mubr.bf16.mxu0 %v8390_v53 }
 0x2cb   : > { %5533 = vmatpush3.bf16.msra.mxu1 %v5786_v2 }
 0x2cc   : > { %5534 = vmatprep.subr.bf16.mxu1 %v5787_v18 }
 0x2ce   : > { %3582 = vmatmul.mubr.bf16.gmra.mrb[204].mxu1 %v8390_v53 }
 0x2cf   : > { %3589 = vmatprep.mubr.bf16.mxu1 %v7351_v4  ;;  %5535 = vmatpush3.bf16.msra.mxu1 %v5787_v18 }
 0x2d0   : > { %5536 = vmatprep.subr.bf16.mxu1 %v5788_v34 }
 0x2d1   : > { %4471 = vmatmul.mubr.msk.bf16.gmra.mrb[232].mxu0 %vm6835_vm5, %v8391_v56 }
 0x2d2   : > { %3742 = vmatprep.mubr.bf16.mxu0 %v8392_v38 }
 0x2d3   : > { %5537 = vmatpush3.bf16.msra.mxu1 %v5788_v34 }
 0x2d6   : > { %3590 = vmatmul.mubr.bf16.gmra.mrb[208].mxu1 %v8392_v38 }
 0x2d7   : > { %3597 = vmatprep.mubr.bf16.mxu1 %v7443_v37 }
 0x2d9   : > { %4475 = vmatmul.mubr.msk.bf16.gmra.mrb[236].mxu0 %vm6835_vm5, %v8393_v47 }
 0x2da   : > { %3750 = vmatprep.mubr.bf16.mxu0 %v7347_v5 }
 0x2de   : > { %3598 = vmatmul.mubr.bf16.gmra.mrb[212].mxu1 %v7347_v5 }
 0x2df   : > { %3605 = vmatprep.mubr.bf16.mxu1 %v7498_v36 }
 0x2e1   : > { %4479 = vmatmul.mubr.msk.bf16.gmra.mrb[240].mxu0 %vm6835_vm5, %v7269_v54  ;;  %v7856_v54 = vld [vmem:[%s8226_s4] ss:$0 sm:$0xff] }
 0x2e2   : > { %3758 = vmatprep.mubr.bf16.mxu0 %v7421_v16 }
 0x2e6   : > { %3606 = vmatmul.mubr.bf16.gmra.mrb[216].mxu1 %v7421_v16  ;;  %v3238_v16 = vadd.f32 %v7745_v52, %v7856_v54 }
 0x2e7   : > { %3613 = vmatprep.mubr.bf16.mxu1 %v7526_v10 }
 0x2e9   : > { %4483 = vmatmul.mubr.msk.bf16.gmra.mrb[244].mxu0 %vm6835_vm5, %v8394_v55 }
 0x2ea   : > { %3766 = vmatprep.mubr.bf16.mxu0 %v7475_v32 }
 0x2ee   : > { %3614 = vmatmul.mubr.bf16.gmra.mrb[220].mxu1 %v7475_v32 }
 0x2ef   : > { %3621 = vmatprep.mubr.bf16.mxu1 %v7562_v13 }
 0x2f1   : > { %4487 = vmatmul.mubr.msk.bf16.gmra.mrb[248].mxu0 %vm6835_vm5, %v7447_v1 }
 0x2f2   : > { %3774 = vmatprep.mubr.bf16.mxu0 %v7510_v11 }
 0x2f6   : > { %3622 = vmatmul.mubr.bf16.gmra.mrb[224].mxu1 %v7510_v11 }
 0x2f7   : > { %3629 = vmatprep.mubr.bf16.mxu1 %v7584_v58 }
 0x2f9   : > { %4491 = vmatmul.mubr.msk.bf16.gmra.mrb[252].mxu0 %vm6835_vm5, %v7484_v22 }
 0x2fa   : > { %3782 = vmatprep.mubr.bf16.mxu0 %v7543_v25 }
 0x2fe   : > { %3630 = vmatmul.mubr.bf16.gmra.mrb[228].mxu1 %v7543_v25 }
 0x2ff   : > { %3637 = vmatprep.mubr.bf16.mxu1 %v7615_v26 }
 0x301   : > { %4495 = vmatmul.mubr.msk.bf16.gmra.mrb[0].mxu0 %vm6835_vm5, %v7524_v24 }
 0x302   : > { %3790 = vmatprep.mubr.bf16.mxu0 %v7582_v31 }
 0x306   : > { %3638 = vmatmul.mubr.bf16.gmra.mrb[232].mxu1 %v7582_v31 }
 0x307   : > { %3645 = vmatprep.mubr.bf16.mxu1 %v7647_v42 }
 0x309   : > { %4499 = vmatmul.mubr.msk.bf16.gmra.mrb[4].mxu0 %vm6835_vm5, %v7552_v45  ;;  %v3241_v45 = vadd.f32 %v7747_v51, %v7856_v54 }
 0x30a   : > { %3798 = vmatprep.mubr.bf16.mxu0 %v7613_v28 }
 0x30c   : > { %v5130_v5 = vpop.f32.mrb[160].mxu0 }
 0x30d   : > { %v5131_v24 = vpop.f32.mrb[161].mxu0 }
 0x30e   : > { %v5132_v1 = vadd.f32 %v5131_v24, %v5130_v5  ;;  %v5133_v32 = vpop.f32.mrb[162].mxu0  ;;  %3646 = vmatmul.mubr.bf16.gmra.mrb[236].mxu1 %v7613_v28 }
 0x30f   : > { %v5024_v22 = vpop.f32.mrb[132].mxu1  ;;  %v5134_v11 = vpop.f32.mrb[163].mxu0  ;;  %3653 = vmatprep.mubr.bf16.mxu1 %v7675_v41 }
 0x310   : > { %v5025_v25 = vpop.f32.mrb[133].mxu1  ;;  %v7863_v31 = vadd.f32 %v5132_v1, %v3238_v16  ;;  %v5135_v20 = vadd.f32 %v5134_v11, %v5133_v32 }
 0x311   : > { %v5026_v23 = vadd.f32 %v5025_v25, %v5024_v22  ;;  %v5027_v21 = vpop.f32.mrb[134].mxu1  ;;  %4503 = vmatmul.mubr.msk.bf16.gmra.mrb[8].mxu0 %vm6835_vm5, %v7588_v29 }
 0x312   : > { %v5028_v30 = vpop.f32.mrb[135].mxu1  ;;  %v7866_v61 = vadd.f32 %v5135_v20, %v3241_v45  ;;  %3806 = vmatprep.mubr.bf16.mxu0 %v7645_v40 }
 0x313   : > { %v5029_v19 = vadd.f32 %v5028_v30, %v5027_v21  ;;  %v3246_v52 = vadd.f32 %v5026_v23, %v7856_v54 }
 0x315   : > { %v5136_v35 = vpop.f32.mrb[164].mxu0  ;;  %v3249_v60 = vadd.f32 %v5029_v19, %v7856_v54 }
 0x316   : > { %v5137_v17 = vpop.f32.mrb[165].mxu0  ;;  %3654 = vmatmul.mubr.bf16.gmra.mrb[240].mxu1 %v7645_v40 }
 0x317   : > { %v5030_v8 = vpop.f32.mrb[136].mxu1  ;;  %v5138_v27 = vadd.f32 %v5137_v17, %v5136_v35  ;;  %v5139_v6 = vpop.f32.mrb[166].mxu0  ;;  %3661 = vmatprep.mubr.bf16.mxu1 %v7705_v43 }
 0x318   : > { %v5031_v51 = vpop.f32.mrb[137].mxu1  ;;  %v5140_v28 = vpop.f32.mrb[167].mxu0 }
 0x319   : > { %v5032_v46 = vadd.f32 %v5031_v51, %v5030_v8  ;;  %v5033_v15 = vpop.f32.mrb[138].mxu1  ;;  %v7875_v50 = vadd.f32 %v5138_v27, %v3246_v52  ;;  %v5141_v29 = vadd.f32 %v5140_v28, %v5139_v6  ;;  %4507 = vmatmul.mubr.msk.bf16.gmra.mrb[12].mxu0 %vm6835_vm5, %v7619_v33 }
 0x31a   : > { %v5034_v3 = vpop.f32.mrb[139].mxu1  ;;  %3814 = vmatprep.mubr.bf16.mxu0 %v7659_v14 }
 0x31b   : > { %v5035_v2 = vadd.f32 %v5034_v3, %v5033_v15  ;;  %v7882_v57 = vadd.f32 %v5141_v29, %v3249_v60  ;;  %v3254_v40 = vadd.f32 %v5032_v46, %v7856_v54 }
 0x31d   : > { %v3257_v1 = vadd.f32 %v5035_v2, %v7856_v54 }
 0x31e   : > { %3662 = vmatmul.mubr.bf16.gmra.mrb[244].mxu1 %v7659_v14 }
 0x31f   : > { %v5036_v53 = vpop.f32.mrb[140].mxu1  ;;  %v5142_v34 = vpop.f32.mrb[168].mxu0  ;;  %3669 = vmatprep.mubr.bf16.mxu1 %v7716_v9 }
 0x320   : > { %v5037_v18 = vpop.f32.mrb[141].mxu1  ;;  %v5143_v47 = vpop.f32.mrb[169].mxu0 }
 0x321   : > { %v5038_v56 = vadd.f32 %v5037_v18, %v5036_v53  ;;  %v5039_v38 = vpop.f32.mrb[142].mxu1  ;;  %v5144_v5 = vadd.f32 %v5143_v47, %v5142_v34  ;;  %v5145_v24 = vpop.f32.mrb[170].mxu0  ;;  %4511 = vmatmul.mubr.msk.bf16.gmra.mrb[16].mxu0 %vm6835_vm5, %v7643_v7  ;;  %v8395_v53 = vld [vmem:[#allocation10_spill] sm:$0xff] }
 0x322   : > { %v5040_v55 = vpop.f32.mrb[143].mxu1  ;;  %v5146_v16 = vpop.f32.mrb[171].mxu0  ;;  %3822 = vmatprep.mubr.bf16.mxu0 %v7689_v0 }
 0x323   : > { %v5041_v33 = vadd.f32 %v5040_v55, %v5039_v38  ;;  %v7893_v32 = vadd.f32 %v5144_v5, %v3254_v40  ;;  %v5147_v22 = vadd.f32 %v5146_v16, %v5145_v24  ;;  %v3262_v21 = vadd.f32 %v5038_v56, %v7856_v54 }
 0x325   : > { %v7895_v11 = vadd.f32 %v5147_v22, %v3257_v1 }
 0x326   : > { %3670 = vmatmul.mubr.bf16.gmra.mrb[248].mxu1 %v7689_v0  ;;  %v3265_v0 = vadd.f32 %v5041_v33, %v7856_v54 }
 0x327   : > { %3677 = vmatprep.mubr.bf16.mxu1 %v7735_v59 }
 0x328   : > { %v5042_v14 = vpop.f32.mrb[144].mxu1 }
 0x329   : > { %v5148_v25 = vpop.f32.mrb[172].mxu0  ;;  %v5043_v45 = vpop.f32.mrb[145].mxu1  ;;  %4515 = vmatmul.mubr.msk.bf16.gmra.mrb[20].mxu0 %vm6835_vm5, %v7673_v48 }
 0x32a   : > { %v5149_v7 = vpop.f32.mrb[173].mxu0  ;;  %v5044_v20 = vadd.f32 %v5043_v45, %v5042_v14  ;;  %v5045_v23 = vpop.f32.mrb[146].mxu1  ;;  %3830 = vmatprep.mubr.bf16.mxu0 %v7733_v62 }
 0x32b   : > { %v5150_v30 = vadd.f32 %v5149_v7, %v5148_v25  ;;  %v5151_v19 = vpop.f32.mrb[174].mxu0  ;;  %v5046_v35 = vpop.f32.mrb[147].mxu1 }
 0x32c   : > { %v5152_v17 = vpop.f32.mrb[175].mxu0  ;;  %v5047_v8 = vadd.f32 %v5046_v35, %v5045_v23  ;;  %v3270_v29 = vadd.f32 %v5044_v20, %v7856_v54 }
 0x32d   : > { %v7905_v52 = vadd.f32 %v5150_v30, %v3262_v21  ;;  %v5153_v27 = vadd.f32 %v5152_v17, %v5151_v19 }
 0x32e   : > { %3678 = vmatmul.mubr.bf16.gmra.mrb[252].mxu1 %v7733_v62  ;;  %v3273_v62 = vadd.f32 %v5047_v8, %v7856_v54 }
 0x32f   : > { %v7907_v48 = vadd.f32 %v5153_v27, %v3265_v0  ;;  %5538 = vmatprep.mubr.bf16.mxu1 %v7126_v44  ;;  %v8396_v44 = vld [vmem:[#allocation8_spill] sm:$0xff] }
 0x330   : > { %v5048_v6 = vpop.f32.mrb[148].mxu1 }
 0x331   : > { %v5154_v51 = vpop.f32.mrb[176].mxu0  ;;  %v5049_v28 = vpop.f32.mrb[149].mxu1  ;;  %4519 = vmatmul.mubr.msk.bf16.gmra.mrb[24].mxu0 %vm6835_vm5, %v7698_v39 }
 0x332   : > { %v5155_v46 = vpop.f32.mrb[177].mxu0  ;;  %v5050_v15 = vadd.f32 %v5049_v28, %v5048_v6  ;;  %v5051_v60 = vpop.f32.mrb[150].mxu1  ;;  %3838 = vmatprep.mubr.bf16.mxu0 %v8395_v53 }
 0x333   : > { %v5156_v3 = vadd.f32 %v5155_v46, %v5154_v51  ;;  %v5157_v2 = vpop.f32.mrb[178].mxu0  ;;  %v5052_v18 = vpop.f32.mrb[151].mxu1 }
 0x334   : > { %v5158_v34 = vpop.f32.mrb[179].mxu0  ;;  %v5053_v56 = vadd.f32 %v5052_v18, %v5051_v60  ;;  %v3278_v33 = vadd.f32 %v5050_v15, %v7856_v54 }
 0x335   : > { %v7917_v38 = vadd.f32 %v5156_v3, %v3270_v29  ;;  %v5159_v47 = vadd.f32 %v5158_v34, %v5157_v2 }
 0x336   : > { %5539 = vmatmul.mubr.bf16.vlgmr.msra.gmra.mrb[0].mxu1 %v8386_v63  ;;  %v3281_v63 = vadd.f32 %v5053_v56, %v7856_v54 }
 0x337   : > { %v7919_v39 = vadd.f32 %v5159_v47, %v3273_v62  ;;  %5542 = vmatprep.mubr.bf16.mxu1 %v8389_v49 }
 0x338   : > { %v5054_v40 = vpop.f32.mrb[152].mxu1 }
 0x339   : > { %4523 = vmatmul.mubr.msk.bf16.gmra.mrb[28].mxu0 %vm6835_vm5, %v8396_v44  ;;  %v5160_v55 = vpop.f32.mrb[180].mxu0  ;;  %v5055_v24 = vpop.f32.mrb[153].mxu1 }
 0x33a   : > { %v5161_v5 = vpop.f32.mrb[181].mxu0  ;;  %v5056_v22 = vadd.f32 %v5055_v24, %v5054_v40  ;;  %v5057_v14 = vpop.f32.mrb[154].mxu1 }
 0x33b   : > { %v5162_v16 = vadd.f32 %v5161_v5, %v5160_v55  ;;  %v5163_v1 = vpop.f32.mrb[182].mxu0  ;;  %v5058_v45 = vpop.f32.mrb[155].mxu1 }
 0x33c   : > { %v5164_v25 = vpop.f32.mrb[183].mxu0  ;;  %v5059_v20 = vadd.f32 %v5058_v45, %v5057_v14  ;;  %v3286_v8 = vadd.f32 %v5056_v22, %v7856_v54 }
 0x33d   : > { %v7928_v7 = vadd.f32 %v5162_v16, %v3278_v33  ;;  %v5165_v12 = vadd.f32 %v5164_v25, %v5163_v1 }
 0x33e   : > { %5543 = vmatmul.mubr.bf16.gmra.mrb[4].mxu1 %v7351_v4  ;;  %v3289_v46 = vadd.f32 %v5059_v20, %v7856_v54 }
 0x33f   : > { %v7930_v23 = vadd.f32 %v5165_v12, %v3281_v63  ;;  %5546 = vmatprep.mubr.bf16.mxu1 %v7443_v37 }
 0x341   : > { %v5060_v49 = vpop.f32.mrb[156].mxu1 }
 0x342   : > { %v5061_v30 = vpop.f32.mrb[157].mxu1 }
 0x343   : > { %v5062_v35 = vadd.f32 %v5061_v30, %v5060_v49  ;;  %v5063_v17 = vpop.f32.mrb[158].mxu1 }
 0x344   : > { %v5166_v21 = vpop.f32.mrb[184].mxu0  ;;  %v5064_v6 = vpop.f32.mrb[159].mxu1 }
 0x345   : > { %v5167_v19 = vpop.f32.mrb[185].mxu0  ;;  %v5065_v28 = vadd.f32 %v5064_v6, %v5063_v17  ;;  %v3294_v34 = vadd.f32 %v5062_v35, %v7856_v54 }
 0x346   : > { %v5168_v0 = vadd.f32 %v5167_v19, %v5166_v21  ;;  %v5169_v27 = vpop.f32.mrb[186].mxu0  ;;  %5547 = vmatmul.mubr.bf16.gmra.mrb[8].mxu1 %v7498_v36 }
 0x347   : > { %v5170_v51 = vpop.f32.mrb[187].mxu0  ;;  %5550 = vmatprep.mubr.bf16.mxu1 %v7526_v10  ;;  %v3297_v40 = vadd.f32 %v5065_v28, %v7856_v54 }
 0x348   : > { %v7936_v15 = vadd.f32 %v5168_v0, %v3286_v8  ;;  %v5171_v4 = vadd.f32 %v5170_v51, %v5169_v27 }
 0x349   : > { %v5066_v60 = vpop.f32.mrb[160].mxu1 }
 0x34a   : > { %v7940_v37 = vadd.f32 %v5171_v4, %v3289_v46  ;;  %v5067_v3 = vpop.f32.mrb[161].mxu1 }
 0x34b   : > { %v5068_v53 = vadd.f32 %v5067_v3, %v5066_v60  ;;  %v5069_v18 = vpop.f32.mrb[162].mxu1 }
 0x34c   : > { %v5172_v29 = vpop.f32.mrb[188].mxu0  ;;  %v5070_v47 = vpop.f32.mrb[163].mxu1 }
 0x34d   : > { %v5173_v2 = vpop.f32.mrb[189].mxu0  ;;  %v5071_v55 = vadd.f32 %v5070_v47, %v5069_v18  ;;  %v3302_v25 = vadd.f32 %v5068_v53, %v7856_v54 }
 0x34e   : > { %v5174_v56 = vadd.f32 %v5173_v2, %v5172_v29  ;;  %v5175_v62 = vpop.f32.mrb[190].mxu0  ;;  %5551 = vmatmul.mubr.bf16.gmra.mrb[12].mxu1 %v7562_v13 }
 0x34f   : > { %v5176_v44 = vpop.f32.mrb[191].mxu0  ;;  %5554 = vmatprep.mubr.bf16.mxu1 %v7584_v58  ;;  %v3305_v21 = vadd.f32 %v5071_v55, %v7856_v54 }
 0x350   : > { %v7944_v36 = vadd.f32 %v5174_v56, %v3294_v34  ;;  %v5177_v10 = vadd.f32 %v5176_v44, %v5175_v62 }
 0x351   : > { %v5072_v24 = vpop.f32.mrb[164].mxu1 }
 0x352   : > { %v7948_v5 = vadd.f32 %v5177_v10, %v3297_v40  ;;  %v5073_v16 = vpop.f32.mrb[165].mxu1 }
 0x353   : > { %v5074_v22 = vadd.f32 %v5073_v16, %v5072_v24  ;;  %v5075_v14 = vpop.f32.mrb[166].mxu1 }
 0x354   : > { %v5178_v33 = vpop.f32.mrb[192].mxu0  ;;  %v5076_v12 = vpop.f32.mrb[167].mxu1 }
 0x355   : > { %v5179_v1 = vpop.f32.mrb[193].mxu0  ;;  %v5077_v49 = vadd.f32 %v5076_v12, %v5075_v14  ;;  %v3310_v6 = vadd.f32 %v5074_v22, %v7856_v54 }
 0x356   : > { %v5180_v45 = vadd.f32 %v5179_v1, %v5178_v33  ;;  %v5181_v63 = vpop.f32.mrb[194].mxu0  ;;  %5555 = vmatmul.mubr.bf16.gmra.mrb[16].mxu1 %v7615_v26 }
 0x357   : > { %v5182_v20 = vpop.f32.mrb[195].mxu0  ;;  %5558 = vmatprep.mubr.bf16.mxu1 %v7647_v42  ;;  %v3313_v29 = vadd.f32 %v5077_v49, %v7856_v54 }
 0x358   : > { %v7952_v13 = vadd.f32 %v5180_v45, %v3302_v25  ;;  %v5183_v58 = vadd.f32 %v5182_v20, %v5181_v63 }
 0x359   : > { %v5078_v19 = vpop.f32.mrb[168].mxu1 }
 0x35a   : > { %v7956_v30 = vadd.f32 %v5183_v58, %v3305_v21  ;;  %v5079_v17 = vpop.f32.mrb[169].mxu1 }
 0x35b   : > { %v5080_v0 = vadd.f32 %v5079_v17, %v5078_v19  ;;  %v5081_v27 = vpop.f32.mrb[170].mxu1  ;;  %v8397_v17 = vld [vmem:[#allocation9_spill] sm:$0xff] }
 0x35c   : > { %v5184_v35 = vpop.f32.mrb[196].mxu0  ;;  %v5082_v46 = vpop.f32.mrb[171].mxu1 }
 0x35d   : > { %v5185_v8 = vpop.f32.mrb[197].mxu0  ;;  %v5083_v60 = vadd.f32 %v5082_v46, %v5081_v27  ;;  %v3318_v47 = vadd.f32 %v5080_v0, %v7856_v54 }
 0x35e   : > { %v5186_v51 = vadd.f32 %v5185_v8, %v5184_v35  ;;  %v5187_v28 = vpop.f32.mrb[198].mxu0  ;;  %5559 = vmatmul.mubr.bf16.gmra.mrb[20].mxu1 %v7675_v41 }
 0x35f   : > { %v5188_v4 = vpop.f32.mrb[199].mxu0  ;;  %5562 = vmatprep.mubr.bf16.mxu1 %v7705_v43  ;;  %v3321_v33 = vadd.f32 %v5083_v60, %v7856_v54 }
 0x360   : > { %v7960_v26 = vadd.f32 %v5186_v51, %v3310_v6  ;;  %v5189_v42 = vadd.f32 %v5188_v4, %v5187_v28 }
 0x361   : > { %v5084_v2 = vpop.f32.mrb[172].mxu1 }
 0x362   : > { %v7964_v3 = vadd.f32 %v5189_v42, %v3313_v29  ;;  %v5085_v18 = vpop.f32.mrb[173].mxu1 }
 0x363   : > { %v5086_v56 = vadd.f32 %v5085_v18, %v5084_v2  ;;  %v5087_v62 = vpop.f32.mrb[174].mxu1 }
 0x364   : > { %v5190_v53 = vpop.f32.mrb[200].mxu0  ;;  %v5088_v40 = vpop.f32.mrb[175].mxu1 }
 0x365   : > { %v5191_v34 = vpop.f32.mrb[201].mxu0  ;;  %v5089_v24 = vadd.f32 %v5088_v40, %v5087_v62  ;;  %v3326_v12 = vadd.f32 %v5086_v56, %v7856_v54 }
 0x366   : > { %v5192_v44 = vadd.f32 %v5191_v34, %v5190_v53  ;;  %v5193_v55 = vpop.f32.mrb[202].mxu0  ;;  %5563 = vmatmul.mubr.bf16.gmra.mrb[24].mxu1 %v7716_v9 }
 0x367   : > { %v5194_v10 = vpop.f32.mrb[203].mxu0  ;;  %5566 = vmatprep.mubr.bf16.mxu1 %v7735_v59  ;;  %v3329_v35 = vadd.f32 %v5089_v24, %v7856_v54 }
 0x368   : > { %v7968_v41 = vadd.f32 %v5192_v44, %v3318_v47  ;;  %v5195_v43 = vadd.f32 %v5194_v10, %v5193_v55 }
 0x369   : > { %v5090_v1 = vpop.f32.mrb[176].mxu1 }
 0x36a   : > { %v7972_v16 = vadd.f32 %v5195_v43, %v3321_v33  ;;  %v5091_v14 = vpop.f32.mrb[177].mxu1 }
 0x36b   : > { %v5092_v45 = vadd.f32 %v5091_v14, %v5090_v1  ;;  %v5093_v63 = vpop.f32.mrb[178].mxu1 }
 0x36c   : > { %v5196_v22 = vpop.f32.mrb[204].mxu0  ;;  %v5094_v21 = vpop.f32.mrb[179].mxu1 }
 0x36d   : > { %v5197_v25 = vpop.f32.mrb[205].mxu0  ;;  %v5095_v19 = vadd.f32 %v5094_v21, %v5093_v63  ;;  %v3334_v4 = vadd.f32 %v5092_v45, %v7856_v54 }
 0x36e   : > { %v5198_v20 = vadd.f32 %v5197_v25, %v5196_v22  ;;  %v5199_v49 = vpop.f32.mrb[206].mxu0  ;;  %5567 = vmatmul.mubr.bf16.gmra.mrb[28].mxu1 %v8397_v17 }
 0x36f   : > { %v5200_v58 = vpop.f32.mrb[207].mxu0  ;;  %v3337_v18 = vadd.f32 %v5095_v19, %v7856_v54 }
 0x370   : > { %v7976_v9 = vadd.f32 %v5198_v20, %v3326_v12  ;;  %v5201_v59 = vadd.f32 %v5200_v58, %v5199_v49 }
 0x371   : > { %v5096_v0 = vpop.f32.mrb[180].mxu1 }
 0x372   : > { %v7979_v8 = vadd.f32 %v5201_v59, %v3329_v35  ;;  %v5097_v6 = vpop.f32.mrb[181].mxu1 }
 0x373   : > { %v5098_v28 = vadd.f32 %v5097_v6, %v5096_v0  ;;  %v5099_v46 = vpop.f32.mrb[182].mxu1 }
 0x374   : > { %v5202_v27 = vpop.f32.mrb[208].mxu0  ;;  %v5100_v42 = vpop.f32.mrb[183].mxu1 }
 0x375   : > { %v5203_v51 = vpop.f32.mrb[209].mxu0  ;;  %v5101_v53 = vadd.f32 %v5100_v42, %v5099_v46  ;;  %v3342_v33 = vadd.f32 %v5098_v28, %v7856_v54 }
 0x376   : > { %v5204_v60 = vadd.f32 %v5203_v51, %v5202_v27  ;;  %v5205_v29 = vpop.f32.mrb[210].mxu0 }
 0x377   : > { %v5206_v2 = vpop.f32.mrb[211].mxu0  ;;  %v3345_v45 = vadd.f32 %v5101_v53, %v7856_v54 }
 0x378   : > { %v7983_v34 = vadd.f32 %v5204_v60, %v3334_v4  ;;  %v5207_v56 = vadd.f32 %v5206_v2, %v5205_v29 }
 0x379   : > { %v5102_v47 = vpop.f32.mrb[184].mxu1 }
 0x37a   : > { %v7985_v62 = vadd.f32 %v5207_v56, %v3337_v18  ;;  %v5103_v55 = vpop.f32.mrb[185].mxu1 }
 0x37b   : > { %v5104_v10 = vadd.f32 %v5103_v55, %v5102_v47  ;;  %v5105_v24 = vpop.f32.mrb[186].mxu1 }
 0x37c   : > { %v5208_v44 = vpop.f32.mrb[212].mxu0  ;;  %v5106_v22 = vpop.f32.mrb[187].mxu1 }
 0x37d   : > { %v5209_v40 = vpop.f32.mrb[213].mxu0  ;;  %v5107_v25 = vadd.f32 %v5106_v22, %v5105_v24  ;;  %v3350_v17 = vadd.f32 %v5104_v10, %v7856_v54 }
 0x37e   : > { %v5210_v43 = vadd.f32 %v5209_v40, %v5208_v44  ;;  %v5211_v1 = vpop.f32.mrb[214].mxu0 }
 0x37f   : > { %v5212_v14 = vpop.f32.mrb[215].mxu0  ;;  %v3353_v46 = vadd.f32 %v5107_v25, %v7856_v54 }
 0x380   : > { %v7989_v63 = vadd.f32 %v5210_v43, %v3342_v33  ;;  %v5213_v12 = vadd.f32 %v5212_v14, %v5211_v1 }
 0x381   : > { %v5108_v49 = vpop.f32.mrb[188].mxu1 }
 0x382   : > { %v7991_v20 = vadd.f32 %v5213_v12, %v3345_v45  ;;  %v5109_v58 = vpop.f32.mrb[189].mxu1 }
 0x383   : > { %v5110_v35 = vadd.f32 %v5109_v58, %v5108_v49  ;;  %v5111_v59 = vpop.f32.mrb[190].mxu1 }
 0x384   : > { %v5214_v21 = vpop.f32.mrb[216].mxu0  ;;  %v5112_v6 = vpop.f32.mrb[191].mxu1 }
 0x385   : > { %v5215_v19 = vpop.f32.mrb[217].mxu0  ;;  %v5113_v28 = vadd.f32 %v5112_v6, %v5111_v59  ;;  %v3358_v44 = vadd.f32 %v5110_v35, %v7856_v54 }
 0x386   : > { %v5216_v0 = vadd.f32 %v5215_v19, %v5214_v21  ;;  %v5217_v27 = vpop.f32.mrb[218].mxu0 }
 0x387   : > { %v5218_v51 = vpop.f32.mrb[219].mxu0  ;;  %v3361_v1 = vadd.f32 %v5113_v28, %v7856_v54 }
 0x388   : > { %v7995_v4 = vadd.f32 %v5216_v0, %v3350_v17  ;;  %v5219_v60 = vadd.f32 %v5218_v51, %v5217_v27 }
 0x389   : > { %v5242_v42 = vpop.f32.mrb[192].mxu1 }
 0x38a   : > { %v7997_v29 = vadd.f32 %v5219_v60, %v3353_v46  ;;  %v5243_v53 = vpop.f32.mrb[193].mxu1 }
 0x38b   : > { %v5244_v56 = vadd.f32 %v5243_v53, %v5242_v42  ;;  %v5245_v47 = vpop.f32.mrb[194].mxu1 }
 0x38c   : > { %v5220_v2 = vpop.f32.mrb[220].mxu0  ;;  %v5246_v10 = vpop.f32.mrb[195].mxu1 }
 0x38d   : > { %v5221_v18 = vpop.f32.mrb[221].mxu0  ;;  %v3560_v33 = vadd.f32 %v5244_v56, %v7863_v31  ;;  %v5247_v43 = vadd.f32 %v5246_v10, %v5245_v47 }
 0x38e   : > { %v5222_v55 = vadd.f32 %v5221_v18, %v5220_v2  ;;  %v5223_v40 = vpop.f32.mrb[222].mxu0 }
 0x38f   : > { %v5224_v24 = vpop.f32.mrb[223].mxu0  ;;  %v3563_v25 = vadd.f32 %v5247_v43, %v7866_v61 }
 0x390   : > { %v8002_v22 = vadd.f32 %v5222_v55, %v3358_v44  ;;  %v5225_v14 = vadd.f32 %v5224_v24, %v5223_v40 }
 0x391   : > { %v5248_v12 = vpop.f32.mrb[196].mxu1 }
 0x392   : > { %v8005_v45 = vadd.f32 %v5225_v14, %v3361_v1  ;;  %v5249_v21 = vpop.f32.mrb[197].mxu1 }
 0x393   : > { %v5250_v19 = vadd.f32 %v5249_v21, %v5248_v12  ;;  %v5251_v35 = vpop.f32.mrb[198].mxu1 }
 0x394   : > { %v5354_v49 = vpop.f32.mrb[224].mxu0  ;;  %v5252_v0 = vpop.f32.mrb[199].mxu1 }
 0x395   : > { %v5355_v58 = vpop.f32.mrb[225].mxu0  ;;  %v3568_v27 = vadd.f32 %v5250_v19, %v7875_v50  ;;  %v5253_v54 = vadd.f32 %v5252_v0, %v5251_v35 }
 0x396   : > { %v5356_v59 = vadd.f32 %v5355_v58, %v5354_v49  ;;  %v5357_v17 = vpop.f32.mrb[226].mxu0 }
 0x397   : > { %v5358_v31 = vpop.f32.mrb[227].mxu0  ;;  %v3571_v61 = vadd.f32 %v5253_v54, %v7882_v57 }
 0x398   : > { %v5359_v6 = vadd.f32 %v5358_v31, %v5357_v17  ;;  %v8008_v51 = vadd.f32 %v5356_v59, %v3560_v33 }
 0x399   : > { %v5254_v46 = vpop.f32.mrb[200].mxu1 }
 0x39a   : > { %v8011_v28 = vadd.f32 %v5359_v6, %v3563_v25  ;;  %v5255_v42 = vpop.f32.mrb[201].mxu1 }
 0x39b   : > { %v5256_v53 = vadd.f32 %v5255_v42, %v5254_v46  ;;  %v5257_v18 = vpop.f32.mrb[202].mxu1 }
 0x39c   : > { %v5360_v60 = vpop.f32.mrb[228].mxu0  ;;  %v5258_v44 = vpop.f32.mrb[203].mxu1 }
 0x39d   : > { %v5361_v2 = vpop.f32.mrb[229].mxu0  ;;  %v3576_v50 = vadd.f32 %v5256_v53, %v7893_v32  ;;  %v5259_v40 = vadd.f32 %v5258_v44, %v5257_v18 }
 0x39e   : > { %v5362_v56 = vadd.f32 %v5361_v2, %v5360_v60  ;;  %v5363_v47 = vpop.f32.mrb[230].mxu0 }
 0x39f   : > { %v5364_v55 = vpop.f32.mrb[231].mxu0  ;;  %v3579_v57 = vadd.f32 %v5259_v40, %v7895_v11 }
 0x3a0   : > { %v5365_v10 = vadd.f32 %v5364_v55, %v5363_v47  ;;  %v8014_v24 = vadd.f32 %v5362_v56, %v3568_v27 }
 0x3a1   : > { %v5260_v43 = vpop.f32.mrb[204].mxu1 }
 0x3a2   : > { %v8017_v33 = vadd.f32 %v5365_v10, %v3571_v61  ;;  %v5261_v14 = vpop.f32.mrb[205].mxu1 }
 0x3a3   : > { %v5262_v12 = vadd.f32 %v5261_v14, %v5260_v43  ;;  %v5263_v49 = vpop.f32.mrb[206].mxu1 }
 0x3a4   : > { %v5366_v1 = vpop.f32.mrb[232].mxu0  ;;  %v5264_v19 = vpop.f32.mrb[207].mxu1 }
 0x3a5   : > { %v5367_v25 = vpop.f32.mrb[233].mxu0  ;;  %v3584_v32 = vadd.f32 %v5262_v12, %v7905_v52  ;;  %v5265_v59 = vadd.f32 %v5264_v19, %v5263_v49 }
 0x3a6   : > { %v5368_v21 = vadd.f32 %v5367_v25, %v5366_v1  ;;  %v5369_v58 = vpop.f32.mrb[234].mxu0 }
 0x3a7   : > { %v5370_v35 = vpop.f32.mrb[235].mxu0  ;;  %v3587_v11 = vadd.f32 %v5265_v59, %v7907_v48 }
 0x3a8   : > { %v5371_v17 = vadd.f32 %v5370_v35, %v5369_v58  ;;  %v8020_v0 = vadd.f32 %v5368_v21, %v3576_v50 }
 0x3a9   : > { %v5266_v27 = vpop.f32.mrb[208].mxu1 }
 0x3aa   : > { %v8023_v31 = vadd.f32 %v5371_v17, %v3579_v57  ;;  %v5267_v6 = vpop.f32.mrb[209].mxu1 }
 0x3ab   : > { %v5268_v46 = vadd.f32 %v5267_v6, %v5266_v27  ;;  %v5269_v60 = vpop.f32.mrb[210].mxu1 }
 0x3ac   : > { %v5372_v54 = vpop.f32.mrb[236].mxu0  ;;  %v5270_v53 = vpop.f32.mrb[211].mxu1 }
 0x3ad   : > { %v5373_v61 = vpop.f32.mrb[237].mxu0  ;;  %v3592_v52 = vadd.f32 %v5268_v46, %v7917_v38  ;;  %v5271_v56 = vadd.f32 %v5270_v53, %v5269_v60 }
 0x3ae   : > { %v5374_v42 = vadd.f32 %v5373_v61, %v5372_v54  ;;  %v5375_v2 = vpop.f32.mrb[238].mxu0 }
 0x3af   : > { %v5376_v18 = vpop.f32.mrb[239].mxu0  ;;  %v3595_v48 = vadd.f32 %v5271_v56, %v7919_v39 }
 0x3b0   : > { %v5377_v47 = vadd.f32 %v5376_v18, %v5375_v2  ;;  %v8026_v44 = vadd.f32 %v5374_v42, %v3584_v32 }
 0x3b1   : > { %v5272_v50 = vpop.f32.mrb[212].mxu1 }
 0x3b2   : > { %v8029_v55 = vadd.f32 %v5377_v47, %v3587_v11  ;;  %v5273_v10 = vpop.f32.mrb[213].mxu1 }
 0x3b3   : > { %v5274_v43 = vadd.f32 %v5273_v10, %v5272_v50  ;;  %v5275_v1 = vpop.f32.mrb[214].mxu1 }
 0x3b4   : > { %v5378_v40 = vpop.f32.mrb[240].mxu0  ;;  %v5276_v12 = vpop.f32.mrb[215].mxu1 }
 0x3b5   : > { %v5379_v57 = vpop.f32.mrb[241].mxu0  ;;  %v3600_v38 = vadd.f32 %v5274_v43, %v7928_v7  ;;  %v5277_v21 = vadd.f32 %v5276_v12, %v5275_v1 }
 0x3b6   : > { %v5380_v14 = vadd.f32 %v5379_v57, %v5378_v40  ;;  %v5381_v25 = vpop.f32.mrb[242].mxu0 }
 0x3b7   : > { %v5382_v49 = vpop.f32.mrb[243].mxu0  ;;  %v3603_v39 = vadd.f32 %v5277_v21, %v7930_v23 }
 0x3b8   : > { %v5383_v58 = vadd.f32 %v5382_v49, %v5381_v25  ;;  %v8032_v19 = vadd.f32 %v5380_v14, %v3592_v52 }
 0x3b9   : > { %v5278_v32 = vpop.f32.mrb[216].mxu1 }
 0x3ba   : > { %v8035_v35 = vadd.f32 %v5383_v58, %v3595_v48  ;;  %v5279_v17 = vpop.f32.mrb[217].mxu1 }
 0x3bb   : > { %v5280_v27 = vadd.f32 %v5279_v17, %v5278_v32  ;;  %v5281_v54 = vpop.f32.mrb[218].mxu1 }
 0x3bc   : > { %v5384_v59 = vpop.f32.mrb[244].mxu0  ;;  %v5282_v46 = vpop.f32.mrb[219].mxu1 }
 0x3bd   : > { %v5385_v11 = vpop.f32.mrb[245].mxu0  ;;  %v3608_v7 = vadd.f32 %v5280_v27, %v7936_v15  ;;  %v5283_v42 = vadd.f32 %v5282_v46, %v5281_v54 }
 0x3be   : > { %v5386_v6 = vadd.f32 %v5385_v11, %v5384_v59  ;;  %v5387_v61 = vpop.f32.mrb[246].mxu0 }
 0x3bf   : > { %v5388_v60 = vpop.f32.mrb[247].mxu0  ;;  %v3611_v23 = vadd.f32 %v5283_v42, %v7940_v37 }
 0x3c0   : > { %v5389_v2 = vadd.f32 %v5388_v60, %v5387_v61  ;;  %v8038_v53 = vadd.f32 %v5386_v6, %v3600_v38 }
 0x3c1   : > { %v5284_v52 = vpop.f32.mrb[220].mxu1 }
 0x3c2   : > { %v8041_v18 = vadd.f32 %v5389_v2, %v3603_v39  ;;  %v5285_v47 = vpop.f32.mrb[221].mxu1 }
 0x3c3   : > { %v5286_v50 = vadd.f32 %v5285_v47, %v5284_v52  ;;  %v5287_v40 = vpop.f32.mrb[222].mxu1 }
 0x3c4   : > { %v5390_v56 = vpop.f32.mrb[248].mxu0  ;;  %v5288_v43 = vpop.f32.mrb[223].mxu1 }
 0x3c5   : > { %v5391_v48 = vpop.f32.mrb[249].mxu0  ;;  %v3616_v15 = vadd.f32 %v5286_v50, %v7944_v36  ;;  %v5289_v14 = vadd.f32 %v5288_v43, %v5287_v40 }
 0x3c6   : > { %v5392_v10 = vadd.f32 %v5391_v48, %v5390_v56  ;;  %v5393_v57 = vpop.f32.mrb[250].mxu0 }
 0x3c7   : > { %v5394_v1 = vpop.f32.mrb[251].mxu0  ;;  %v3619_v37 = vadd.f32 %v5289_v14, %v7948_v5 }
 0x3c8   : > { %v5395_v25 = vadd.f32 %v5394_v1, %v5393_v57  ;;  %v8044_v12 = vadd.f32 %v5392_v10, %v3608_v7 }
 0x3c9   : > { %v5290_v38 = vpop.f32.mrb[224].mxu1 }
 0x3ca   : > { %v8047_v49 = vadd.f32 %v5395_v25, %v3611_v23  ;;  %v5291_v58 = vpop.f32.mrb[225].mxu1 }
 0x3cb   : > { %v5292_v32 = vadd.f32 %v5291_v58, %v5290_v38  ;;  %v5293_v59 = vpop.f32.mrb[226].mxu1 }
 0x3cc   : > { %v5396_v21 = vpop.f32.mrb[252].mxu0  ;;  %v5294_v27 = vpop.f32.mrb[227].mxu1 }
 0x3cd   : > { %v5397_v39 = vpop.f32.mrb[253].mxu0  ;;  %v3624_v36 = vadd.f32 %v5292_v32, %v7952_v13  ;;  %v5295_v6 = vadd.f32 %v5294_v27, %v5293_v59 }
 0x3ce   : > { %v5398_v17 = vadd.f32 %v5397_v39, %v5396_v21  ;;  %v5399_v11 = vpop.f32.mrb[254].mxu0 }
 0x3cf   : > { %v5400_v54 = vpop.f32.mrb[255].mxu0  ;;  %v3627_v5 = vadd.f32 %v5295_v6, %v7956_v30 }
 0x3d0   : > { %v5401_v61 = vadd.f32 %v5400_v54, %v5399_v11  ;;  %v8050_v46 = vadd.f32 %v5398_v17, %v3616_v15 }
 0x3d1   : > { %v5296_v7 = vpop.f32.mrb[228].mxu1 }
 0x3d2   : > { %v8053_v60 = vadd.f32 %v5401_v61, %v3619_v37  ;;  %v5297_v2 = vpop.f32.mrb[229].mxu1 }
 0x3d3   : > { %v5298_v52 = vadd.f32 %v5297_v2, %v5296_v7  ;;  %v5299_v56 = vpop.f32.mrb[230].mxu1 }
 0x3d4   : > { %v5402_v42 = vpop.f32.mrb[0].mxu0  ;;  %v5300_v50 = vpop.f32.mrb[231].mxu1 }
 0x3d5   : > { %v5403_v23 = vpop.f32.mrb[1].mxu0  ;;  %v3632_v13 = vadd.f32 %v5298_v52, %v7960_v26  ;;  %v5301_v10 = vadd.f32 %v5300_v50, %v5299_v56 }
 0x3d6   : > { %v5404_v47 = vadd.f32 %v5403_v23, %v5402_v42  ;;  %v5405_v48 = vpop.f32.mrb[2].mxu0 }
 0x3d7   : > { %v5406_v40 = vpop.f32.mrb[3].mxu0  ;;  %v3635_v30 = vadd.f32 %v5301_v10, %v7964_v3 }
 0x3d8   : > { %v5407_v57 = vadd.f32 %v5406_v40, %v5405_v48  ;;  %v8056_v43 = vadd.f32 %v5404_v47, %v3624_v36 }
 0x3d9   : > { %v5302_v15 = vpop.f32.mrb[232].mxu1 }
 0x3da   : > { %v8059_v1 = vadd.f32 %v5407_v57, %v3627_v5  ;;  %v5303_v25 = vpop.f32.mrb[233].mxu1 }
 0x3db   : > { %v5304_v38 = vadd.f32 %v5303_v25, %v5302_v15  ;;  %v5305_v21 = vpop.f32.mrb[234].mxu1 }
 0x3dc   : > { %v5408_v14 = vpop.f32.mrb[4].mxu0  ;;  %v5306_v32 = vpop.f32.mrb[235].mxu1 }
 0x3dd   : > { %v5409_v37 = vpop.f32.mrb[5].mxu0  ;;  %v3640_v26 = vadd.f32 %v5304_v38, %v7968_v41  ;;  %v5307_v17 = vadd.f32 %v5306_v32, %v5305_v21 }
 0x3de   : > { %v5410_v58 = vadd.f32 %v5409_v37, %v5408_v14  ;;  %v5411_v39 = vpop.f32.mrb[6].mxu0 }
 0x3df   : > { %v5412_v59 = vpop.f32.mrb[7].mxu0  ;;  %v3643_v3 = vadd.f32 %v5307_v17, %v7972_v16 }
 0x3e0   : > { %v5413_v11 = vadd.f32 %v5412_v59, %v5411_v39  ;;  %v8062_v27 = vadd.f32 %v5410_v58, %v3632_v13 }
 0x3e1   : > { %v5308_v36 = vpop.f32.mrb[236].mxu1 }
 0x3e2   : > { %v8065_v54 = vadd.f32 %v5413_v11, %v3635_v30  ;;  %v5309_v61 = vpop.f32.mrb[237].mxu1 }
 0x3e3   : > { %v5310_v7 = vadd.f32 %v5309_v61, %v5308_v36  ;;  %v5311_v42 = vpop.f32.mrb[238].mxu1 }
 0x3e4   : > { %v5414_v6 = vpop.f32.mrb[8].mxu0  ;;  %v5312_v52 = vpop.f32.mrb[239].mxu1 }
 0x3e5   : > { %v5415_v5 = vpop.f32.mrb[9].mxu0  ;;  %v3648_v41 = vadd.f32 %v5310_v7, %v7976_v9  ;;  %v5313_v47 = vadd.f32 %v5312_v52, %v5311_v42 }
 0x3e6   : > { %v5416_v2 = vadd.f32 %v5415_v5, %v5414_v6  ;;  %v5417_v23 = vpop.f32.mrb[10].mxu0 }
 0x3e7   : > { %v5418_v56 = vpop.f32.mrb[11].mxu0  ;;  %v3651_v16 = vadd.f32 %v5313_v47, %v7979_v8 }
 0x3e8   : > { %v5419_v48 = vadd.f32 %v5418_v56, %v5417_v23  ;;  %v8068_v50 = vadd.f32 %v5416_v2, %v3640_v26 }
 0x3e9   : > { %v5314_v13 = vpop.f32.mrb[240].mxu1 }
 0x3ea   : > { %v8071_v40 = vadd.f32 %v5419_v48, %v3643_v3  ;;  %v5315_v57 = vpop.f32.mrb[241].mxu1 }
 0x3eb   : > { %v5316_v15 = vadd.f32 %v5315_v57, %v5314_v13  ;;  %v5317_v14 = vpop.f32.mrb[242].mxu1 }
 0x3ec   : > { %v5420_v10 = vpop.f32.mrb[12].mxu0  ;;  %v5318_v38 = vpop.f32.mrb[243].mxu1 }
 0x3ed   : > { %v5421_v30 = vpop.f32.mrb[13].mxu0  ;;  %v3656_v9 = vadd.f32 %v5316_v15, %v7983_v34  ;;  %v5319_v58 = vadd.f32 %v5318_v38, %v5317_v14 }
 0x3ee   : > { %v5422_v25 = vadd.f32 %v5421_v30, %v5420_v10  ;;  %v5423_v37 = vpop.f32.mrb[14].mxu0 }
 0x3ef   : > { %v5424_v21 = vpop.f32.mrb[15].mxu0  ;;  %v3659_v8 = vadd.f32 %v5319_v58, %v7985_v62 }
 0x3f0   : > { %v5425_v39 = vadd.f32 %v5424_v21, %v5423_v37  ;;  %v8074_v32 = vadd.f32 %v5422_v25, %v3648_v41 }
 0x3f1   : > { %v5320_v26 = vpop.f32.mrb[244].mxu1 }
 0x3f2   : > { %v8077_v59 = vadd.f32 %v5425_v39, %v3651_v16  ;;  %v5321_v11 = vpop.f32.mrb[245].mxu1 }
 0x3f3   : > { %v5322_v36 = vadd.f32 %v5321_v11, %v5320_v26  ;;  %v5323_v6 = vpop.f32.mrb[246].mxu1 }
 0x3f4   : > { %v5426_v17 = vpop.f32.mrb[16].mxu0  ;;  %v5324_v7 = vpop.f32.mrb[247].mxu1 }
 0x3f5   : > { %v5427_v3 = vpop.f32.mrb[17].mxu0  ;;  %v3664_v34 = vadd.f32 %v5322_v36, %v7989_v63  ;;  %v5325_v2 = vadd.f32 %v5324_v7, %v5323_v6 }
 0x3f6   : > { %v5428_v61 = vadd.f32 %v5427_v3, %v5426_v17  ;;  %v5429_v5 = vpop.f32.mrb[18].mxu0 }
 0x3f7   : > { %v5430_v42 = vpop.f32.mrb[19].mxu0  ;;  %v3667_v62 = vadd.f32 %v5325_v2, %v7991_v20 }
 0x3f8   : > { %v5431_v23 = vadd.f32 %v5430_v42, %v5429_v5  ;;  %v8080_v52 = vadd.f32 %v5428_v61, %v3656_v9 }
 0x3f9   : > { %v5326_v41 = vpop.f32.mrb[248].mxu1 }
 0x3fa   : > { %v8083_v56 = vadd.f32 %v5431_v23, %v3659_v8  ;;  %v5327_v48 = vpop.f32.mrb[249].mxu1 }
 0x3fb   : > { %v5328_v13 = vadd.f32 %v5327_v48, %v5326_v41  ;;  %v5329_v10 = vpop.f32.mrb[250].mxu1 }
 0x3fc   : > { %v5432_v47 = vpop.f32.mrb[20].mxu0  ;;  %v5330_v15 = vpop.f32.mrb[251].mxu1 }
 0x3fd   : > { %v5433_v16 = vpop.f32.mrb[21].mxu0  ;;  %v3672_v63 = vadd.f32 %v5328_v13, %v7995_v4  ;;  %v5331_v25 = vadd.f32 %v5330_v15, %v5329_v10 }
 0x3fe   : > { %v5434_v57 = vadd.f32 %v5433_v16, %v5432_v47  ;;  %v5435_v30 = vpop.f32.mrb[22].mxu0 }
 0x3ff   : > { %v5436_v14 = vpop.f32.mrb[23].mxu0  ;;  %v3675_v20 = vadd.f32 %v5331_v25, %v7997_v29 }
 0x400   : > { %v5437_v37 = vadd.f32 %v5436_v14, %v5435_v30  ;;  %v8086_v38 = vadd.f32 %v5434_v57, %v3664_v34 }
 0x401   : > { %v5332_v9 = vpop.f32.mrb[252].mxu1 }
 0x402   : > { %v8089_v21 = vadd.f32 %v5437_v37, %v3667_v62  ;;  %v5333_v39 = vpop.f32.mrb[253].mxu1 }
 0x403   : > { %v5334_v26 = vadd.f32 %v5333_v39, %v5332_v9  ;;  %v5335_v17 = vpop.f32.mrb[254].mxu1 }
 0x404   : > { %v5438_v58 = vpop.f32.mrb[24].mxu0  ;;  %v5336_v36 = vpop.f32.mrb[255].mxu1 }
 0x405   : > { %v5439_v8 = vpop.f32.mrb[25].mxu0  ;;  %v3680_v6 = vadd.f32 %v5334_v26, %v8002_v22  ;;  %v5337_v61 = vadd.f32 %v5336_v36, %v5335_v17 }
 0x406   : > { %v5440_v11 = vadd.f32 %v5439_v8, %v5438_v58  ;;  %v5441_v3 = vpop.f32.mrb[26].mxu0 }
 0x407   : > { %v5442_v4 = vpop.f32.mrb[27].mxu0  ;;  %v3683_v29 = vadd.f32 %v5337_v61, %v8005_v45 }
 0x408   : > { %v5443_v5 = vadd.f32 %v5442_v4, %v5441_v3  ;;  %v8093_v7 = vadd.f32 %v5440_v11, %v3672_v63 }
 0x409   : > { %v5540_v34 = vpop.f32.mrb[0].mxu1 }
 0x40a   : > { %v8098_v42 = vadd.f32 %v5443_v5, %v3675_v20  ;;  %v3890_v23 = vadd.f32 %v5540_v34, %v8014_v24  ;;  %v3881_v62 = vpop.f32.mrb[1].mxu1 }
 0x40b   : > { %v3882_v47 = vadd.f32 %v3881_v62, %v8008_v51  ;;  %v5541_v22 = vpop.f32.mrb[2].mxu1 }
 0x40c   : > { %v5444_v2 = vpop.f32.mrb[28].mxu0  ;;  %v4010_v13 = vmax.f32 %v3890_v23, 0.0  ;;  %v3893_v10 = vadd.f32 %v5541_v22, %v8017_v33  ;;  %v3884_v57 = vpop.f32.mrb[3].mxu1 }
 0x40d   : > { %v5445_v41 = vpop.f32.mrb[29].mxu0  ;;  %v4008_v30 = vmax.f32 %v3882_v47, 0.0  ;;  %v3885_v15 = vadd.f32 %v3884_v57, %v8011_v28 }
 0x40e   : > { %v5446_v48 = vadd.f32 %v5445_v41, %v5444_v2  ;;  %v5447_v16 = vpop.f32.mrb[30].mxu0  ;;  %4042 = vst [vmem:[%s8104_s6 + $0x10] sm:$0xff] %v4010_v13  ;;  %v4011_v51 = vmax.f32 %v3893_v10, 0.0 }
 0x40f   : > { %v5448_v45 = vpop.f32.mrb[31].mxu0  ;;  %4040 = vst [vmem:[%s8104_s6] sm:$0xff] %v4008_v30  ;;  %v4009_v63 = vmax.f32 %v3885_v15, 0.0 }
 0x410   : > { %v5449_v14 = vadd.f32 %v5448_v45, %v5447_v16  ;;  %v8107_v24 = vadd.f32 %v5446_v48, %v3680_v6  ;;  %4043 = vst [vmem:[%s8104_s6 + $0x18] sm:$0xff] %v4011_v51 }
 0x411   : > { %4041 = vst [vmem:[%s8104_s6 + $0x8] sm:$0xff] %v4009_v63  ;;  %v5544_v28 = vpop.f32.mrb[4].mxu1 }
 0x412   : > { %v8111_v33 = vadd.f32 %v5449_v14, %v3683_v29  ;;  %v3906_v25 = vadd.f32 %v5544_v28, %v8026_v44  ;;  %v3897_v37 = vpop.f32.mrb[5].mxu1 }
 0x413   : > { %v3898_v20 = vadd.f32 %v3897_v37, %v8020_v0  ;;  %v5545_v9 = vpop.f32.mrb[6].mxu1 }
 0x414   : > { %v4014_v58 = vmax.f32 %v3906_v25, 0.0  ;;  %v3909_v39 = vadd.f32 %v5545_v9, %v8029_v55  ;;  %v3900_v8 = vpop.f32.mrb[7].mxu1 }
 0x415   : > { %v4012_v26 = vmax.f32 %v3898_v20, 0.0  ;;  %v3901_v17 = vadd.f32 %v3900_v8, %v8023_v31 }
 0x416   : > { %4046 = vst [vmem:[%s8104_s6 + $0x30] sm:$0xff] %v4014_v58  ;;  %v4015_v11 = vmax.f32 %v3909_v39, 0.0 }
 0x417   : > { %4044 = vst [vmem:[%s8104_s6 + $0x20] sm:$0xff] %v4012_v26  ;;  %v4013_v3 = vmax.f32 %v3901_v17, 0.0 }
 0x418   : > { %4047 = vst [vmem:[%s8104_s6 + $0x38] sm:$0xff] %v4015_v11 }
 0x419   : > { %4045 = vst [vmem:[%s8104_s6 + $0x28] sm:$0xff] %v4013_v3  ;;  %v5548_v44 = vpop.f32.mrb[8].mxu1 }
 0x41a   : > { %v3922_v0 = vadd.f32 %v5548_v44, %v8038_v53  ;;  %v3913_v36 = vpop.f32.mrb[9].mxu1 }
 0x41b   : > { %v3914_v55 = vadd.f32 %v3913_v36, %v8032_v19  ;;  %v5549_v4 = vpop.f32.mrb[10].mxu1 }
 0x41c   : > { %v4018_v6 = vmax.f32 %v3922_v0, 0.0  ;;  %v3925_v31 = vadd.f32 %v5549_v4, %v8041_v18  ;;  %v3916_v61 = vpop.f32.mrb[11].mxu1 }
 0x41d   : > { %v4016_v5 = vmax.f32 %v3914_v55, 0.0  ;;  %v3917_v29 = vadd.f32 %v3916_v61, %v8035_v35 }
 0x41e   : > { %4050 = vst [vmem:[%s8104_s6 + $0x50] sm:$0xff] %v4018_v6  ;;  %v4019_v34 = vmax.f32 %v3925_v31, 0.0 }
 0x41f   : > { %4048 = vst [vmem:[%s8104_s6 + $0x40] sm:$0xff] %v4016_v5  ;;  %v4017_v2 = vmax.f32 %v3917_v29, 0.0 }
 0x420   : > { %4051 = vst [vmem:[%s8104_s6 + $0x58] sm:$0xff] %v4019_v34 }
 0x421   : > { %4049 = vst [vmem:[%s8104_s6 + $0x48] sm:$0xff] %v4017_v2  ;;  %v5552_v53 = vpop.f32.mrb[12].mxu1 }
 0x422   : > { %v3938_v19 = vadd.f32 %v5552_v53, %v8050_v46  ;;  %v3929_v23 = vpop.f32.mrb[13].mxu1 }
 0x423   : > { %v3930_v18 = vadd.f32 %v3929_v23, %v8044_v12  ;;  %v5553_v62 = vpop.f32.mrb[14].mxu1 }
 0x424   : > { %v4022_v41 = vmax.f32 %v3938_v19, 0.0  ;;  %v3941_v35 = vadd.f32 %v5553_v62, %v8053_v60  ;;  %v3932_v47 = vpop.f32.mrb[15].mxu1 }
 0x425   : > { %v4020_v22 = vmax.f32 %v3930_v18, 0.0  ;;  %v3933_v48 = vadd.f32 %v3932_v47, %v8047_v49 }
 0x426   : > { %4054 = vst [vmem:[%s8104_s6 + $0x70] sm:$0xff] %v4022_v41  ;;  %v4023_v16 = vmax.f32 %v3941_v35, 0.0 }
 0x427   : > { %4052 = vst [vmem:[%s8104_s6 + $0x60] sm:$0xff] %v4020_v22  ;;  %v4021_v13 = vmax.f32 %v3933_v48, 0.0 }
 0x428   : > { %4055 = vst [vmem:[%s8104_s6 + $0x78] sm:$0xff] %v4023_v16 }
 0x429   : > { %4053 = vst [vmem:[%s8104_s6 + $0x68] sm:$0xff] %v4021_v13  ;;  %v5556_v46 = vpop.f32.mrb[16].mxu1 }
 0x42a   : > { %v3954_v12 = vadd.f32 %v5556_v46, %v8062_v27  ;;  %v3945_v10 = vpop.f32.mrb[17].mxu1 }
 0x42b   : > { %v3946_v60 = vadd.f32 %v3945_v10, %v8056_v43  ;;  %v5557_v57 = vpop.f32.mrb[18].mxu1 }
 0x42c   : > { %v4026_v45 = vmax.f32 %v3954_v12, 0.0  ;;  %v3957_v49 = vadd.f32 %v5557_v57, %v8065_v54  ;;  %v3948_v30 = vpop.f32.mrb[19].mxu1 }
 0x42d   : > { %v4024_v15 = vmax.f32 %v3946_v60, 0.0  ;;  %v3949_v14 = vadd.f32 %v3948_v30, %v8059_v1 }
 0x42e   : > { %4058 = vst [vmem:[%s8104_s6 + $0x90] sm:$0xff] %v4026_v45  ;;  %v4027_v51 = vmax.f32 %v3957_v49, 0.0 }
 0x42f   : > { %4056 = vst [vmem:[%s8104_s6 + $0x80] sm:$0xff] %v4024_v15  ;;  %v4025_v63 = vmax.f32 %v3949_v14, 0.0 }
 0x430   : > { %4059 = vst [vmem:[%s8104_s6 + $0x98] sm:$0xff] %v4027_v51 }
 0x431   : > { %4057 = vst [vmem:[%s8104_s6 + $0x88] sm:$0xff] %v4025_v63  ;;  %v5560_v27 = vpop.f32.mrb[20].mxu1 }
 0x432   : > { %v3970_v43 = vadd.f32 %v5560_v27, %v8074_v32  ;;  %v3961_v28 = vpop.f32.mrb[21].mxu1 }
 0x433   : > { %v3962_v54 = vadd.f32 %v3961_v28, %v8068_v50  ;;  %v5561_v25 = vpop.f32.mrb[22].mxu1 }
 0x434   : > { %v4030_v37 = vmax.f32 %v3970_v43, 0.0  ;;  %v3973_v1 = vadd.f32 %v5561_v25, %v8077_v59  ;;  %v3964_v20 = vpop.f32.mrb[23].mxu1 }
 0x435   : > { %v4028_v9 = vmax.f32 %v3962_v54, 0.0  ;;  %v3965_v58 = vadd.f32 %v3964_v20, %v8071_v40 }
 0x436   : > { %4062 = vst [vmem:[%s8104_s6 + $0xb0] sm:$0xff] %v4030_v37  ;;  %v4031_v39 = vmax.f32 %v3973_v1, 0.0 }
 0x437   : > { %4060 = vst [vmem:[%s8104_s6 + $0xa0] sm:$0xff] %v4028_v9  ;;  %v4029_v8 = vmax.f32 %v3965_v58, 0.0 }
 0x438   : > { %4063 = vst [vmem:[%s8104_s6 + $0xb8] sm:$0xff] %v4031_v39 }
 0x439   : > { %4061 = vst [vmem:[%s8104_s6 + $0xa8] sm:$0xff] %v4029_v8  ;;  %v5564_v32 = vpop.f32.mrb[24].mxu1 }
 0x43a   : > { %v3986_v50 = vadd.f32 %v5564_v32, %v8086_v38  ;;  %v3977_v26 = vpop.f32.mrb[25].mxu1 }
 0x43b   : > { %v3978_v59 = vadd.f32 %v3977_v26, %v8080_v52  ;;  %v5565_v17 = vpop.f32.mrb[26].mxu1 }
 0x43c   : > { %v4034_v11 = vmax.f32 %v3986_v50, 0.0  ;;  %v3989_v40 = vadd.f32 %v5565_v17, %v8089_v21  ;;  %v3980_v3 = vpop.f32.mrb[27].mxu1 }
 0x43d   : > { %v4032_v44 = vmax.f32 %v3978_v59, 0.0  ;;  %v3981_v0 = vadd.f32 %v3980_v3, %v8083_v56 }
 0x43e   : > { %4066 = vst [vmem:[%s8104_s6 + $0xd0] sm:$0xff] %v4034_v11  ;;  %v4035_v36 = vmax.f32 %v3989_v40, 0.0 }
 0x43f   : > { %4064 = vst [vmem:[%s8104_s6 + $0xc0] sm:$0xff] %v4032_v44  ;;  %v4033_v55 = vmax.f32 %v3981_v0, 0.0 }
 0x440   : > { %4067 = vst [vmem:[%s8104_s6 + $0xd8] sm:$0xff] %v4035_v36 }
 0x441   : > { %4065 = vst [vmem:[%s8104_s6 + $0xc8] sm:$0xff] %v4033_v55  ;;  %v5568_v38 = vpop.f32.mrb[28].mxu1 }
 0x442   : > { %v4002_v52 = vadd.f32 %v5568_v38, %v8107_v24  ;;  %v3993_v4 = vpop.f32.mrb[29].mxu1 }
 0x443   : > { %v3994_v21 = vadd.f32 %v3993_v4, %v8093_v7  ;;  %v5569_v6 = vpop.f32.mrb[30].mxu1 }
 0x444   : > { %v4038_v56 = vmax.f32 %v4002_v52, 0.0  ;;  %v4005_v31 = vadd.f32 %v5569_v6, %v8111_v33  ;;  %v3996_v61 = vpop.f32.mrb[31].mxu1 }
 0x445   : > { %v4036_v5 = vmax.f32 %v3994_v21, 0.0  ;;  %v3997_v29 = vadd.f32 %v3996_v61, %v8098_v42 }
 0x446   : > { %4070 = vst [vmem:[%s8104_s6 + $0xf0] sm:$0xff] %v4038_v56  ;;  %v4039_v34 = vmax.f32 %v4005_v31, 0.0 }
 0x447   : > { %4068 = vst [vmem:[%s8104_s6 + $0xe0] sm:$0xff] %v4036_v5  ;;  %v4037_v7 = vmax.f32 %v3997_v29, 0.0 }
 0x448   : > { %4071 = vst [vmem:[%s8104_s6 + $0xf8] sm:$0xff] %v4039_v34 }
 0x449   : > { %4069 = vst [vmem:[%s8104_s6 + $0xe8] sm:$0xff] %v4037_v7 }
 0x44a   : > { %5848 = shalt.err (!%p5845_p7)
}
 0x44b   : > { %s5849_s16 = scalar_lea.hbm %s8172_s7, 4096  ;;  %s5853_s15 = scalar_lea.hbm %s8227_s5, 8192 }
 0x44c   : > { %p5850_p8 = scmp.ne.s32.totalorder %s8172_s7, %s5849_s16  ;;  %p5854_p1 = scmp.lt.u32.totalorder %s8172_s7, %s8227_s5 }
 0x44d   : > { %p5855_p0 = scmp.lt.u32.totalorder %s5853_s15, %s5849_s16  ;;  %p5857_p6 = scmp.lt.u32.totalorder %s5849_s16, %s8172_s7 }
 0x44e   : > { %p5851_p11 = pnand %p5850_p8, %p8398_p9 }
 0x44f   : > { %p5856_p5 = por %p5855_p0, %p5854_p1 }
 0x450   : > { %p5852_p13 = pneg %p5851_p11 }
 0x451   : > { %p5858_p10 = por %p5857_p6, %p5856_p5 }
 0x453   : > { %p5859_p12 = pnand %p5858_p10, %p5852_p13 }
 0x455   : > { %5862 = shalt.err (!%p5859_p12)
}
 0x456   : > { %s5909_s6 = smov 128   ;;  %s5910_s9 = smov 8  }
 0x457   : > { %5575 = dma.vmem_to_hbm [thread:$0]  (%p8398_p9), %s8174_s10, 4096, %s8172_s7, %s8181_s22, %s5909_s6, %s5909_s6, %s5910_s9  }
 0x458 PF: > { %p5587_p2 = scmp.ge.s32.totalorder %s5901_s21, 2  ;;  %s4101_s11 = sand.u32 1, %s5889_s18  }
 0x459   : > { %p8399_p3 = scmp.ne.s32.totalorder %s8254_s29, 0  ;;  %s4102_s8 = scalar_lea.sflag [#allocation4], %s4101_s11 }
 0x45b   : > { %p5582_p4 = pnand %p5587_p2, %p8399_p3 }
 0x45d   : > { %5884 = dma.done.wait (!%p5582_p4), %s4102_s8, 4096  }
 0x45e   : > { %5886 = vsyncadd (!%p5582_p4), %s4102_s8, 4294963200  ;;  %p16_p7 = scmp.ge.s32.totalorder %s5966_s24, 4   ;;  %s8400_s18 = smov %s5893_s19 }
 0x45f   : > { %s8401_s19 = smov %s5897_s20  ;;  %s8402_s20 = smov %s5977_s27 }
 0x460   : > { %s8403_s21 = smov %s5966_s24  ;;  %18 = sbr.rel (!%p16_p7) target bundleno = 4 (0x4), region = 80 }
 0x467   :  { %4107 = vsyncpa [#allocation3], 1 }
 0x468   :  { %4109 = vsyncpa [#allocation3 + $0x1], 1 }
 0x469   :  { %4110 = vsyncpa [#allocation4], 1 }
 0x46a   :  { %4112 = vsyncpa [#allocation4 + $0x1], 1 }

</bundles_post_ra>
